<compile_context>
chip_gen: v6e
topology: v6e:2x2x1
jax: 0.10.0
libtpu: 0.0.40
codegen_flags: <defaults>
</compile_context>

<pallas_src>
import jax
import jax.numpy as jnp
from jax import lax
from jax.experimental import pallas as pl
from jax.experimental.pallas import tpu as pltpu

_VMEM = pl.BlockSpec(memory_space=pltpu.MemorySpace.VMEM)
_SMEM = pl.BlockSpec(memory_space=pltpu.MemorySpace.SMEM)


def _batchnorm_train(x, gamma, beta):
    # nn.BatchNorm2d(1) in training mode: biased batch statistics over the
    # whole single-channel slab, eps = 1e-5.
    # TODO(synk): running-stat updates (training bookkeeping) are not modeled.
    n = x.size
    mean = jnp.sum(x) / n
    xc = x - mean
    var = jnp.sum(xc * xc) / n
    return xc * (lax.rsqrt(var + 1e-5) * gamma) + beta


def _make_generator_kernel(T, B, M):
    H = 2 * M          # GRU hidden size (per direction)

    def kernel(x_ref,
               bn1_g_ref, bn1_b_ref, bn2_g_ref, bn2_b_ref,
               w1_ref, b1_ref,
               wi0_ref, wh0_ref, bf0_ref, bhn0_ref,
               wi1_ref, wh1_ref, bf1_ref, bhn1_ref,
               w2_ref, b2_ref, w3_ref, b3_ref,
               o_ref,
               gi_ref, hcat_ref):

        # ------------- head: to_log -> BN1 -> Linear(M,2M) -> BN2 -------------
        x = x_ref[...]                                      # (T*B, M) time-major
        log_x = jnp.log10(jnp.maximum(x, 1e-8))
        h = _batchnorm_train(log_x, bn1_g_ref[0, 0], bn1_b_ref[0, 0])
        h = jnp.dot(h, w1_ref[...], preferred_element_type=jnp.float32) + b1_ref[...]
        h = _batchnorm_train(h, bn2_g_ref[0, 0], bn2_b_ref[0, 0])      # (T*B, 2M)

        # ------------- bidirectional 2-layer GRU (PyTorch gate order r,z,n) ---
        def bigru_layer(x_in, wi_ref, wh_ref, bf_ref, bhn_ref):
            # Hoisted input-side gates, both directions in ONE big MXU matmul:
            # columns [0,3H) = fwd (r,z,n), [3H,6H) = bwd (r,z,n); input and
            # hidden r/z biases folded in once.
            gi_ref[...] = (jnp.dot(x_in, wi_ref[...],
                                   preferred_element_type=jnp.float32)
                           + bf_ref[...])                   # (T*B, 6H)
            wh_f = wh_ref[0]                                # (H, 3H) fused gate weights
            wh_b = wh_ref[1]
            bhn_f = jnp.broadcast_to(bhn_ref[0], (B, H))    # hoisted broadcasts
            bhn_b = jnp.broadcast_to(bhn_ref[1], (B, H))

            def gate(gi, gh, bhn, h_prev):
                #   r,z = sigmoid(gi_rz + gh_rz)   (hidden r/z biases folded into gi)
                #   n   = tanh(gi_n + r * (gh_n + bhn))
                #   h'  = (1 - z) * n + z * h_prev
                rz = jax.nn.sigmoid(gi[:, :2 * H] + gh[:, :2 * H])
                r = rz[:, :H]
                z = rz[:, H:]
                n = jnp.tanh(gi[:, 2 * H:] + r * (gh[:, 2 * H:] + bhn))
                return (1.0 - z) * n + z * h_prev

            h_f = jnp.zeros((B, H), jnp.float32)
            h_b = jnp.zeros((B, H), jnp.float32)
            # T is small & static: full unroll with static row offsets gives the
            # scheduler cross-step visibility (fwd/bwd chains interleave) and
            # avoids dynamic-slice lowering.  For large T switch to
            # lax.fori_loop with pl.ds(s*B, B) slices.
            for s in range(T):
                rf = s * B                     # forward reads time s
                rb = (T - 1 - s) * B           # backward reads time T-1-s (in-kernel flip)
                gi_fb = gi_ref[rf:rf + B, :]   # row-block loads, off the serial chain
                gi_bb = gi_ref[rb:rb + B, :]
                gh_f = jnp.dot(h_f, wh_f, preferred_element_type=jnp.float32)
                gh_b = jnp.dot(h_b, wh_b, preferred_element_type=jnp.float32)
                h_f = gate(gi_fb[:, :3 * H], gh_f, bhn_f, h_f)
                h_b = gate(gi_bb[:, 3 * H:], gh_b, bhn_b, h_b)
                # write straight into the combined [fwd | bwd] output buffer
                hcat_ref[rf:rf + B, :H] = h_f
                hcat_ref[rb:rb + B, H:] = h_b
            return hcat_ref[...]               # (T*B, 2H), natural time order

        h = bigru_layer(h, wi0_ref, wh0_ref, bf0_ref, bhn0_ref)   # (T*B, 4M)
        h = bigru_layer(h, wi1_ref, wh1_ref, bf1_ref, bhn1_ref)   # (T*B, 4M)

        # ------------- tail: ReLU -> Linear(4M,2M) -> ReLU -> Linear(2M,M) ----
        h = jnp.maximum(h, 0.0)
        h = jnp.dot(h, w2_ref[...], preferred_element_type=jnp.float32) + b2_ref[...]
        h = jnp.maximum(h, 0.0)
        h = jnp.dot(h, w3_ref[...], preferred_element_type=jnp.float32) + b3_ref[...]
        o_ref[...] = h + log_x                              # residual with log-mel

    return kernel


def _fold_gru_biases(bi, bh, H):
    # bi/bh: (2, 1, 3H) stacked (fwd, bwd), gate order (r, z, n).
    # Hidden-side r/z biases fold into the hoisted input-side gate pre-activations;
    # only the n-gate hidden bias must stay inside r * ( . ).
    bf = bi + jnp.concatenate(
        [bh[..., :2 * H], jnp.zeros_like(bh[..., 2 * H:])], axis=-1)
    bhn = bh[..., 2 * H:]
    return bf, bhn


def _pack_gru_layer(wi, bi, bh, H):
    # wi: (2, Din, 3H) stacked (fwd, bwd).  Build the fused input-side weight
    # (Din, 6H) = [W_fwd | W_bwd] and matching folded bias (1, 6H) so the
    # kernel needs a single big matmul per layer.
    bf, bhn = _fold_gru_biases(bi, bh, H)               # bf: (2,1,3H), bhn: (2,1,H)
    wi_cat = jnp.concatenate([wi[0], wi[1]], axis=-1)   # (Din, 6H)
    bf_cat = jnp.concatenate([bf[0], bf[1]], axis=-1)   # (1, 6H)
    return wi_cat, bf_cat, bhn


def generator_forward(mel_orig, params):
    B, C, T, M = mel_orig.shape          # NCHW, C == 1
    H = 2 * M
    # time-major (T*B, M) slab (row = t*B + b); tiny plain-JAX glue.
    x_tm = (mel_orig.astype(jnp.float32)
            .reshape(B, T, M).transpose(1, 0, 2).reshape(T * B, M))

    wi0, bf0, bhn0 = _pack_gru_layer(params["wi0"], params["bi0"], params["bh0"], H)
    wi1, bf1, bhn1 = _pack_gru_layer(params["wi1"], params["bi1"], params["bh1"], H)

    out2d = pl.pallas_call(
        _make_generator_kernel(T, B, M),
        out_shape=jax.ShapeDtypeStruct((T * B, M), jnp.float32),
        in_specs=[_VMEM] + [_SMEM] * 4 + [_VMEM] * 14,
        out_specs=_VMEM,
        scratch_shapes=[
            pltpu.VMEM((T * B, 6 * H), jnp.float32),   # fused fwd+bwd input gates (reused per layer)
            pltpu.VMEM((T * B, 2 * H), jnp.float32),   # combined [fwd | bwd] hidden sequence
        ],
    )(x_tm,
      params["bn1_g"], params["bn1_b"], params["bn2_g"], params["bn2_b"],
      params["w1"], params["b1"],
      wi0, params["wh0"], bf0, bhn0,
      wi1, params["wh1"], bf1, bhn1,
      params["w2"], params["b2"], params["w3"], params["b3"])

    mel = out2d.reshape(T, B, M).transpose(1, 0, 2).reshape(B, C, T, M)
    return {"mel": mel}


def init_params(key, n_mel):
    M = n_mel
    H = 2 * M

    def dense(k, fan_in, fan_out):
        k1, k2 = jax.random.split(k)
        lim = 1.0 / jnp.sqrt(jnp.float32(fan_in))
        w = jax.random.uniform(k1, (fan_in, fan_out), jnp.float32, -lim, lim)
        b = jax.random.uniform(k2, (1, fan_out), jnp.float32, -lim, lim)
        return w, b

    def gru_layer(k, d_in, h):
        # Stacked (fwd, bwd) weights, gate order (r, z, n) along the output columns.
        # weight_ih xavier-like, weight_hh random stand-in for orthogonal,
        # biases zeroed by BN_GRU.init_weights().
        k1, k2 = jax.random.split(k)
        lim_i = jnp.sqrt(6.0 / jnp.float32(d_in + h))
        wi = jax.random.uniform(k1, (2, d_in, 3 * h), jnp.float32, -lim_i, lim_i)
        lim_h = 1.0 / jnp.sqrt(jnp.float32(h))
        wh = jax.random.uniform(k2, (2, h, 3 * h), jnp.float32, -lim_h, lim_h)
        bi = jnp.zeros((2, 1, 3 * h), jnp.float32)
        bh = jnp.zeros((2, 1, 3 * h), jnp.float32)
        return wi, wh, bi, bh

    keys = jax.random.split(key, 5)
    params = {
        # fresh nn.BatchNorm2d(1): weight=1, bias=0
        "bn1_g": jnp.ones((1, 1), jnp.float32),
        "bn1_b": jnp.zeros((1, 1), jnp.float32),
        "bn2_g": jnp.ones((1, 1), jnp.float32),
        "bn2_b": jnp.zeros((1, 1), jnp.float32),
    }
    params["w1"], params["b1"] = dense(keys[0], M, 2 * M)
    params["w2"], params["b2"] = dense(keys[1], 4 * M, 2 * M)
    params["w3"], params["b3"] = dense(keys[2], 2 * M, M)
    params["wi0"], params["wh0"], params["bi0"], params["bh0"] = gru_layer(keys[3], 2 * M, H)
    params["wi1"], params["wh1"], params["bi1"], params["bh1"] = gru_layer(keys[4], 4 * M, H)
    return params


if __name__ == "__main__":
    B, T, n_mel = 2, 8, 32          # mel_orig: (B, 1, T, n_mel)
    key = jax.random.PRNGKey(0)
    k_in, k_p = jax.random.split(key)
    mel_orig = jax.random.uniform(k_in, (B, 1, T, n_mel), jnp.float32, 0.0, 1.0)
    params = init_params(k_p, n_mel)

    out = jax.jit(generator_forward)(mel_orig, params)
    jax.block_until_ready(out)
    assert out["mel"].shape == (B, 1, T, n_mel)
    assert out["mel"].dtype == jnp.float32
    print("KERNEL_OK")
</pallas_src>

<mosaic_0001>
module attributes {stable_mosaic.version = 11 : i64} {
  func.func @kernel(%arg0: memref<16x32xf32, #tpu.memory_space<vmem>>, %arg1: memref<1x1xf32, #tpu.memory_space<smem>>, %arg2: memref<1x1xf32, #tpu.memory_space<smem>>, %arg3: memref<1x1xf32, #tpu.memory_space<smem>>, %arg4: memref<1x1xf32, #tpu.memory_space<smem>>, %arg5: memref<32x64xf32, #tpu.memory_space<vmem>>, %arg6: memref<1x64xf32, #tpu.memory_space<vmem>>, %arg7: memref<64x384xf32, #tpu.memory_space<vmem>>, %arg8: memref<2x64x192xf32, #tpu.memory_space<vmem>>, %arg9: memref<1x384xf32, #tpu.memory_space<vmem>>, %arg10: memref<2x1x64xf32, #tpu.memory_space<vmem>>, %arg11: memref<128x384xf32, #tpu.memory_space<vmem>>, %arg12: memref<2x64x192xf32, #tpu.memory_space<vmem>>, %arg13: memref<1x384xf32, #tpu.memory_space<vmem>>, %arg14: memref<2x1x64xf32, #tpu.memory_space<vmem>>, %arg15: memref<128x64xf32, #tpu.memory_space<vmem>>, %arg16: memref<1x64xf32, #tpu.memory_space<vmem>>, %arg17: memref<64x32xf32, #tpu.memory_space<vmem>>, %arg18: memref<1x32xf32, #tpu.memory_space<vmem>>, %arg19: memref<16x32xf32, #tpu.memory_space<vmem>>, %arg20: memref<16x384xf32, #tpu.memory_space<vmem>>, %arg21: memref<16x128xf32, #tpu.memory_space<vmem>>) attributes {dimension_semantics = [], scalar_prefetch = 0 : i64, scratch_operands = 2 : i64, tpu.core_type = #tpu.core_type<tc>} {
    %c0 = arith.constant 0 : index
    %c0_0 = arith.constant 0 : index
    %0 = vector.load %arg0[%c0, %c0_0] : memref<16x32xf32, #tpu.memory_space<vmem>>, vector<16x32xf32>
    %cst = arith.constant 9.99999993E-9 : f32
    %1 = vector.broadcast %cst : f32 to vector<16x32xf32>
    %2 = arith.maximumf %0, %1 : vector<16x32xf32>
    %3 = math.log %2 : vector<16x32xf32>
    %cst_1 = arith.constant 0.434294492 : f32
    %4 = vector.broadcast %cst_1 : f32 to vector<16x32xf32>
    %5 = arith.mulf %3, %4 : vector<16x32xf32>
    %c0_2 = arith.constant 0 : index
    %c0_3 = arith.constant 0 : index
    %6 = memref.load %arg1[%c0_2, %c0_3] : memref<1x1xf32, #tpu.memory_space<smem>>
    %c0_4 = arith.constant 0 : index
    %c0_5 = arith.constant 0 : index
    %7 = memref.load %arg2[%c0_4, %c0_5] : memref<1x1xf32, #tpu.memory_space<smem>>
    %8 = vector.shape_cast %5 : vector<16x32xf32> to vector<1x16x32xf32>
    %cst_6 = arith.constant dense<0.000000e+00> : vector<1xf32>
    %9 = vector.multi_reduction <add>, %8, %cst_6 [1, 2] : vector<1x16x32xf32> to vector<1xf32>
    %10 = vector.shape_cast %9 : vector<1xf32> to vector<1x1x1xf32>
    %11 = vector.extract %10[0, 0, 0] : f32 from vector<1x1x1xf32>
    %cst_7 = arith.constant 5.120000e+02 : f32
    %12 = arith.divf %11, %cst_7 : f32
    %13 = vector.broadcast %12 : f32 to vector<16x32xf32>
    %14 = arith.subf %5, %13 : vector<16x32xf32>
    %15 = arith.mulf %14, %14 : vector<16x32xf32>
    %16 = vector.shape_cast %15 : vector<16x32xf32> to vector<1x16x32xf32>
    %cst_8 = arith.constant dense<0.000000e+00> : vector<1xf32>
    %17 = vector.multi_reduction <add>, %16, %cst_8 [1, 2] : vector<1x16x32xf32> to vector<1xf32>
    %18 = vector.shape_cast %17 : vector<1xf32> to vector<1x1x1xf32>
    %19 = vector.extract %18[0, 0, 0] : f32 from vector<1x1x1xf32>
    %cst_9 = arith.constant 5.120000e+02 : f32
    %20 = arith.divf %19, %cst_9 : f32
    %cst_10 = arith.constant 9.99999974E-6 : f32
    %21 = arith.addf %20, %cst_10 : f32
    %22 = math.rsqrt %21 : f32
    %23 = arith.mulf %22, %6 : f32
    %24 = vector.broadcast %23 : f32 to vector<16x32xf32>
    %25 = arith.mulf %14, %24 : vector<16x32xf32>
    %26 = vector.broadcast %7 : f32 to vector<16x32xf32>
    %27 = arith.addf %25, %26 : vector<16x32xf32>
    %c0_11 = arith.constant 0 : index
    %c0_12 = arith.constant 0 : index
    %28 = vector.load %arg5[%c0_11, %c0_12] : memref<32x64xf32, #tpu.memory_space<vmem>>, vector<32x64xf32>
    %cst_13 = arith.constant dense<0.000000e+00> : vector<16x64xf32>
    %29 = tpu.matmul %27, %28, %cst_13 {dimension_numbers = #tpu.dot_dimension_numbers<[1], [0], [0], [1], [0, 0, 1, 1], [], []>} : vector<16x32xf32>, vector<32x64xf32>, vector<16x64xf32> -> vector<16x64xf32>
    %c0_14 = arith.constant 0 : index
    %c0_15 = arith.constant 0 : index
    %30 = vector.load %arg6[%c0_14, %c0_15] : memref<1x64xf32, #tpu.memory_space<vmem>>, vector<1x64xf32>
    %31 = vector.broadcast %30 : vector<1x64xf32> to vector<16x64xf32>
    %32 = arith.addf %29, %31 : vector<16x64xf32>
    %c0_16 = arith.constant 0 : index
    %c0_17 = arith.constant 0 : index
    %33 = memref.load %arg3[%c0_16, %c0_17] : memref<1x1xf32, #tpu.memory_space<smem>>
    %c0_18 = arith.constant 0 : index
    %c0_19 = arith.constant 0 : index
    %34 = memref.load %arg4[%c0_18, %c0_19] : memref<1x1xf32, #tpu.memory_space<smem>>
    %35 = vector.shape_cast %32 : vector<16x64xf32> to vector<1x16x64xf32>
    %cst_20 = arith.constant dense<0.000000e+00> : vector<1xf32>
    %36 = vector.multi_reduction <add>, %35, %cst_20 [1, 2] : vector<1x16x64xf32> to vector<1xf32>
    %37 = vector.shape_cast %36 : vector<1xf32> to vector<1x1x1xf32>
    %38 = vector.extract %37[0, 0, 0] : f32 from vector<1x1x1xf32>
    %cst_21 = arith.constant 1.024000e+03 : f32
    %39 = arith.divf %38, %cst_21 : f32
    %40 = vector.broadcast %39 : f32 to vector<16x64xf32>
    %41 = arith.subf %32, %40 : vector<16x64xf32>
    %42 = arith.mulf %41, %41 : vector<16x64xf32>
    %43 = vector.shape_cast %42 : vector<16x64xf32> to vector<1x16x64xf32>
    %cst_22 = arith.constant dense<0.000000e+00> : vector<1xf32>
    %44 = vector.multi_reduction <add>, %43, %cst_22 [1, 2] : vector<1x16x64xf32> to vector<1xf32>
    %45 = vector.shape_cast %44 : vector<1xf32> to vector<1x1x1xf32>
    %46 = vector.extract %45[0, 0, 0] : f32 from vector<1x1x1xf32>
    %cst_23 = arith.constant 1.024000e+03 : f32
    %47 = arith.divf %46, %cst_23 : f32
    %cst_24 = arith.constant 9.99999974E-6 : f32
    %48 = arith.addf %47, %cst_24 : f32
    %49 = math.rsqrt %48 : f32
    %50 = arith.mulf %49, %33 : f32
    %51 = vector.broadcast %50 : f32 to vector<16x64xf32>
    %52 = arith.mulf %41, %51 : vector<16x64xf32>
    %53 = vector.broadcast %34 : f32 to vector<16x64xf32>
    %54 = arith.addf %52, %53 : vector<16x64xf32>
    %c0_25 = arith.constant 0 : index
    %c0_26 = arith.constant 0 : index
    %55 = vector.load %arg7[%c0_25, %c0_26] : memref<64x384xf32, #tpu.memory_space<vmem>>, vector<64x384xf32>
    %cst_27 = arith.constant dense<0.000000e+00> : vector<16x384xf32>
    %56 = tpu.matmul %54, %55, %cst_27 {dimension_numbers = #tpu.dot_dimension_numbers<[1], [0], [0], [1], [0, 0, 1, 1], [], []>} : vector<16x64xf32>, vector<64x384xf32>, vector<16x384xf32> -> vector<16x384xf32>
    %c0_28 = arith.constant 0 : index
    %c0_29 = arith.constant 0 : index
    %57 = vector.load %arg9[%c0_28, %c0_29] : memref<1x384xf32, #tpu.memory_space<vmem>>, vector<1x384xf32>
    %58 = vector.broadcast %57 : vector<1x384xf32> to vector<16x384xf32>
    %59 = arith.addf %56, %58 : vector<16x384xf32>
    %c0_30 = arith.constant 0 : index
    %c0_31 = arith.constant 0 : index
    %60 = vector.load %arg20[%c0_30, %c0_31] : memref<16x384xf32, #tpu.memory_space<vmem>>, vector<16x384xf32>
    tpu.vector_store %arg20[%c0_30, %c0_31], %59 {strides = array<i32>} : memref<16x384xf32, #tpu.memory_space<vmem>>, vector<16x384xf32>,
    %c0_32 = arith.constant 0 : index
    %c0_33 = arith.constant 0 : index
    %c0_34 = arith.constant 0 : index
    %61 = vector.load %arg8[%c0_32, %c0_33, %c0_34] : memref<2x64x192xf32, #tpu.memory_space<vmem>>, vector<1x64x192xf32>
    %62 = vector.shape_cast %61 : vector<1x64x192xf32> to vector<64x192xf32>
    %c1 = arith.constant 1 : index
    %c0_35 = arith.constant 0 : index
    %c0_36 = arith.constant 0 : index
    %63 = vector.load %arg8[%c1, %c0_35, %c0_36] : memref<2x64x192xf32, #tpu.memory_space<vmem>>, vector<1x64x192xf32>
    %64 = vector.shape_cast %63 : vector<1x64x192xf32> to vector<64x192xf32>
    %c0_37 = arith.constant 0 : index
    %c0_38 = arith.constant 0 : index
    %c0_39 = arith.constant 0 : index
    %65 = vector.load %arg10[%c0_37, %c0_38, %c0_39] : memref<2x1x64xf32, #tpu.memory_space<vmem>>, vector<1x1x64xf32>
    %66 = vector.shape_cast %65 : vector<1x1x64xf32> to vector<1x64xf32>
    %67 = vector.shape_cast %66 : vector<1x64xf32> to vector<1x64xf32>
    %68 = vector.broadcast %67 : vector<1x64xf32> to vector<2x64xf32>
    %c1_40 = arith.constant 1 : index
    %c0_41 = arith.constant 0 : index
    %c0_42 = arith.constant 0 : index
    %69 = vector.load %arg10[%c1_40, %c0_41, %c0_42] : memref<2x1x64xf32, #tpu.memory_space<vmem>>, vector<1x1x64xf32>
    %70 = vector.shape_cast %69 : vector<1x1x64xf32> to vector<1x64xf32>
    %71 = vector.shape_cast %70 : vector<1x64xf32> to vector<1x64xf32>
    %72 = vector.broadcast %71 : vector<1x64xf32> to vector<2x64xf32>
    %cst_43 = arith.constant 0.000000e+00 : f32
    %73 = vector.broadcast %cst_43 : f32 to vector<2x64xf32>
    %cst_44 = arith.constant 0.000000e+00 : f32
    %74 = vector.broadcast %cst_44 : f32 to vector<2x64xf32>
    %c0_45 = arith.constant 0 : index
    %c0_46 = arith.constant 0 : index
    %75 = vector.load %arg20[%c0_45, %c0_46] : memref<16x384xf32, #tpu.memory_space<vmem>>, vector<2x384xf32>
    %c14 = arith.constant 14 : index
    %c0_47 = arith.constant 0 : index
    %76 = vector.load %arg20[%c14, %c0_47] : memref<16x384xf32, #tpu.memory_space<vmem>>, vector<2x384xf32>
    %cst_48 = arith.constant dense<0.000000e+00> : vector<2x192xf32>
    %77 = tpu.matmul %73, %62, %cst_48 {dimension_numbers = #tpu.dot_dimension_numbers<[1], [0], [0], [1], [0, 0, 1, 1], [], []>} : vector<2x64xf32>, vector<64x192xf32>, vector<2x192xf32> -> vector<2x192xf32>
    %cst_49 = arith.constant dense<0.000000e+00> : vector<2x192xf32>
    %78 = tpu.matmul %74, %64, %cst_49 {dimension_numbers = #tpu.dot_dimension_numbers<[1], [0], [0], [1], [0, 0, 1, 1], [], []>} : vector<2x64xf32>, vector<64x192xf32>, vector<2x192xf32> -> vector<2x192xf32>
    %79 = vector.extract_strided_slice %75 {offsets = [0, 0], sizes = [2, 192], strides = [1, 1]} : vector<2x384xf32> to vector<2x192xf32>
    %80 = vector.extract_strided_slice %79 {offsets = [0, 0], sizes = [2, 128], strides = [1, 1]} : vector<2x192xf32> to vector<2x128xf32>
    %81 = vector.extract_strided_slice %77 {offsets = [0, 0], sizes = [2, 128], strides = [1, 1]} : vector<2x192xf32> to vector<2x128xf32>
    %82 = arith.addf %80, %81 : vector<2x128xf32>
    %83 = arith.negf %82 : vector<2x128xf32>
    %84 = math.exp %83 : vector<2x128xf32>
    %cst_50 = arith.constant 1.000000e+00 : f32
    %85 = vector.broadcast %cst_50 : f32 to vector<2x128xf32>
    %86 = arith.addf %85, %84 : vector<2x128xf32>
    %87 = arith.divf %85, %86 : vector<2x128xf32>
    %88 = vector.extract_strided_slice %87 {offsets = [0, 0], sizes = [2, 64], strides = [1, 1]} : vector<2x128xf32> to vector<2x64xf32>
    %89 = vector.extract_strided_slice %87 {offsets = [0, 64], sizes = [2, 64], strides = [1, 1]} : vector<2x128xf32> to vector<2x64xf32>
    %90 = vector.extract_strided_slice %79 {offsets = [0, 128], sizes = [2, 64], strides = [1, 1]} : vector<2x192xf32> to vector<2x64xf32>
    %91 = vector.extract_strided_slice %77 {offsets = [0, 128], sizes = [2, 64], strides = [1, 1]} : vector<2x192xf32> to vector<2x64xf32>
    %92 = arith.addf %91, %68 : vector<2x64xf32>
    %93 = arith.mulf %88, %92 : vector<2x64xf32>
    %94 = arith.addf %90, %93 : vector<2x64xf32>
    %95 = math.tanh %94 : vector<2x64xf32>
    %cst_51 = arith.constant 1.000000e+00 : f32
    %96 = vector.broadcast %cst_51 : f32 to vector<2x64xf32>
    %97 = arith.subf %96, %89 : vector<2x64xf32>
    %98 = arith.mulf %97, %95 : vector<2x64xf32>
    %99 = arith.mulf %89, %73 : vector<2x64xf32>
    %100 = arith.addf %98, %99 : vector<2x64xf32>
    %101 = vector.extract_strided_slice %76 {offsets = [0, 192], sizes = [2, 192], strides = [1, 1]} : vector<2x384xf32> to vector<2x192xf32>
    %102 = vector.extract_strided_slice %101 {offsets = [0, 0], sizes = [2, 128], strides = [1, 1]} : vector<2x192xf32> to vector<2x128xf32>
    %103 = vector.extract_strided_slice %78 {offsets = [0, 0], sizes = [2, 128], strides = [1, 1]} : vector<2x192xf32> to vector<2x128xf32>
    %104 = arith.addf %102, %103 : vector<2x128xf32>
    %105 = arith.negf %104 : vector<2x128xf32>
    %106 = math.exp %105 : vector<2x128xf32>
    %cst_52 = arith.constant 1.000000e+00 : f32
    %107 = vector.broadcast %cst_52 : f32 to vector<2x128xf32>
    %108 = arith.addf %107, %106 : vector<2x128xf32>
    %109 = arith.divf %107, %108 : vector<2x128xf32>
    %110 = vector.extract_strided_slice %109 {offsets = [0, 0], sizes = [2, 64], strides = [1, 1]} : vector<2x128xf32> to vector<2x64xf32>
    %111 = vector.extract_strided_slice %109 {offsets = [0, 64], sizes = [2, 64], strides = [1, 1]} : vector<2x128xf32> to vector<2x64xf32>
    %112 = vector.extract_strided_slice %101 {offsets = [0, 128], sizes = [2, 64], strides = [1, 1]} : vector<2x192xf32> to vector<2x64xf32>
    %113 = vector.extract_strided_slice %78 {offsets = [0, 128], sizes = [2, 64], strides = [1, 1]} : vector<2x192xf32> to vector<2x64xf32>
    %114 = arith.addf %113, %72 : vector<2x64xf32>
    %115 = arith.mulf %110, %114 : vector<2x64xf32>
    %116 = arith.addf %112, %115 : vector<2x64xf32>
    %117 = math.tanh %116 : vector<2x64xf32>
    %cst_53 = arith.constant 1.000000e+00 : f32
    %118 = vector.broadcast %cst_53 : f32 to vector<2x64xf32>
    %119 = arith.subf %118, %111 : vector<2x64xf32>
    %120 = arith.mulf %119, %117 : vector<2x64xf32>
    %121 = arith.mulf %111, %74 : vector<2x64xf32>
    %122 = arith.addf %120, %121 : vector<2x64xf32>
    %c0_54 = arith.constant 0 : index
    %c0_55 = arith.constant 0 : index
    %123 = vector.load %arg21[%c0_54, %c0_55] : memref<16x128xf32, #tpu.memory_space<vmem>>, vector<2x64xf32>
    tpu.vector_store %arg21[%c0_54, %c0_55], %100 {strides = array<i32>} : memref<16x128xf32, #tpu.memory_space<vmem>>, vector<2x64xf32>,
    %c14_56 = arith.constant 14 : index
    %c64 = arith.constant 64 : index
    %124 = vector.load %arg21[%c14_56, %c64] : memref<16x128xf32, #tpu.memory_space<vmem>>, vector<2x64xf32>
    tpu.vector_store %arg21[%c14_56, %c64], %122 {strides = array<i32>} : memref<16x128xf32, #tpu.memory_space<vmem>>, vector<2x64xf32>,
    %c2 = arith.constant 2 : index
    %c0_57 = arith.constant 0 : index
    %125 = vector.load %arg20[%c2, %c0_57] : memref<16x384xf32, #tpu.memory_space<vmem>>, vector<2x384xf32>
    %c12 = arith.constant 12 : index
    %c0_58 = arith.constant 0 : index
    %126 = vector.load %arg20[%c12, %c0_58] : memref<16x384xf32, #tpu.memory_space<vmem>>, vector<2x384xf32>
    %cst_59 = arith.constant dense<0.000000e+00> : vector<2x192xf32>
    %127 = tpu.matmul %100, %62, %cst_59 {dimension_numbers = #tpu.dot_dimension_numbers<[1], [0], [0], [1], [0, 0, 1, 1], [], []>} : vector<2x64xf32>, vector<64x192xf32>, vector<2x192xf32> -> vector<2x192xf32>
    %cst_60 = arith.constant dense<0.000000e+00> : vector<2x192xf32>
    %128 = tpu.matmul %122, %64, %cst_60 {dimension_numbers = #tpu.dot_dimension_numbers<[1], [0], [0], [1], [0, 0, 1, 1], [], []>} : vector<2x64xf32>, vector<64x192xf32>, vector<2x192xf32> -> vector<2x192xf32>
    %129 = vector.extract_strided_slice %125 {offsets = [0, 0], sizes = [2, 192], strides = [1, 1]} : vector<2x384xf32> to vector<2x192xf32>
    %130 = vector.extract_strided_slice %129 {offsets = [0, 0], sizes = [2, 128], strides = [1, 1]} : vector<2x192xf32> to vector<2x128xf32>
    %131 = vector.extract_strided_slice %127 {offsets = [0, 0], sizes = [2, 128], strides = [1, 1]} : vector<2x192xf32> to vector<2x128xf32>
    %132 = arith.addf %130, %131 : vector<2x128xf32>
    %133 = arith.negf %132 : vector<2x128xf32>
    %134 = math.exp %133 : vector<2x128xf32>
    %cst_61 = arith.constant 1.000000e+00 : f32
    %135 = vector.broadcast %cst_61 : f32 to vector<2x128xf32>
    %136 = arith.addf %135, %134 : vector<2x128xf32>
    %137 = arith.divf %135, %136 : vector<2x128xf32>
    %138 = vector.extract_strided_slice %137 {offsets = [0, 0], sizes = [2, 64], strides = [1, 1]} : vector<2x128xf32> to vector<2x64xf32>
    %139 = vector.extract_strided_slice %137 {offsets = [0, 64], sizes = [2, 64], strides = [1, 1]} : vector<2x128xf32> to vector<2x64xf32>
    %140 = vector.extract_strided_slice %129 {offsets = [0, 128], sizes = [2, 64], strides = [1, 1]} : vector<2x192xf32> to vector<2x64xf32>
    %141 = vector.extract_strided_slice %127 {offsets = [0, 128], sizes = [2, 64], strides = [1, 1]} : vector<2x192xf32> to vector<2x64xf32>
    %142 = arith.addf %141, %68 : vector<2x64xf32>
    %143 = arith.mulf %138, %142 : vector<2x64xf32>
    %144 = arith.addf %140, %143 : vector<2x64xf32>
    %145 = math.tanh %144 : vector<2x64xf32>
    %cst_62 = arith.constant 1.000000e+00 : f32
    %146 = vector.broadcast %cst_62 : f32 to vector<2x64xf32>
    %147 = arith.subf %146, %139 : vector<2x64xf32>
    %148 = arith.mulf %147, %145 : vector<2x64xf32>
    %149 = arith.mulf %139, %100 : vector<2x64xf32>
    %150 = arith.addf %148, %149 : vector<2x64xf32>
    %151 = vector.extract_strided_slice %126 {offsets = [0, 192], sizes = [2, 192], strides = [1, 1]} : vector<2x384xf32> to vector<2x192xf32>
    %152 = vector.extract_strided_slice %151 {offsets = [0, 0], sizes = [2, 128], strides = [1, 1]} : vector<2x192xf32> to vector<2x128xf32>
    %153 = vector.extract_strided_slice %128 {offsets = [0, 0], sizes = [2, 128], strides = [1, 1]} : vector<2x192xf32> to vector<2x128xf32>
    %154 = arith.addf %152, %153 : vector<2x128xf32>
    %155 = arith.negf %154 : vector<2x128xf32>
    %156 = math.exp %155 : vector<2x128xf32>
    %cst_63 = arith.constant 1.000000e+00 : f32
    %157 = vector.broadcast %cst_63 : f32 to vector<2x128xf32>
    %158 = arith.addf %157, %156 : vector<2x128xf32>
    %159 = arith.divf %157, %158 : vector<2x128xf32>
    %160 = vector.extract_strided_slice %159 {offsets = [0, 0], sizes = [2, 64], strides = [1, 1]} : vector<2x128xf32> to vector<2x64xf32>
    %161 = vector.extract_strided_slice %159 {offsets = [0, 64], sizes = [2, 64], strides = [1, 1]} : vector<2x128xf32> to vector<2x64xf32>
    %162 = vector.extract_strided_slice %151 {offsets = [0, 128], sizes = [2, 64], strides = [1, 1]} : vector<2x192xf32> to vector<2x64xf32>
    %163 = vector.extract_strided_slice %128 {offsets = [0, 128], sizes = [2, 64], strides = [1, 1]} : vector<2x192xf32> to vector<2x64xf32>
    %164 = arith.addf %163, %72 : vector<2x64xf32>
    %165 = arith.mulf %160, %164 : vector<2x64xf32>
    %166 = arith.addf %162, %165 : vector<2x64xf32>
    %167 = math.tanh %166 : vector<2x64xf32>
    %cst_64 = arith.constant 1.000000e+00 : f32
    %168 = vector.broadcast %cst_64 : f32 to vector<2x64xf32>
    %169 = arith.subf %168, %161 : vector<2x64xf32>
    %170 = arith.mulf %169, %167 : vector<2x64xf32>
    %171 = arith.mulf %161, %122 : vector<2x64xf32>
    %172 = arith.addf %170, %171 : vector<2x64xf32>
    %c2_65 = arith.constant 2 : index
    %c0_66 = arith.constant 0 : index
    %173 = vector.load %arg21[%c2_65, %c0_66] : memref<16x128xf32, #tpu.memory_space<vmem>>, vector<2x64xf32>
    tpu.vector_store %arg21[%c2_65, %c0_66], %150 {strides = array<i32>} : memref<16x128xf32, #tpu.memory_space<vmem>>, vector<2x64xf32>,
    %c12_67 = arith.constant 12 : index
    %c64_68 = arith.constant 64 : index
    %174 = vector.load %arg21[%c12_67, %c64_68] : memref<16x128xf32, #tpu.memory_space<vmem>>, vector<2x64xf32>
    tpu.vector_store %arg21[%c12_67, %c64_68], %172 {strides = array<i32>} : memref<16x128xf32, #tpu.memory_space<vmem>>, vector<2x64xf32>,
    %c4 = arith.constant 4 : index
    %c0_69 = arith.constant 0 : index
    %175 = vector.load %arg20[%c4, %c0_69] : memref<16x384xf32, #tpu.memory_space<vmem>>, vector<2x384xf32>
    %c10 = arith.constant 10 : index
    %c0_70 = arith.constant 0 : index
    %176 = vector.load %arg20[%c10, %c0_70] : memref<16x384xf32, #tpu.memory_space<vmem>>, vector<2x384xf32>
    %cst_71 = arith.constant dense<0.000000e+00> : vector<2x192xf32>
    %177 = tpu.matmul %150, %62, %cst_71 {dimension_numbers = #tpu.dot_dimension_numbers<[1], [0], [0], [1], [0, 0, 1, 1], [], []>} : vector<2x64xf32>, vector<64x192xf32>, vector<2x192xf32> -> vector<2x192xf32>
    %cst_72 = arith.constant dense<0.000000e+00> : vector<2x192xf32>
    %178 = tpu.matmul %172, %64, %cst_72 {dimension_numbers = #tpu.dot_dimension_numbers<[1], [0], [0], [1], [0, 0, 1, 1], [], []>} : vector<2x64xf32>, vector<64x192xf32>, vector<2x192xf32> -> vector<2x192xf32>
    %179 = vector.extract_strided_slice %175 {offsets = [0, 0], sizes = [2, 192], strides = [1, 1]} : vector<2x384xf32> to vector<2x192xf32>
    %180 = vector.extract_strided_slice %179 {offsets = [0, 0], sizes = [2, 128], strides = [1, 1]} : vector<2x192xf32> to vector<2x128xf32>
    %181 = vector.extract_strided_slice %177 {offsets = [0, 0], sizes = [2, 128], strides = [1, 1]} : vector<2x192xf32> to vector<2x128xf32>
    %182 = arith.addf %180, %181 : vector<2x128xf32>
    %183 = arith.negf %182 : vector<2x128xf32>
    %184 = math.exp %183 : vector<2x128xf32>
    %cst_73 = arith.constant 1.000000e+00 : f32
    %185 = vector.broadcast %cst_73 : f32 to vector<2x128xf32>
    %186 = arith.addf %185, %184 : vector<2x128xf32>
    %187 = arith.divf %185, %186 : vector<2x128xf32>
    %188 = vector.extract_strided_slice %187 {offsets = [0, 0], sizes = [2, 64], strides = [1, 1]} : vector<2x128xf32> to vector<2x64xf32>
    %189 = vector.extract_strided_slice %187 {offsets = [0, 64], sizes = [2, 64], strides = [1, 1]} : vector<2x128xf32> to vector<2x64xf32>
    %190 = vector.extract_strided_slice %179 {offsets = [0, 128], sizes = [2, 64], strides = [1, 1]} : vector<2x192xf32> to vector<2x64xf32>
    %191 = vector.extract_strided_slice %177 {offsets = [0, 128], sizes = [2, 64], strides = [1, 1]} : vector<2x192xf32> to vector<2x64xf32>
    %192 = arith.addf %191, %68 : vector<2x64xf32>
    %193 = arith.mulf %188, %192 : vector<2x64xf32>
    %194 = arith.addf %190, %193 : vector<2x64xf32>
    %195 = math.tanh %194 : vector<2x64xf32>
    %cst_74 = arith.constant 1.000000e+00 : f32
    %196 = vector.broadcast %cst_74 : f32 to vector<2x64xf32>
    %197 = arith.subf %196, %189 : vector<2x64xf32>
    %198 = arith.mulf %197, %195 : vector<2x64xf32>
    %199 = arith.mulf %189, %150 : vector<2x64xf32>
    %200 = arith.addf %198, %199 : vector<2x64xf32>
    %201 = vector.extract_strided_slice %176 {offsets = [0, 192], sizes = [2, 192], strides = [1, 1]} : vector<2x384xf32> to vector<2x192xf32>
    %202 = vector.extract_strided_slice %201 {offsets = [0, 0], sizes = [2, 128], strides = [1, 1]} : vector<2x192xf32> to vector<2x128xf32>
    %203 = vector.extract_strided_slice %178 {offsets = [0, 0], sizes = [2, 128], strides = [1, 1]} : vector<2x192xf32> to vector<2x128xf32>
    %204 = arith.addf %202, %203 : vector<2x128xf32>
    %205 = arith.negf %204 : vector<2x128xf32>
    %206 = math.exp %205 : vector<2x128xf32>
    %cst_75 = arith.constant 1.000000e+00 : f32
    %207 = vector.broadcast %cst_75 : f32 to vector<2x128xf32>
    %208 = arith.addf %207, %206 : vector<2x128xf32>
    %209 = arith.divf %207, %208 : vector<2x128xf32>
    %210 = vector.extract_strided_slice %209 {offsets = [0, 0], sizes = [2, 64], strides = [1, 1]} : vector<2x128xf32> to vector<2x64xf32>
    %211 = vector.extract_strided_slice %209 {offsets = [0, 64], sizes = [2, 64], strides = [1, 1]} : vector<2x128xf32> to vector<2x64xf32>
    %212 = vector.extract_strided_slice %201 {offsets = [0, 128], sizes = [2, 64], strides = [1, 1]} : vector<2x192xf32> to vector<2x64xf32>
    %213 = vector.extract_strided_slice %178 {offsets = [0, 128], sizes = [2, 64], strides = [1, 1]} : vector<2x192xf32> to vector<2x64xf32>
    %214 = arith.addf %213, %72 : vector<2x64xf32>
    %215 = arith.mulf %210, %214 : vector<2x64xf32>
    %216 = arith.addf %212, %215 : vector<2x64xf32>
    %217 = math.tanh %216 : vector<2x64xf32>
    %cst_76 = arith.constant 1.000000e+00 : f32
    %218 = vector.broadcast %cst_76 : f32 to vector<2x64xf32>
    %219 = arith.subf %218, %211 : vector<2x64xf32>
    %220 = arith.mulf %219, %217 : vector<2x64xf32>
    %221 = arith.mulf %211, %172 : vector<2x64xf32>
    %222 = arith.addf %220, %221 : vector<2x64xf32>
    %c4_77 = arith.constant 4 : index
    %c0_78 = arith.constant 0 : index
    %223 = vector.load %arg21[%c4_77, %c0_78] : memref<16x128xf32, #tpu.memory_space<vmem>>, vector<2x64xf32>
    tpu.vector_store %arg21[%c4_77, %c0_78], %200 {strides = array<i32>} : memref<16x128xf32, #tpu.memory_space<vmem>>, vector<2x64xf32>,
    %c10_79 = arith.constant 10 : index
    %c64_80 = arith.constant 64 : index
    %224 = vector.load %arg21[%c10_79, %c64_80] : memref<16x128xf32, #tpu.memory_space<vmem>>, vector<2x64xf32>
    tpu.vector_store %arg21[%c10_79, %c64_80], %222 {strides = array<i32>} : memref<16x128xf32, #tpu.memory_space<vmem>>, vector<2x64xf32>,
    %c6 = arith.constant 6 : index
    %c0_81 = arith.constant 0 : index
    %225 = vector.load %arg20[%c6, %c0_81] : memref<16x384xf32, #tpu.memory_space<vmem>>, vector<2x384xf32>
    %c8 = arith.constant 8 : index
    %c0_82 = arith.constant 0 : index
    %226 = vector.load %arg20[%c8, %c0_82] : memref<16x384xf32, #tpu.memory_space<vmem>>, vector<2x384xf32>
    %cst_83 = arith.constant dense<0.000000e+00> : vector<2x192xf32>
    %227 = tpu.matmul %200, %62, %cst_83 {dimension_numbers = #tpu.dot_dimension_numbers<[1], [0], [0], [1], [0, 0, 1, 1], [], []>} : vector<2x64xf32>, vector<64x192xf32>, vector<2x192xf32> -> vector<2x192xf32>
    %cst_84 = arith.constant dense<0.000000e+00> : vector<2x192xf32>
    %228 = tpu.matmul %222, %64, %cst_84 {dimension_numbers = #tpu.dot_dimension_numbers<[1], [0], [0], [1], [0, 0, 1, 1], [], []>} : vector<2x64xf32>, vector<64x192xf32>, vector<2x192xf32> -> vector<2x192xf32>
    %229 = vector.extract_strided_slice %225 {offsets = [0, 0], sizes = [2, 192], strides = [1, 1]} : vector<2x384xf32> to vector<2x192xf32>
    %230 = vector.extract_strided_slice %229 {offsets = [0, 0], sizes = [2, 128], strides = [1, 1]} : vector<2x192xf32> to vector<2x128xf32>
    %231 = vector.extract_strided_slice %227 {offsets = [0, 0], sizes = [2, 128], strides = [1, 1]} : vector<2x192xf32> to vector<2x128xf32>
    %232 = arith.addf %230, %231 : vector<2x128xf32>
    %233 = arith.negf %232 : vector<2x128xf32>
    %234 = math.exp %233 : vector<2x128xf32>
    %cst_85 = arith.constant 1.000000e+00 : f32
    %235 = vector.broadcast %cst_85 : f32 to vector<2x128xf32>
    %236 = arith.addf %235, %234 : vector<2x128xf32>
    %237 = arith.divf %235, %236 : vector<2x128xf32>
    %238 = vector.extract_strided_slice %237 {offsets = [0, 0], sizes = [2, 64], strides = [1, 1]} : vector<2x128xf32> to vector<2x64xf32>
    %239 = vector.extract_strided_slice %237 {offsets = [0, 64], sizes = [2, 64], strides = [1, 1]} : vector<2x128xf32> to vector<2x64xf32>
    %240 = vector.extract_strided_slice %229 {offsets = [0, 128], sizes = [2, 64], strides = [1, 1]} : vector<2x192xf32> to vector<2x64xf32>
    %241 = vector.extract_strided_slice %227 {offsets = [0, 128], sizes = [2, 64], strides = [1, 1]} : vector<2x192xf32> to vector<2x64xf32>
    %242 = arith.addf %241, %68 : vector<2x64xf32>
    %243 = arith.mulf %238, %242 : vector<2x64xf32>
    %244 = arith.addf %240, %243 : vector<2x64xf32>
    %245 = math.tanh %244 : vector<2x64xf32>
    %cst_86 = arith.constant 1.000000e+00 : f32
    %246 = vector.broadcast %cst_86 : f32 to vector<2x64xf32>
    %247 = arith.subf %246, %239 : vector<2x64xf32>
    %248 = arith.mulf %247, %245 : vector<2x64xf32>
    %249 = arith.mulf %239, %200 : vector<2x64xf32>
    %250 = arith.addf %248, %249 : vector<2x64xf32>
    %251 = vector.extract_strided_slice %226 {offsets = [0, 192], sizes = [2, 192], strides = [1, 1]} : vector<2x384xf32> to vector<2x192xf32>
    %252 = vector.extract_strided_slice %251 {offsets = [0, 0], sizes = [2, 128], strides = [1, 1]} : vector<2x192xf32> to vector<2x128xf32>
    %253 = vector.extract_strided_slice %228 {offsets = [0, 0], sizes = [2, 128], strides = [1, 1]} : vector<2x192xf32> to vector<2x128xf32>
    %254 = arith.addf %252, %253 : vector<2x128xf32>
    %255 = arith.negf %254 : vector<2x128xf32>
    %256 = math.exp %255 : vector<2x128xf32>
    %cst_87 = arith.constant 1.000000e+00 : f32
    %257 = vector.broadcast %cst_87 : f32 to vector<2x128xf32>
    %258 = arith.addf %257, %256 : vector<2x128xf32>
    %259 = arith.divf %257, %258 : vector<2x128xf32>
    %260 = vector.extract_strided_slice %259 {offsets = [0, 0], sizes = [2, 64], strides = [1, 1]} : vector<2x128xf32> to vector<2x64xf32>
    %261 = vector.extract_strided_slice %259 {offsets = [0, 64], sizes = [2, 64], strides = [1, 1]} : vector<2x128xf32> to vector<2x64xf32>
    %262 = vector.extract_strided_slice %251 {offsets = [0, 128], sizes = [2, 64], strides = [1, 1]} : vector<2x192xf32> to vector<2x64xf32>
    %263 = vector.extract_strided_slice %228 {offsets = [0, 128], sizes = [2, 64], strides = [1, 1]} : vector<2x192xf32> to vector<2x64xf32>
    %264 = arith.addf %263, %72 : vector<2x64xf32>
    %265 = arith.mulf %260, %264 : vector<2x64xf32>
    %266 = arith.addf %262, %265 : vector<2x64xf32>
    %267 = math.tanh %266 : vector<2x64xf32>
    %cst_88 = arith.constant 1.000000e+00 : f32
    %268 = vector.broadcast %cst_88 : f32 to vector<2x64xf32>
    %269 = arith.subf %268, %261 : vector<2x64xf32>
    %270 = arith.mulf %269, %267 : vector<2x64xf32>
    %271 = arith.mulf %261, %222 : vector<2x64xf32>
    %272 = arith.addf %270, %271 : vector<2x64xf32>
    %c6_89 = arith.constant 6 : index
    %c0_90 = arith.constant 0 : index
    %273 = vector.load %arg21[%c6_89, %c0_90] : memref<16x128xf32, #tpu.memory_space<vmem>>, vector<2x64xf32>
    tpu.vector_store %arg21[%c6_89, %c0_90], %250 {strides = array<i32>} : memref<16x128xf32, #tpu.memory_space<vmem>>, vector<2x64xf32>,
    %c8_91 = arith.constant 8 : index
    %c64_92 = arith.constant 64 : index
    %274 = vector.load %arg21[%c8_91, %c64_92] : memref<16x128xf32, #tpu.memory_space<vmem>>, vector<2x64xf32>
    tpu.vector_store %arg21[%c8_91, %c64_92], %272 {strides = array<i32>} : memref<16x128xf32, #tpu.memory_space<vmem>>, vector<2x64xf32>,
    %c8_93 = arith.constant 8 : index
    %c0_94 = arith.constant 0 : index
    %275 = vector.load %arg20[%c8_93, %c0_94] : memref<16x384xf32, #tpu.memory_space<vmem>>, vector<2x384xf32>
    %c6_95 = arith.constant 6 : index
    %c0_96 = arith.constant 0 : index
    %276 = vector.load %arg20[%c6_95, %c0_96] : memref<16x384xf32, #tpu.memory_space<vmem>>, vector<2x384xf32>
    %cst_97 = arith.constant dense<0.000000e+00> : vector<2x192xf32>
    %277 = tpu.matmul %250, %62, %cst_97 {dimension_numbers = #tpu.dot_dimension_numbers<[1], [0], [0], [1], [0, 0, 1, 1], [], []>} : vector<2x64xf32>, vector<64x192xf32>, vector<2x192xf32> -> vector<2x192xf32>
    %cst_98 = arith.constant dense<0.000000e+00> : vector<2x192xf32>
    %278 = tpu.matmul %272, %64, %cst_98 {dimension_numbers = #tpu.dot_dimension_numbers<[1], [0], [0], [1], [0, 0, 1, 1], [], []>} : vector<2x64xf32>, vector<64x192xf32>, vector<2x192xf32> -> vector<2x192xf32>
    %279 = vector.extract_strided_slice %275 {offsets = [0, 0], sizes = [2, 192], strides = [1, 1]} : vector<2x384xf32> to vector<2x192xf32>
    %280 = vector.extract_strided_slice %279 {offsets = [0, 0], sizes = [2, 128], strides = [1, 1]} : vector<2x192xf32> to vector<2x128xf32>
    %281 = vector.extract_strided_slice %277 {offsets = [0, 0], sizes = [2, 128], strides = [1, 1]} : vector<2x192xf32> to vector<2x128xf32>
    %282 = arith.addf %280, %281 : vector<2x128xf32>
    %283 = arith.negf %282 : vector<2x128xf32>
    %284 = math.exp %283 : vector<2x128xf32>
    %cst_99 = arith.constant 1.000000e+00 : f32
    %285 = vector.broadcast %cst_99 : f32 to vector<2x128xf32>
    %286 = arith.addf %285, %284 : vector<2x128xf32>
    %287 = arith.divf %285, %286 : vector<2x128xf32>
    %288 = vector.extract_strided_slice %287 {offsets = [0, 0], sizes = [2, 64], strides = [1, 1]} : vector<2x128xf32> to vector<2x64xf32>
    %289 = vector.extract_strided_slice %287 {offsets = [0, 64], sizes = [2, 64], strides = [1, 1]} : vector<2x128xf32> to vector<2x64xf32>
    %290 = vector.extract_strided_slice %279 {offsets = [0, 128], sizes = [2, 64], strides = [1, 1]} : vector<2x192xf32> to vector<2x64xf32>
    %291 = vector.extract_strided_slice %277 {offsets = [0, 128], sizes = [2, 64], strides = [1, 1]} : vector<2x192xf32> to vector<2x64xf32>
    %292 = arith.addf %291, %68 : vector<2x64xf32>
    %293 = arith.mulf %288, %292 : vector<2x64xf32>
    %294 = arith.addf %290, %293 : vector<2x64xf32>
    %295 = math.tanh %294 : vector<2x64xf32>
    %cst_100 = arith.constant 1.000000e+00 : f32
    %296 = vector.broadcast %cst_100 : f32 to vector<2x64xf32>
    %297 = arith.subf %296, %289 : vector<2x64xf32>
    %298 = arith.mulf %297, %295 : vector<2x64xf32>
    %299 = arith.mulf %289, %250 : vector<2x64xf32>
    %300 = arith.addf %298, %299 : vector<2x64xf32>
    %301 = vector.extract_strided_slice %276 {offsets = [0, 192], sizes = [2, 192], strides = [1, 1]} : vector<2x384xf32> to vector<2x192xf32>
    %302 = vector.extract_strided_slice %301 {offsets = [0, 0], sizes = [2, 128], strides = [1, 1]} : vector<2x192xf32> to vector<2x128xf32>
    %303 = vector.extract_strided_slice %278 {offsets = [0, 0], sizes = [2, 128], strides = [1, 1]} : vector<2x192xf32> to vector<2x128xf32>
    %304 = arith.addf %302, %303 : vector<2x128xf32>
    %305 = arith.negf %304 : vector<2x128xf32>
    %306 = math.exp %305 : vector<2x128xf32>
    %cst_101 = arith.constant 1.000000e+00 : f32
    %307 = vector.broadcast %cst_101 : f32 to vector<2x128xf32>
    %308 = arith.addf %307, %306 : vector<2x128xf32>
    %309 = arith.divf %307, %308 : vector<2x128xf32>
    %310 = vector.extract_strided_slice %309 {offsets = [0, 0], sizes = [2, 64], strides = [1, 1]} : vector<2x128xf32> to vector<2x64xf32>
    %311 = vector.extract_strided_slice %309 {offsets = [0, 64], sizes = [2, 64], strides = [1, 1]} : vector<2x128xf32> to vector<2x64xf32>
    %312 = vector.extract_strided_slice %301 {offsets = [0, 128], sizes = [2, 64], strides = [1, 1]} : vector<2x192xf32> to vector<2x64xf32>
    %313 = vector.extract_strided_slice %278 {offsets = [0, 128], sizes = [2, 64], strides = [1, 1]} : vector<2x192xf32> to vector<2x64xf32>
    %314 = arith.addf %313, %72 : vector<2x64xf32>
    %315 = arith.mulf %310, %314 : vector<2x64xf32>
    %316 = arith.addf %312, %315 : vector<2x64xf32>
    %317 = math.tanh %316 : vector<2x64xf32>
    %cst_102 = arith.constant 1.000000e+00 : f32
    %318 = vector.broadcast %cst_102 : f32 to vector<2x64xf32>
    %319 = arith.subf %318, %311 : vector<2x64xf32>
    %320 = arith.mulf %319, %317 : vector<2x64xf32>
    %321 = arith.mulf %311, %272 : vector<2x64xf32>
    %322 = arith.addf %320, %321 : vector<2x64xf32>
    %c8_103 = arith.constant 8 : index
    %c0_104 = arith.constant 0 : index
    %323 = vector.load %arg21[%c8_103, %c0_104] : memref<16x128xf32, #tpu.memory_space<vmem>>, vector<2x64xf32>
    tpu.vector_store %arg21[%c8_103, %c0_104], %300 {strides = array<i32>} : memref<16x128xf32, #tpu.memory_space<vmem>>, vector<2x64xf32>,
    %c6_105 = arith.constant 6 : index
    %c64_106 = arith.constant 64 : index
    %324 = vector.load %arg21[%c6_105, %c64_106] : memref<16x128xf32, #tpu.memory_space<vmem>>, vector<2x64xf32>
    tpu.vector_store %arg21[%c6_105, %c64_106], %322 {strides = array<i32>} : memref<16x128xf32, #tpu.memory_space<vmem>>, vector<2x64xf32>,
    %c10_107 = arith.constant 10 : index
    %c0_108 = arith.constant 0 : index
    %325 = vector.load %arg20[%c10_107, %c0_108] : memref<16x384xf32, #tpu.memory_space<vmem>>, vector<2x384xf32>
    %c4_109 = arith.constant 4 : index
    %c0_110 = arith.constant 0 : index
    %326 = vector.load %arg20[%c4_109, %c0_110] : memref<16x384xf32, #tpu.memory_space<vmem>>, vector<2x384xf32>
    %cst_111 = arith.constant dense<0.000000e+00> : vector<2x192xf32>
    %327 = tpu.matmul %300, %62, %cst_111 {dimension_numbers = #tpu.dot_dimension_numbers<[1], [0], [0], [1], [0, 0, 1, 1], [], []>} : vector<2x64xf32>, vector<64x192xf32>, vector<2x192xf32> -> vector<2x192xf32>
    %cst_112 = arith.constant dense<0.000000e+00> : vector<2x192xf32>
    %328 = tpu.matmul %322, %64, %cst_112 {dimension_numbers = #tpu.dot_dimension_numbers<[1], [0], [0], [1], [0, 0, 1, 1], [], []>} : vector<2x64xf32>, vector<64x192xf32>, vector<2x192xf32> -> vector<2x192xf32>
    %329 = vector.extract_strided_slice %325 {offsets = [0, 0], sizes = [2, 192], strides = [1, 1]} : vector<2x384xf32> to vector<2x192xf32>
    %330 = vector.extract_strided_slice %329 {offsets = [0, 0], sizes = [2, 128], strides = [1, 1]} : vector<2x192xf32> to vector<2x128xf32>
    %331 = vector.extract_strided_slice %327 {offsets = [0, 0], sizes = [2, 128], strides = [1, 1]} : vector<2x192xf32> to vector<2x128xf32>
    %332 = arith.addf %330, %331 : vector<2x128xf32>
    %333 = arith.negf %332 : vector<2x128xf32>
    %334 = math.exp %333 : vector<2x128xf32>
    %cst_113 = arith.constant 1.000000e+00 : f32
    %335 = vector.broadcast %cst_113 : f32 to vector<2x128xf32>
    %336 = arith.addf %335, %334 : vector<2x128xf32>
    %337 = arith.divf %335, %336 : vector<2x128xf32>
    %338 = vector.extract_strided_slice %337 {offsets = [0, 0], sizes = [2, 64], strides = [1, 1]} : vector<2x128xf32> to vector<2x64xf32>
    %339 = vector.extract_strided_slice %337 {offsets = [0, 64], sizes = [2, 64], strides = [1, 1]} : vector<2x128xf32> to vector<2x64xf32>
    %340 = vector.extract_strided_slice %329 {offsets = [0, 128], sizes = [2, 64], strides = [1, 1]} : vector<2x192xf32> to vector<2x64xf32>
    %341 = vector.extract_strided_slice %327 {offsets = [0, 128], sizes = [2, 64], strides = [1, 1]} : vector<2x192xf32> to vector<2x64xf32>
    %342 = arith.addf %341, %68 : vector<2x64xf32>
    %343 = arith.mulf %338, %342 : vector<2x64xf32>
    %344 = arith.addf %340, %343 : vector<2x64xf32>
    %345 = math.tanh %344 : vector<2x64xf32>
    %cst_114 = arith.constant 1.000000e+00 : f32
    %346 = vector.broadcast %cst_114 : f32 to vector<2x64xf32>
    %347 = arith.subf %346, %339 : vector<2x64xf32>
    %348 = arith.mulf %347, %345 : vector<2x64xf32>
    %349 = arith.mulf %339, %300 : vector<2x64xf32>
    %350 = arith.addf %348, %349 : vector<2x64xf32>
    %351 = vector.extract_strided_slice %326 {offsets = [0, 192], sizes = [2, 192], strides = [1, 1]} : vector<2x384xf32> to vector<2x192xf32>
    %352 = vector.extract_strided_slice %351 {offsets = [0, 0], sizes = [2, 128], strides = [1, 1]} : vector<2x192xf32> to vector<2x128xf32>
    %353 = vector.extract_strided_slice %328 {offsets = [0, 0], sizes = [2, 128], strides = [1, 1]} : vector<2x192xf32> to vector<2x128xf32>
    %354 = arith.addf %352, %353 : vector<2x128xf32>
    %355 = arith.negf %354 : vector<2x128xf32>
    %356 = math.exp %355 : vector<2x128xf32>
    %cst_115 = arith.constant 1.000000e+00 : f32
    %357 = vector.broadcast %cst_115 : f32 to vector<2x128xf32>
    %358 = arith.addf %357, %356 : vector<2x128xf32>
    %359 = arith.divf %357, %358 : vector<2x128xf32>
    %360 = vector.extract_strided_slice %359 {offsets = [0, 0], sizes = [2, 64], strides = [1, 1]} : vector<2x128xf32> to vector<2x64xf32>
    %361 = vector.extract_strided_slice %359 {offsets = [0, 64], sizes = [2, 64], strides = [1, 1]} : vector<2x128xf32> to vector<2x64xf32>
    %362 = vector.extract_strided_slice %351 {offsets = [0, 128], sizes = [2, 64], strides = [1, 1]} : vector<2x192xf32> to vector<2x64xf32>
    %363 = vector.extract_strided_slice %328 {offsets = [0, 128], sizes = [2, 64], strides = [1, 1]} : vector<2x192xf32> to vector<2x64xf32>
    %364 = arith.addf %363, %72 : vector<2x64xf32>
    %365 = arith.mulf %360, %364 : vector<2x64xf32>
    %366 = arith.addf %362, %365 : vector<2x64xf32>
    %367 = math.tanh %366 : vector<2x64xf32>
    %cst_116 = arith.constant 1.000000e+00 : f32
    %368 = vector.broadcast %cst_116 : f32 to vector<2x64xf32>
    %369 = arith.subf %368, %361 : vector<2x64xf32>
    %370 = arith.mulf %369, %367 : vector<2x64xf32>
    %371 = arith.mulf %361, %322 : vector<2x64xf32>
    %372 = arith.addf %370, %371 : vector<2x64xf32>
    %c10_117 = arith.constant 10 : index
    %c0_118 = arith.constant 0 : index
    %373 = vector.load %arg21[%c10_117, %c0_118] : memref<16x128xf32, #tpu.memory_space<vmem>>, vector<2x64xf32>
    tpu.vector_store %arg21[%c10_117, %c0_118], %350 {strides = array<i32>} : memref<16x128xf32, #tpu.memory_space<vmem>>, vector<2x64xf32>,
    %c4_119 = arith.constant 4 : index
    %c64_120 = arith.constant 64 : index
    %374 = vector.load %arg21[%c4_119, %c64_120] : memref<16x128xf32, #tpu.memory_space<vmem>>, vector<2x64xf32>
    tpu.vector_store %arg21[%c4_119, %c64_120], %372 {strides = array<i32>} : memref<16x128xf32, #tpu.memory_space<vmem>>, vector<2x64xf32>,
    %c12_121 = arith.constant 12 : index
    %c0_122 = arith.constant 0 : index
    %375 = vector.load %arg20[%c12_121, %c0_122] : memref<16x384xf32, #tpu.memory_space<vmem>>, vector<2x384xf32>
    %c2_123 = arith.constant 2 : index
    %c0_124 = arith.constant 0 : index
    %376 = vector.load %arg20[%c2_123, %c0_124] : memref<16x384xf32, #tpu.memory_space<vmem>>, vector<2x384xf32>
    %cst_125 = arith.constant dense<0.000000e+00> : vector<2x192xf32>
    %377 = tpu.matmul %350, %62, %cst_125 {dimension_numbers = #tpu.dot_dimension_numbers<[1], [0], [0], [1], [0, 0, 1, 1], [], []>} : vector<2x64xf32>, vector<64x192xf32>, vector<2x192xf32> -> vector<2x192xf32>
    %cst_126 = arith.constant dense<0.000000e+00> : vector<2x192xf32>
    %378 = tpu.matmul %372, %64, %cst_126 {dimension_numbers = #tpu.dot_dimension_numbers<[1], [0], [0], [1], [0, 0, 1, 1], [], []>} : vector<2x64xf32>, vector<64x192xf32>, vector<2x192xf32> -> vector<2x192xf32>
    %379 = vector.extract_strided_slice %375 {offsets = [0, 0], sizes = [2, 192], strides = [1, 1]} : vector<2x384xf32> to vector<2x192xf32>
    %380 = vector.extract_strided_slice %379 {offsets = [0, 0], sizes = [2, 128], strides = [1, 1]} : vector<2x192xf32> to vector<2x128xf32>
    %381 = vector.extract_strided_slice %377 {offsets = [0, 0], sizes = [2, 128], strides = [1, 1]} : vector<2x192xf32> to vector<2x128xf32>
    %382 = arith.addf %380, %381 : vector<2x128xf32>
    %383 = arith.negf %382 : vector<2x128xf32>
    %384 = math.exp %383 : vector<2x128xf32>
    %cst_127 = arith.constant 1.000000e+00 : f32
    %385 = vector.broadcast %cst_127 : f32 to vector<2x128xf32>
    %386 = arith.addf %385, %384 : vector<2x128xf32>
    %387 = arith.divf %385, %386 : vector<2x128xf32>
    %388 = vector.extract_strided_slice %387 {offsets = [0, 0], sizes = [2, 64], strides = [1, 1]} : vector<2x128xf32> to vector<2x64xf32>
    %389 = vector.extract_strided_slice %387 {offsets = [0, 64], sizes = [2, 64], strides = [1, 1]} : vector<2x128xf32> to vector<2x64xf32>
    %390 = vector.extract_strided_slice %379 {offsets = [0, 128], sizes = [2, 64], strides = [1, 1]} : vector<2x192xf32> to vector<2x64xf32>
    %391 = vector.extract_strided_slice %377 {offsets = [0, 128], sizes = [2, 64], strides = [1, 1]} : vector<2x192xf32> to vector<2x64xf32>
    %392 = arith.addf %391, %68 : vector<2x64xf32>
    %393 = arith.mulf %388, %392 : vector<2x64xf32>
    %394 = arith.addf %390, %393 : vector<2x64xf32>
    %395 = math.tanh %394 : vector<2x64xf32>
    %cst_128 = arith.constant 1.000000e+00 : f32
    %396 = vector.broadcast %cst_128 : f32 to vector<2x64xf32>
    %397 = arith.subf %396, %389 : vector<2x64xf32>
    %398 = arith.mulf %397, %395 : vector<2x64xf32>
    %399 = arith.mulf %389, %350 : vector<2x64xf32>
    %400 = arith.addf %398, %399 : vector<2x64xf32>
    %401 = vector.extract_strided_slice %376 {offsets = [0, 192], sizes = [2, 192], strides = [1, 1]} : vector<2x384xf32> to vector<2x192xf32>
    %402 = vector.extract_strided_slice %401 {offsets = [0, 0], sizes = [2, 128], strides = [1, 1]} : vector<2x192xf32> to vector<2x128xf32>
    %403 = vector.extract_strided_slice %378 {offsets = [0, 0], sizes = [2, 128], strides = [1, 1]} : vector<2x192xf32> to vector<2x128xf32>
    %404 = arith.addf %402, %403 : vector<2x128xf32>
    %405 = arith.negf %404 : vector<2x128xf32>
    %406 = math.exp %405 : vector<2x128xf32>
    %cst_129 = arith.constant 1.000000e+00 : f32
    %407 = vector.broadcast %cst_129 : f32 to vector<2x128xf32>
    %408 = arith.addf %407, %406 : vector<2x128xf32>
    %409 = arith.divf %407, %408 : vector<2x128xf32>
    %410 = vector.extract_strided_slice %409 {offsets = [0, 0], sizes = [2, 64], strides = [1, 1]} : vector<2x128xf32> to vector<2x64xf32>
    %411 = vector.extract_strided_slice %409 {offsets = [0, 64], sizes = [2, 64], strides = [1, 1]} : vector<2x128xf32> to vector<2x64xf32>
    %412 = vector.extract_strided_slice %401 {offsets = [0, 128], sizes = [2, 64], strides = [1, 1]} : vector<2x192xf32> to vector<2x64xf32>
    %413 = vector.extract_strided_slice %378 {offsets = [0, 128], sizes = [2, 64], strides = [1, 1]} : vector<2x192xf32> to vector<2x64xf32>
    %414 = arith.addf %413, %72 : vector<2x64xf32>
    %415 = arith.mulf %410, %414 : vector<2x64xf32>
    %416 = arith.addf %412, %415 : vector<2x64xf32>
    %417 = math.tanh %416 : vector<2x64xf32>
    %cst_130 = arith.constant 1.000000e+00 : f32
    %418 = vector.broadcast %cst_130 : f32 to vector<2x64xf32>
    %419 = arith.subf %418, %411 : vector<2x64xf32>
    %420 = arith.mulf %419, %417 : vector<2x64xf32>
    %421 = arith.mulf %411, %372 : vector<2x64xf32>
    %422 = arith.addf %420, %421 : vector<2x64xf32>
    %c12_131 = arith.constant 12 : index
    %c0_132 = arith.constant 0 : index
    %423 = vector.load %arg21[%c12_131, %c0_132] : memref<16x128xf32, #tpu.memory_space<vmem>>, vector<2x64xf32>
    tpu.vector_store %arg21[%c12_131, %c0_132], %400 {strides = array<i32>} : memref<16x128xf32, #tpu.memory_space<vmem>>, vector<2x64xf32>,
    %c2_133 = arith.constant 2 : index
    %c64_134 = arith.constant 64 : index
    %424 = vector.load %arg21[%c2_133, %c64_134] : memref<16x128xf32, #tpu.memory_space<vmem>>, vector<2x64xf32>
    tpu.vector_store %arg21[%c2_133, %c64_134], %422 {strides = array<i32>} : memref<16x128xf32, #tpu.memory_space<vmem>>, vector<2x64xf32>,
    %c14_135 = arith.constant 14 : index
    %c0_136 = arith.constant 0 : index
    %425 = vector.load %arg20[%c14_135, %c0_136] : memref<16x384xf32, #tpu.memory_space<vmem>>, vector<2x384xf32>
    %c0_137 = arith.constant 0 : index
    %c0_138 = arith.constant 0 : index
    %426 = vector.load %arg20[%c0_137, %c0_138] : memref<16x384xf32, #tpu.memory_space<vmem>>, vector<2x384xf32>
    %cst_139 = arith.constant dense<0.000000e+00> : vector<2x192xf32>
    %427 = tpu.matmul %400, %62, %cst_139 {dimension_numbers = #tpu.dot_dimension_numbers<[1], [0], [0], [1], [0, 0, 1, 1], [], []>} : vector<2x64xf32>, vector<64x192xf32>, vector<2x192xf32> -> vector<2x192xf32>
    %cst_140 = arith.constant dense<0.000000e+00> : vector<2x192xf32>
    %428 = tpu.matmul %422, %64, %cst_140 {dimension_numbers = #tpu.dot_dimension_numbers<[1], [0], [0], [1], [0, 0, 1, 1], [], []>} : vector<2x64xf32>, vector<64x192xf32>, vector<2x192xf32> -> vector<2x192xf32>
    %429 = vector.extract_strided_slice %425 {offsets = [0, 0], sizes = [2, 192], strides = [1, 1]} : vector<2x384xf32> to vector<2x192xf32>
    %430 = vector.extract_strided_slice %429 {offsets = [0, 0], sizes = [2, 128], strides = [1, 1]} : vector<2x192xf32> to vector<2x128xf32>
    %431 = vector.extract_strided_slice %427 {offsets = [0, 0], sizes = [2, 128], strides = [1, 1]} : vector<2x192xf32> to vector<2x128xf32>
    %432 = arith.addf %430, %431 : vector<2x128xf32>
    %433 = arith.negf %432 : vector<2x128xf32>
    %434 = math.exp %433 : vector<2x128xf32>
    %cst_141 = arith.constant 1.000000e+00 : f32
    %435 = vector.broadcast %cst_141 : f32 to vector<2x128xf32>
    %436 = arith.addf %435, %434 : vector<2x128xf32>
    %437 = arith.divf %435, %436 : vector<2x128xf32>
    %438 = vector.extract_strided_slice %437 {offsets = [0, 0], sizes = [2, 64], strides = [1, 1]} : vector<2x128xf32> to vector<2x64xf32>
    %439 = vector.extract_strided_slice %437 {offsets = [0, 64], sizes = [2, 64], strides = [1, 1]} : vector<2x128xf32> to vector<2x64xf32>
    %440 = vector.extract_strided_slice %429 {offsets = [0, 128], sizes = [2, 64], strides = [1, 1]} : vector<2x192xf32> to vector<2x64xf32>
    %441 = vector.extract_strided_slice %427 {offsets = [0, 128], sizes = [2, 64], strides = [1, 1]} : vector<2x192xf32> to vector<2x64xf32>
    %442 = arith.addf %441, %68 : vector<2x64xf32>
    %443 = arith.mulf %438, %442 : vector<2x64xf32>
    %444 = arith.addf %440, %443 : vector<2x64xf32>
    %445 = math.tanh %444 : vector<2x64xf32>
    %cst_142 = arith.constant 1.000000e+00 : f32
    %446 = vector.broadcast %cst_142 : f32 to vector<2x64xf32>
    %447 = arith.subf %446, %439 : vector<2x64xf32>
    %448 = arith.mulf %447, %445 : vector<2x64xf32>
    %449 = arith.mulf %439, %400 : vector<2x64xf32>
    %450 = arith.addf %448, %449 : vector<2x64xf32>
    %451 = vector.extract_strided_slice %426 {offsets = [0, 192], sizes = [2, 192], strides = [1, 1]} : vector<2x384xf32> to vector<2x192xf32>
    %452 = vector.extract_strided_slice %451 {offsets = [0, 0], sizes = [2, 128], strides = [1, 1]} : vector<2x192xf32> to vector<2x128xf32>
    %453 = vector.extract_strided_slice %428 {offsets = [0, 0], sizes = [2, 128], strides = [1, 1]} : vector<2x192xf32> to vector<2x128xf32>
    %454 = arith.addf %452, %453 : vector<2x128xf32>
    %455 = arith.negf %454 : vector<2x128xf32>
    %456 = math.exp %455 : vector<2x128xf32>
    %cst_143 = arith.constant 1.000000e+00 : f32
    %457 = vector.broadcast %cst_143 : f32 to vector<2x128xf32>
    %458 = arith.addf %457, %456 : vector<2x128xf32>
    %459 = arith.divf %457, %458 : vector<2x128xf32>
    %460 = vector.extract_strided_slice %459 {offsets = [0, 0], sizes = [2, 64], strides = [1, 1]} : vector<2x128xf32> to vector<2x64xf32>
    %461 = vector.extract_strided_slice %459 {offsets = [0, 64], sizes = [2, 64], strides = [1, 1]} : vector<2x128xf32> to vector<2x64xf32>
    %462 = vector.extract_strided_slice %451 {offsets = [0, 128], sizes = [2, 64], strides = [1, 1]} : vector<2x192xf32> to vector<2x64xf32>
    %463 = vector.extract_strided_slice %428 {offsets = [0, 128], sizes = [2, 64], strides = [1, 1]} : vector<2x192xf32> to vector<2x64xf32>
    %464 = arith.addf %463, %72 : vector<2x64xf32>
    %465 = arith.mulf %460, %464 : vector<2x64xf32>
    %466 = arith.addf %462, %465 : vector<2x64xf32>
    %467 = math.tanh %466 : vector<2x64xf32>
    %cst_144 = arith.constant 1.000000e+00 : f32
    %468 = vector.broadcast %cst_144 : f32 to vector<2x64xf32>
    %469 = arith.subf %468, %461 : vector<2x64xf32>
    %470 = arith.mulf %469, %467 : vector<2x64xf32>
    %471 = arith.mulf %461, %422 : vector<2x64xf32>
    %472 = arith.addf %470, %471 : vector<2x64xf32>
    %c14_145 = arith.constant 14 : index
    %c0_146 = arith.constant 0 : index
    %473 = vector.load %arg21[%c14_145, %c0_146] : memref<16x128xf32, #tpu.memory_space<vmem>>, vector<2x64xf32>
    tpu.vector_store %arg21[%c14_145, %c0_146], %450 {strides = array<i32>} : memref<16x128xf32, #tpu.memory_space<vmem>>, vector<2x64xf32>,
    %c0_147 = arith.constant 0 : index
    %c64_148 = arith.constant 64 : index
    %474 = vector.load %arg21[%c0_147, %c64_148] : memref<16x128xf32, #tpu.memory_space<vmem>>, vector<2x64xf32>
    tpu.vector_store %arg21[%c0_147, %c64_148], %472 {strides = array<i32>} : memref<16x128xf32, #tpu.memory_space<vmem>>, vector<2x64xf32>,
    %c0_149 = arith.constant 0 : index
    %c0_150 = arith.constant 0 : index
    %475 = vector.load %arg21[%c0_149, %c0_150] : memref<16x128xf32, #tpu.memory_space<vmem>>, vector<16x128xf32>
    %c0_151 = arith.constant 0 : index
    %c0_152 = arith.constant 0 : index
    %476 = vector.load %arg11[%c0_151, %c0_152] : memref<128x384xf32, #tpu.memory_space<vmem>>, vector<128x384xf32>
    %cst_153 = arith.constant dense<0.000000e+00> : vector<16x384xf32>
    %477 = tpu.matmul %475, %476, %cst_153 {dimension_numbers = #tpu.dot_dimension_numbers<[1], [0], [0], [1], [0, 0, 1, 1], [], []>} : vector<16x128xf32>, vector<128x384xf32>, vector<16x384xf32> -> vector<16x384xf32>
    %c0_154 = arith.constant 0 : index
    %c0_155 = arith.constant 0 : index
    %478 = vector.load %arg13[%c0_154, %c0_155] : memref<1x384xf32, #tpu.memory_space<vmem>>, vector<1x384xf32>
    %479 = vector.broadcast %478 : vector<1x384xf32> to vector<16x384xf32>
    %480 = arith.addf %477, %479 : vector<16x384xf32>
    %c0_156 = arith.constant 0 : index
    %c0_157 = arith.constant 0 : index
    %481 = vector.load %arg20[%c0_156, %c0_157] : memref<16x384xf32, #tpu.memory_space<vmem>>, vector<16x384xf32>
    tpu.vector_store %arg20[%c0_156, %c0_157], %480 {strides = array<i32>} : memref<16x384xf32, #tpu.memory_space<vmem>>, vector<16x384xf32>,
    %c0_158 = arith.constant 0 : index
    %c0_159 = arith.constant 0 : index
    %c0_160 = arith.constant 0 : index
    %482 = vector.load %arg12[%c0_158, %c0_159, %c0_160] : memref<2x64x192xf32, #tpu.memory_space<vmem>>, vector<1x64x192xf32>
    %483 = vector.shape_cast %482 : vector<1x64x192xf32> to vector<64x192xf32>
    %c1_161 = arith.constant 1 : index
    %c0_162 = arith.constant 0 : index
    %c0_163 = arith.constant 0 : index
    %484 = vector.load %arg12[%c1_161, %c0_162, %c0_163] : memref<2x64x192xf32, #tpu.memory_space<vmem>>, vector<1x64x192xf32>
    %485 = vector.shape_cast %484 : vector<1x64x192xf32> to vector<64x192xf32>
    %c0_164 = arith.constant 0 : index
    %c0_165 = arith.constant 0 : index
    %c0_166 = arith.constant 0 : index
    %486 = vector.load %arg14[%c0_164, %c0_165, %c0_166] : memref<2x1x64xf32, #tpu.memory_space<vmem>>, vector<1x1x64xf32>
    %487 = vector.shape_cast %486 : vector<1x1x64xf32> to vector<1x64xf32>
    %488 = vector.shape_cast %487 : vector<1x64xf32> to vector<1x64xf32>
    %489 = vector.broadcast %488 : vector<1x64xf32> to vector<2x64xf32>
    %c1_167 = arith.constant 1 : index
    %c0_168 = arith.constant 0 : index
    %c0_169 = arith.constant 0 : index
    %490 = vector.load %arg14[%c1_167, %c0_168, %c0_169] : memref<2x1x64xf32, #tpu.memory_space<vmem>>, vector<1x1x64xf32>
    %491 = vector.shape_cast %490 : vector<1x1x64xf32> to vector<1x64xf32>
    %492 = vector.shape_cast %491 : vector<1x64xf32> to vector<1x64xf32>
    %493 = vector.broadcast %492 : vector<1x64xf32> to vector<2x64xf32>
    %cst_170 = arith.constant 0.000000e+00 : f32
    %494 = vector.broadcast %cst_170 : f32 to vector<2x64xf32>
    %cst_171 = arith.constant 0.000000e+00 : f32
    %495 = vector.broadcast %cst_171 : f32 to vector<2x64xf32>
    %c0_172 = arith.constant 0 : index
    %c0_173 = arith.constant 0 : index
    %496 = vector.load %arg20[%c0_172, %c0_173] : memref<16x384xf32, #tpu.memory_space<vmem>>, vector<2x384xf32>
    %c14_174 = arith.constant 14 : index
    %c0_175 = arith.constant 0 : index
    %497 = vector.load %arg20[%c14_174, %c0_175] : memref<16x384xf32, #tpu.memory_space<vmem>>, vector<2x384xf32>
    %cst_176 = arith.constant dense<0.000000e+00> : vector<2x192xf32>
    %498 = tpu.matmul %494, %483, %cst_176 {dimension_numbers = #tpu.dot_dimension_numbers<[1], [0], [0], [1], [0, 0, 1, 1], [], []>} : vector<2x64xf32>, vector<64x192xf32>, vector<2x192xf32> -> vector<2x192xf32>
    %cst_177 = arith.constant dense<0.000000e+00> : vector<2x192xf32>
    %499 = tpu.matmul %495, %485, %cst_177 {dimension_numbers = #tpu.dot_dimension_numbers<[1], [0], [0], [1], [0, 0, 1, 1], [], []>} : vector<2x64xf32>, vector<64x192xf32>, vector<2x192xf32> -> vector<2x192xf32>
    %500 = vector.extract_strided_slice %496 {offsets = [0, 0], sizes = [2, 192], strides = [1, 1]} : vector<2x384xf32> to vector<2x192xf32>
    %501 = vector.extract_strided_slice %500 {offsets = [0, 0], sizes = [2, 128], strides = [1, 1]} : vector<2x192xf32> to vector<2x128xf32>
    %502 = vector.extract_strided_slice %498 {offsets = [0, 0], sizes = [2, 128], strides = [1, 1]} : vector<2x192xf32> to vector<2x128xf32>
    %503 = arith.addf %501, %502 : vector<2x128xf32>
    %504 = arith.negf %503 : vector<2x128xf32>
    %505 = math.exp %504 : vector<2x128xf32>
    %cst_178 = arith.constant 1.000000e+00 : f32
    %506 = vector.broadcast %cst_178 : f32 to vector<2x128xf32>
    %507 = arith.addf %506, %505 : vector<2x128xf32>
    %508 = arith.divf %506, %507 : vector<2x128xf32>
    %509 = vector.extract_strided_slice %508 {offsets = [0, 0], sizes = [2, 64], strides = [1, 1]} : vector<2x128xf32> to vector<2x64xf32>
    %510 = vector.extract_strided_slice %508 {offsets = [0, 64], sizes = [2, 64], strides = [1, 1]} : vector<2x128xf32> to vector<2x64xf32>
    %511 = vector.extract_strided_slice %500 {offsets = [0, 128], sizes = [2, 64], strides = [1, 1]} : vector<2x192xf32> to vector<2x64xf32>
    %512 = vector.extract_strided_slice %498 {offsets = [0, 128], sizes = [2, 64], strides = [1, 1]} : vector<2x192xf32> to vector<2x64xf32>
    %513 = arith.addf %512, %489 : vector<2x64xf32>
    %514 = arith.mulf %509, %513 : vector<2x64xf32>
    %515 = arith.addf %511, %514 : vector<2x64xf32>
    %516 = math.tanh %515 : vector<2x64xf32>
    %cst_179 = arith.constant 1.000000e+00 : f32
    %517 = vector.broadcast %cst_179 : f32 to vector<2x64xf32>
    %518 = arith.subf %517, %510 : vector<2x64xf32>
    %519 = arith.mulf %518, %516 : vector<2x64xf32>
    %520 = arith.mulf %510, %494 : vector<2x64xf32>
    %521 = arith.addf %519, %520 : vector<2x64xf32>
    %522 = vector.extract_strided_slice %497 {offsets = [0, 192], sizes = [2, 192], strides = [1, 1]} : vector<2x384xf32> to vector<2x192xf32>
    %523 = vector.extract_strided_slice %522 {offsets = [0, 0], sizes = [2, 128], strides = [1, 1]} : vector<2x192xf32> to vector<2x128xf32>
    %524 = vector.extract_strided_slice %499 {offsets = [0, 0], sizes = [2, 128], strides = [1, 1]} : vector<2x192xf32> to vector<2x128xf32>
    %525 = arith.addf %523, %524 : vector<2x128xf32>
    %526 = arith.negf %525 : vector<2x128xf32>
    %527 = math.exp %526 : vector<2x128xf32>
    %cst_180 = arith.constant 1.000000e+00 : f32
    %528 = vector.broadcast %cst_180 : f32 to vector<2x128xf32>
    %529 = arith.addf %528, %527 : vector<2x128xf32>
    %530 = arith.divf %528, %529 : vector<2x128xf32>
    %531 = vector.extract_strided_slice %530 {offsets = [0, 0], sizes = [2, 64], strides = [1, 1]} : vector<2x128xf32> to vector<2x64xf32>
    %532 = vector.extract_strided_slice %530 {offsets = [0, 64], sizes = [2, 64], strides = [1, 1]} : vector<2x128xf32> to vector<2x64xf32>
    %533 = vector.extract_strided_slice %522 {offsets = [0, 128], sizes = [2, 64], strides = [1, 1]} : vector<2x192xf32> to vector<2x64xf32>
    %534 = vector.extract_strided_slice %499 {offsets = [0, 128], sizes = [2, 64], strides = [1, 1]} : vector<2x192xf32> to vector<2x64xf32>
    %535 = arith.addf %534, %493 : vector<2x64xf32>
    %536 = arith.mulf %531, %535 : vector<2x64xf32>
    %537 = arith.addf %533, %536 : vector<2x64xf32>
    %538 = math.tanh %537 : vector<2x64xf32>
    %cst_181 = arith.constant 1.000000e+00 : f32
    %539 = vector.broadcast %cst_181 : f32 to vector<2x64xf32>
    %540 = arith.subf %539, %532 : vector<2x64xf32>
    %541 = arith.mulf %540, %538 : vector<2x64xf32>
    %542 = arith.mulf %532, %495 : vector<2x64xf32>
    %543 = arith.addf %541, %542 : vector<2x64xf32>
    %c0_182 = arith.constant 0 : index
    %c0_183 = arith.constant 0 : index
    %544 = vector.load %arg21[%c0_182, %c0_183] : memref<16x128xf32, #tpu.memory_space<vmem>>, vector<2x64xf32>
    tpu.vector_store %arg21[%c0_182, %c0_183], %521 {strides = array<i32>} : memref<16x128xf32, #tpu.memory_space<vmem>>, vector<2x64xf32>,
    %c14_184 = arith.constant 14 : index
    %c64_185 = arith.constant 64 : index
    %545 = vector.load %arg21[%c14_184, %c64_185] : memref<16x128xf32, #tpu.memory_space<vmem>>, vector<2x64xf32>
    tpu.vector_store %arg21[%c14_184, %c64_185], %543 {strides = array<i32>} : memref<16x128xf32, #tpu.memory_space<vmem>>, vector<2x64xf32>,
    %c2_186 = arith.constant 2 : index
    %c0_187 = arith.constant 0 : index
    %546 = vector.load %arg20[%c2_186, %c0_187] : memref<16x384xf32, #tpu.memory_space<vmem>>, vector<2x384xf32>
    %c12_188 = arith.constant 12 : index
    %c0_189 = arith.constant 0 : index
    %547 = vector.load %arg20[%c12_188, %c0_189] : memref<16x384xf32, #tpu.memory_space<vmem>>, vector<2x384xf32>
    %cst_190 = arith.constant dense<0.000000e+00> : vector<2x192xf32>
    %548 = tpu.matmul %521, %483, %cst_190 {dimension_numbers = #tpu.dot_dimension_numbers<[1], [0], [0], [1], [0, 0, 1, 1], [], []>} : vector<2x64xf32>, vector<64x192xf32>, vector<2x192xf32> -> vector<2x192xf32>
    %cst_191 = arith.constant dense<0.000000e+00> : vector<2x192xf32>
    %549 = tpu.matmul %543, %485, %cst_191 {dimension_numbers = #tpu.dot_dimension_numbers<[1], [0], [0], [1], [0, 0, 1, 1], [], []>} : vector<2x64xf32>, vector<64x192xf32>, vector<2x192xf32> -> vector<2x192xf32>
    %550 = vector.extract_strided_slice %546 {offsets = [0, 0], sizes = [2, 192], strides = [1, 1]} : vector<2x384xf32> to vector<2x192xf32>
    %551 = vector.extract_strided_slice %550 {offsets = [0, 0], sizes = [2, 128], strides = [1, 1]} : vector<2x192xf32> to vector<2x128xf32>
    %552 = vector.extract_strided_slice %548 {offsets = [0, 0], sizes = [2, 128], strides = [1, 1]} : vector<2x192xf32> to vector<2x128xf32>
    %553 = arith.addf %551, %552 : vector<2x128xf32>
    %554 = arith.negf %553 : vector<2x128xf32>
    %555 = math.exp %554 : vector<2x128xf32>
    %cst_192 = arith.constant 1.000000e+00 : f32
    %556 = vector.broadcast %cst_192 : f32 to vector<2x128xf32>
    %557 = arith.addf %556, %555 : vector<2x128xf32>
    %558 = arith.divf %556, %557 : vector<2x128xf32>
    %559 = vector.extract_strided_slice %558 {offsets = [0, 0], sizes = [2, 64], strides = [1, 1]} : vector<2x128xf32> to vector<2x64xf32>
    %560 = vector.extract_strided_slice %558 {offsets = [0, 64], sizes = [2, 64], strides = [1, 1]} : vector<2x128xf32> to vector<2x64xf32>
    %561 = vector.extract_strided_slice %550 {offsets = [0, 128], sizes = [2, 64], strides = [1, 1]} : vector<2x192xf32> to vector<2x64xf32>
    %562 = vector.extract_strided_slice %548 {offsets = [0, 128], sizes = [2, 64], strides = [1, 1]} : vector<2x192xf32> to vector<2x64xf32>
    %563 = arith.addf %562, %489 : vector<2x64xf32>
    %564 = arith.mulf %559, %563 : vector<2x64xf32>
    %565 = arith.addf %561, %564 : vector<2x64xf32>
    %566 = math.tanh %565 : vector<2x64xf32>
    %cst_193 = arith.constant 1.000000e+00 : f32
    %567 = vector.broadcast %cst_193 : f32 to vector<2x64xf32>
    %568 = arith.subf %567, %560 : vector<2x64xf32>
    %569 = arith.mulf %568, %566 : vector<2x64xf32>
    %570 = arith.mulf %560, %521 : vector<2x64xf32>
    %571 = arith.addf %569, %570 : vector<2x64xf32>
    %572 = vector.extract_strided_slice %547 {offsets = [0, 192], sizes = [2, 192], strides = [1, 1]} : vector<2x384xf32> to vector<2x192xf32>
    %573 = vector.extract_strided_slice %572 {offsets = [0, 0], sizes = [2, 128], strides = [1, 1]} : vector<2x192xf32> to vector<2x128xf32>
    %574 = vector.extract_strided_slice %549 {offsets = [0, 0], sizes = [2, 128], strides = [1, 1]} : vector<2x192xf32> to vector<2x128xf32>
    %575 = arith.addf %573, %574 : vector<2x128xf32>
    %576 = arith.negf %575 : vector<2x128xf32>
    %577 = math.exp %576 : vector<2x128xf32>
    %cst_194 = arith.constant 1.000000e+00 : f32
    %578 = vector.broadcast %cst_194 : f32 to vector<2x128xf32>
    %579 = arith.addf %578, %577 : vector<2x128xf32>
    %580 = arith.divf %578, %579 : vector<2x128xf32>
    %581 = vector.extract_strided_slice %580 {offsets = [0, 0], sizes = [2, 64], strides = [1, 1]} : vector<2x128xf32> to vector<2x64xf32>
    %582 = vector.extract_strided_slice %580 {offsets = [0, 64], sizes = [2, 64], strides = [1, 1]} : vector<2x128xf32> to vector<2x64xf32>
    %583 = vector.extract_strided_slice %572 {offsets = [0, 128], sizes = [2, 64], strides = [1, 1]} : vector<2x192xf32> to vector<2x64xf32>
    %584 = vector.extract_strided_slice %549 {offsets = [0, 128], sizes = [2, 64], strides = [1, 1]} : vector<2x192xf32> to vector<2x64xf32>
    %585 = arith.addf %584, %493 : vector<2x64xf32>
    %586 = arith.mulf %581, %585 : vector<2x64xf32>
    %587 = arith.addf %583, %586 : vector<2x64xf32>
    %588 = math.tanh %587 : vector<2x64xf32>
    %cst_195 = arith.constant 1.000000e+00 : f32
    %589 = vector.broadcast %cst_195 : f32 to vector<2x64xf32>
    %590 = arith.subf %589, %582 : vector<2x64xf32>
    %591 = arith.mulf %590, %588 : vector<2x64xf32>
    %592 = arith.mulf %582, %543 : vector<2x64xf32>
    %593 = arith.addf %591, %592 : vector<2x64xf32>
    %c2_196 = arith.constant 2 : index
    %c0_197 = arith.constant 0 : index
    %594 = vector.load %arg21[%c2_196, %c0_197] : memref<16x128xf32, #tpu.memory_space<vmem>>, vector<2x64xf32>
    tpu.vector_store %arg21[%c2_196, %c0_197], %571 {strides = array<i32>} : memref<16x128xf32, #tpu.memory_space<vmem>>, vector<2x64xf32>,
    %c12_198 = arith.constant 12 : index
    %c64_199 = arith.constant 64 : index
    %595 = vector.load %arg21[%c12_198, %c64_199] : memref<16x128xf32, #tpu.memory_space<vmem>>, vector<2x64xf32>
    tpu.vector_store %arg21[%c12_198, %c64_199], %593 {strides = array<i32>} : memref<16x128xf32, #tpu.memory_space<vmem>>, vector<2x64xf32>,
    %c4_200 = arith.constant 4 : index
    %c0_201 = arith.constant 0 : index
    %596 = vector.load %arg20[%c4_200, %c0_201] : memref<16x384xf32, #tpu.memory_space<vmem>>, vector<2x384xf32>
    %c10_202 = arith.constant 10 : index
    %c0_203 = arith.constant 0 : index
    %597 = vector.load %arg20[%c10_202, %c0_203] : memref<16x384xf32, #tpu.memory_space<vmem>>, vector<2x384xf32>
    %cst_204 = arith.constant dense<0.000000e+00> : vector<2x192xf32>
    %598 = tpu.matmul %571, %483, %cst_204 {dimension_numbers = #tpu.dot_dimension_numbers<[1], [0], [0], [1], [0, 0, 1, 1], [], []>} : vector<2x64xf32>, vector<64x192xf32>, vector<2x192xf32> -> vector<2x192xf32>
    %cst_205 = arith.constant dense<0.000000e+00> : vector<2x192xf32>
    %599 = tpu.matmul %593, %485, %cst_205 {dimension_numbers = #tpu.dot_dimension_numbers<[1], [0], [0], [1], [0, 0, 1, 1], [], []>} : vector<2x64xf32>, vector<64x192xf32>, vector<2x192xf32> -> vector<2x192xf32>
    %600 = vector.extract_strided_slice %596 {offsets = [0, 0], sizes = [2, 192], strides = [1, 1]} : vector<2x384xf32> to vector<2x192xf32>
    %601 = vector.extract_strided_slice %600 {offsets = [0, 0], sizes = [2, 128], strides = [1, 1]} : vector<2x192xf32> to vector<2x128xf32>
    %602 = vector.extract_strided_slice %598 {offsets = [0, 0], sizes = [2, 128], strides = [1, 1]} : vector<2x192xf32> to vector<2x128xf32>
    %603 = arith.addf %601, %602 : vector<2x128xf32>
    %604 = arith.negf %603 : vector<2x128xf32>
    %605 = math.exp %604 : vector<2x128xf32>
    %cst_206 = arith.constant 1.000000e+00 : f32
    %606 = vector.broadcast %cst_206 : f32 to vector<2x128xf32>
    %607 = arith.addf %606, %605 : vector<2x128xf32>
    %608 = arith.divf %606, %607 : vector<2x128xf32>
    %609 = vector.extract_strided_slice %608 {offsets = [0, 0], sizes = [2, 64], strides = [1, 1]} : vector<2x128xf32> to vector<2x64xf32>
    %610 = vector.extract_strided_slice %608 {offsets = [0, 64], sizes = [2, 64], strides = [1, 1]} : vector<2x128xf32> to vector<2x64xf32>
    %611 = vector.extract_strided_slice %600 {offsets = [0, 128], sizes = [2, 64], strides = [1, 1]} : vector<2x192xf32> to vector<2x64xf32>
    %612 = vector.extract_strided_slice %598 {offsets = [0, 128], sizes = [2, 64], strides = [1, 1]} : vector<2x192xf32> to vector<2x64xf32>
    %613 = arith.addf %612, %489 : vector<2x64xf32>
    %614 = arith.mulf %609, %613 : vector<2x64xf32>
    %615 = arith.addf %611, %614 : vector<2x64xf32>
    %616 = math.tanh %615 : vector<2x64xf32>
    %cst_207 = arith.constant 1.000000e+00 : f32
    %617 = vector.broadcast %cst_207 : f32 to vector<2x64xf32>
    %618 = arith.subf %617, %610 : vector<2x64xf32>
    %619 = arith.mulf %618, %616 : vector<2x64xf32>
    %620 = arith.mulf %610, %571 : vector<2x64xf32>
    %621 = arith.addf %619, %620 : vector<2x64xf32>
    %622 = vector.extract_strided_slice %597 {offsets = [0, 192], sizes = [2, 192], strides = [1, 1]} : vector<2x384xf32> to vector<2x192xf32>
    %623 = vector.extract_strided_slice %622 {offsets = [0, 0], sizes = [2, 128], strides = [1, 1]} : vector<2x192xf32> to vector<2x128xf32>
    %624 = vector.extract_strided_slice %599 {offsets = [0, 0], sizes = [2, 128], strides = [1, 1]} : vector<2x192xf32> to vector<2x128xf32>
    %625 = arith.addf %623, %624 : vector<2x128xf32>
    %626 = arith.negf %625 : vector<2x128xf32>
    %627 = math.exp %626 : vector<2x128xf32>
    %cst_208 = arith.constant 1.000000e+00 : f32
    %628 = vector.broadcast %cst_208 : f32 to vector<2x128xf32>
    %629 = arith.addf %628, %627 : vector<2x128xf32>
    %630 = arith.divf %628, %629 : vector<2x128xf32>
    %631 = vector.extract_strided_slice %630 {offsets = [0, 0], sizes = [2, 64], strides = [1, 1]} : vector<2x128xf32> to vector<2x64xf32>
    %632 = vector.extract_strided_slice %630 {offsets = [0, 64], sizes = [2, 64], strides = [1, 1]} : vector<2x128xf32> to vector<2x64xf32>
    %633 = vector.extract_strided_slice %622 {offsets = [0, 128], sizes = [2, 64], strides = [1, 1]} : vector<2x192xf32> to vector<2x64xf32>
    %634 = vector.extract_strided_slice %599 {offsets = [0, 128], sizes = [2, 64], strides = [1, 1]} : vector<2x192xf32> to vector<2x64xf32>
    %635 = arith.addf %634, %493 : vector<2x64xf32>
    %636 = arith.mulf %631, %635 : vector<2x64xf32>
    %637 = arith.addf %633, %636 : vector<2x64xf32>
    %638 = math.tanh %637 : vector<2x64xf32>
    %cst_209 = arith.constant 1.000000e+00 : f32
    %639 = vector.broadcast %cst_209 : f32 to vector<2x64xf32>
    %640 = arith.subf %639, %632 : vector<2x64xf32>
    %641 = arith.mulf %640, %638 : vector<2x64xf32>
    %642 = arith.mulf %632, %593 : vector<2x64xf32>
    %643 = arith.addf %641, %642 : vector<2x64xf32>
    %c4_210 = arith.constant 4 : index
    %c0_211 = arith.constant 0 : index
    %644 = vector.load %arg21[%c4_210, %c0_211] : memref<16x128xf32, #tpu.memory_space<vmem>>, vector<2x64xf32>
    tpu.vector_store %arg21[%c4_210, %c0_211], %621 {strides = array<i32>} : memref<16x128xf32, #tpu.memory_space<vmem>>, vector<2x64xf32>,
    %c10_212 = arith.constant 10 : index
    %c64_213 = arith.constant 64 : index
    %645 = vector.load %arg21[%c10_212, %c64_213] : memref<16x128xf32, #tpu.memory_space<vmem>>, vector<2x64xf32>
    tpu.vector_store %arg21[%c10_212, %c64_213], %643 {strides = array<i32>} : memref<16x128xf32, #tpu.memory_space<vmem>>, vector<2x64xf32>,
    %c6_214 = arith.constant 6 : index
    %c0_215 = arith.constant 0 : index
    %646 = vector.load %arg20[%c6_214, %c0_215] : memref<16x384xf32, #tpu.memory_space<vmem>>, vector<2x384xf32>
    %c8_216 = arith.constant 8 : index
    %c0_217 = arith.constant 0 : index
    %647 = vector.load %arg20[%c8_216, %c0_217] : memref<16x384xf32, #tpu.memory_space<vmem>>, vector<2x384xf32>
    %cst_218 = arith.constant dense<0.000000e+00> : vector<2x192xf32>
    %648 = tpu.matmul %621, %483, %cst_218 {dimension_numbers = #tpu.dot_dimension_numbers<[1], [0], [0], [1], [0, 0, 1, 1], [], []>} : vector<2x64xf32>, vector<64x192xf32>, vector<2x192xf32> -> vector<2x192xf32>
    %cst_219 = arith.constant dense<0.000000e+00> : vector<2x192xf32>
    %649 = tpu.matmul %643, %485, %cst_219 {dimension_numbers = #tpu.dot_dimension_numbers<[1], [0], [0], [1], [0, 0, 1, 1], [], []>} : vector<2x64xf32>, vector<64x192xf32>, vector<2x192xf32> -> vector<2x192xf32>
    %650 = vector.extract_strided_slice %646 {offsets = [0, 0], sizes = [2, 192], strides = [1, 1]} : vector<2x384xf32> to vector<2x192xf32>
    %651 = vector.extract_strided_slice %650 {offsets = [0, 0], sizes = [2, 128], strides = [1, 1]} : vector<2x192xf32> to vector<2x128xf32>
    %652 = vector.extract_strided_slice %648 {offsets = [0, 0], sizes = [2, 128], strides = [1, 1]} : vector<2x192xf32> to vector<2x128xf32>
    %653 = arith.addf %651, %652 : vector<2x128xf32>
    %654 = arith.negf %653 : vector<2x128xf32>
    %655 = math.exp %654 : vector<2x128xf32>
    %cst_220 = arith.constant 1.000000e+00 : f32
    %656 = vector.broadcast %cst_220 : f32 to vector<2x128xf32>
    %657 = arith.addf %656, %655 : vector<2x128xf32>
    %658 = arith.divf %656, %657 : vector<2x128xf32>
    %659 = vector.extract_strided_slice %658 {offsets = [0, 0], sizes = [2, 64], strides = [1, 1]} : vector<2x128xf32> to vector<2x64xf32>
    %660 = vector.extract_strided_slice %658 {offsets = [0, 64], sizes = [2, 64], strides = [1, 1]} : vector<2x128xf32> to vector<2x64xf32>
    %661 = vector.extract_strided_slice %650 {offsets = [0, 128], sizes = [2, 64], strides = [1, 1]} : vector<2x192xf32> to vector<2x64xf32>
    %662 = vector.extract_strided_slice %648 {offsets = [0, 128], sizes = [2, 64], strides = [1, 1]} : vector<2x192xf32> to vector<2x64xf32>
    %663 = arith.addf %662, %489 : vector<2x64xf32>
    %664 = arith.mulf %659, %663 : vector<2x64xf32>
    %665 = arith.addf %661, %664 : vector<2x64xf32>
    %666 = math.tanh %665 : vector<2x64xf32>
    %cst_221 = arith.constant 1.000000e+00 : f32
    %667 = vector.broadcast %cst_221 : f32 to vector<2x64xf32>
    %668 = arith.subf %667, %660 : vector<2x64xf32>
    %669 = arith.mulf %668, %666 : vector<2x64xf32>
    %670 = arith.mulf %660, %621 : vector<2x64xf32>
    %671 = arith.addf %669, %670 : vector<2x64xf32>
    %672 = vector.extract_strided_slice %647 {offsets = [0, 192], sizes = [2, 192], strides = [1, 1]} : vector<2x384xf32> to vector<2x192xf32>
    %673 = vector.extract_strided_slice %672 {offsets = [0, 0], sizes = [2, 128], strides = [1, 1]} : vector<2x192xf32> to vector<2x128xf32>
    %674 = vector.extract_strided_slice %649 {offsets = [0, 0], sizes = [2, 128], strides = [1, 1]} : vector<2x192xf32> to vector<2x128xf32>
    %675 = arith.addf %673, %674 : vector<2x128xf32>
    %676 = arith.negf %675 : vector<2x128xf32>
    %677 = math.exp %676 : vector<2x128xf32>
    %cst_222 = arith.constant 1.000000e+00 : f32
    %678 = vector.broadcast %cst_222 : f32 to vector<2x128xf32>
    %679 = arith.addf %678, %677 : vector<2x128xf32>
    %680 = arith.divf %678, %679 : vector<2x128xf32>
    %681 = vector.extract_strided_slice %680 {offsets = [0, 0], sizes = [2, 64], strides = [1, 1]} : vector<2x128xf32> to vector<2x64xf32>
    %682 = vector.extract_strided_slice %680 {offsets = [0, 64], sizes = [2, 64], strides = [1, 1]} : vector<2x128xf32> to vector<2x64xf32>
    %683 = vector.extract_strided_slice %672 {offsets = [0, 128], sizes = [2, 64], strides = [1, 1]} : vector<2x192xf32> to vector<2x64xf32>
    %684 = vector.extract_strided_slice %649 {offsets = [0, 128], sizes = [2, 64], strides = [1, 1]} : vector<2x192xf32> to vector<2x64xf32>
    %685 = arith.addf %684, %493 : vector<2x64xf32>
    %686 = arith.mulf %681, %685 : vector<2x64xf32>
    %687 = arith.addf %683, %686 : vector<2x64xf32>
    %688 = math.tanh %687 : vector<2x64xf32>
    %cst_223 = arith.constant 1.000000e+00 : f32
    %689 = vector.broadcast %cst_223 : f32 to vector<2x64xf32>
    %690 = arith.subf %689, %682 : vector<2x64xf32>
    %691 = arith.mulf %690, %688 : vector<2x64xf32>
    %692 = arith.mulf %682, %643 : vector<2x64xf32>
    %693 = arith.addf %691, %692 : vector<2x64xf32>
    %c6_224 = arith.constant 6 : index
    %c0_225 = arith.constant 0 : index
    %694 = vector.load %arg21[%c6_224, %c0_225] : memref<16x128xf32, #tpu.memory_space<vmem>>, vector<2x64xf32>
    tpu.vector_store %arg21[%c6_224, %c0_225], %671 {strides = array<i32>} : memref<16x128xf32, #tpu.memory_space<vmem>>, vector<2x64xf32>,
    %c8_226 = arith.constant 8 : index
    %c64_227 = arith.constant 64 : index
    %695 = vector.load %arg21[%c8_226, %c64_227] : memref<16x128xf32, #tpu.memory_space<vmem>>, vector<2x64xf32>
    tpu.vector_store %arg21[%c8_226, %c64_227], %693 {strides = array<i32>} : memref<16x128xf32, #tpu.memory_space<vmem>>, vector<2x64xf32>,
    %c8_228 = arith.constant 8 : index
    %c0_229 = arith.constant 0 : index
    %696 = vector.load %arg20[%c8_228, %c0_229] : memref<16x384xf32, #tpu.memory_space<vmem>>, vector<2x384xf32>
    %c6_230 = arith.constant 6 : index
    %c0_231 = arith.constant 0 : index
    %697 = vector.load %arg20[%c6_230, %c0_231] : memref<16x384xf32, #tpu.memory_space<vmem>>, vector<2x384xf32>
    %cst_232 = arith.constant dense<0.000000e+00> : vector<2x192xf32>
    %698 = tpu.matmul %671, %483, %cst_232 {dimension_numbers = #tpu.dot_dimension_numbers<[1], [0], [0], [1], [0, 0, 1, 1], [], []>} : vector<2x64xf32>, vector<64x192xf32>, vector<2x192xf32> -> vector<2x192xf32>
    %cst_233 = arith.constant dense<0.000000e+00> : vector<2x192xf32>
    %699 = tpu.matmul %693, %485, %cst_233 {dimension_numbers = #tpu.dot_dimension_numbers<[1], [0], [0], [1], [0, 0, 1, 1], [], []>} : vector<2x64xf32>, vector<64x192xf32>, vector<2x192xf32> -> vector<2x192xf32>
    %700 = vector.extract_strided_slice %696 {offsets = [0, 0], sizes = [2, 192], strides = [1, 1]} : vector<2x384xf32> to vector<2x192xf32>
    %701 = vector.extract_strided_slice %700 {offsets = [0, 0], sizes = [2, 128], strides = [1, 1]} : vector<2x192xf32> to vector<2x128xf32>
    %702 = vector.extract_strided_slice %698 {offsets = [0, 0], sizes = [2, 128], strides = [1, 1]} : vector<2x192xf32> to vector<2x128xf32>
    %703 = arith.addf %701, %702 : vector<2x128xf32>
    %704 = arith.negf %703 : vector<2x128xf32>
    %705 = math.exp %704 : vector<2x128xf32>
    %cst_234 = arith.constant 1.000000e+00 : f32
    %706 = vector.broadcast %cst_234 : f32 to vector<2x128xf32>
    %707 = arith.addf %706, %705 : vector<2x128xf32>
    %708 = arith.divf %706, %707 : vector<2x128xf32>
    %709 = vector.extract_strided_slice %708 {offsets = [0, 0], sizes = [2, 64], strides = [1, 1]} : vector<2x128xf32> to vector<2x64xf32>
    %710 = vector.extract_strided_slice %708 {offsets = [0, 64], sizes = [2, 64], strides = [1, 1]} : vector<2x128xf32> to vector<2x64xf32>
    %711 = vector.extract_strided_slice %700 {offsets = [0, 128], sizes = [2, 64], strides = [1, 1]} : vector<2x192xf32> to vector<2x64xf32>
    %712 = vector.extract_strided_slice %698 {offsets = [0, 128], sizes = [2, 64], strides = [1, 1]} : vector<2x192xf32> to vector<2x64xf32>
    %713 = arith.addf %712, %489 : vector<2x64xf32>
    %714 = arith.mulf %709, %713 : vector<2x64xf32>
    %715 = arith.addf %711, %714 : vector<2x64xf32>
    %716 = math.tanh %715 : vector<2x64xf32>
    %cst_235 = arith.constant 1.000000e+00 : f32
    %717 = vector.broadcast %cst_235 : f32 to vector<2x64xf32>
    %718 = arith.subf %717, %710 : vector<2x64xf32>
    %719 = arith.mulf %718, %716 : vector<2x64xf32>
    %720 = arith.mulf %710, %671 : vector<2x64xf32>
    %721 = arith.addf %719, %720 : vector<2x64xf32>
    %722 = vector.extract_strided_slice %697 {offsets = [0, 192], sizes = [2, 192], strides = [1, 1]} : vector<2x384xf32> to vector<2x192xf32>
    %723 = vector.extract_strided_slice %722 {offsets = [0, 0], sizes = [2, 128], strides = [1, 1]} : vector<2x192xf32> to vector<2x128xf32>
    %724 = vector.extract_strided_slice %699 {offsets = [0, 0], sizes = [2, 128], strides = [1, 1]} : vector<2x192xf32> to vector<2x128xf32>
    %725 = arith.addf %723, %724 : vector<2x128xf32>
    %726 = arith.negf %725 : vector<2x128xf32>
    %727 = math.exp %726 : vector<2x128xf32>
    %cst_236 = arith.constant 1.000000e+00 : f32
    %728 = vector.broadcast %cst_236 : f32 to vector<2x128xf32>
    %729 = arith.addf %728, %727 : vector<2x128xf32>
    %730 = arith.divf %728, %729 : vector<2x128xf32>
    %731 = vector.extract_strided_slice %730 {offsets = [0, 0], sizes = [2, 64], strides = [1, 1]} : vector<2x128xf32> to vector<2x64xf32>
    %732 = vector.extract_strided_slice %730 {offsets = [0, 64], sizes = [2, 64], strides = [1, 1]} : vector<2x128xf32> to vector<2x64xf32>
    %733 = vector.extract_strided_slice %722 {offsets = [0, 128], sizes = [2, 64], strides = [1, 1]} : vector<2x192xf32> to vector<2x64xf32>
    %734 = vector.extract_strided_slice %699 {offsets = [0, 128], sizes = [2, 64], strides = [1, 1]} : vector<2x192xf32> to vector<2x64xf32>
    %735 = arith.addf %734, %493 : vector<2x64xf32>
    %736 = arith.mulf %731, %735 : vector<2x64xf32>
    %737 = arith.addf %733, %736 : vector<2x64xf32>
    %738 = math.tanh %737 : vector<2x64xf32>
    %cst_237 = arith.constant 1.000000e+00 : f32
    %739 = vector.broadcast %cst_237 : f32 to vector<2x64xf32>
    %740 = arith.subf %739, %732 : vector<2x64xf32>
    %741 = arith.mulf %740, %738 : vector<2x64xf32>
    %742 = arith.mulf %732, %693 : vector<2x64xf32>
    %743 = arith.addf %741, %742 : vector<2x64xf32>
    %c8_238 = arith.constant 8 : index
    %c0_239 = arith.constant 0 : index
    %744 = vector.load %arg21[%c8_238, %c0_239] : memref<16x128xf32, #tpu.memory_space<vmem>>, vector<2x64xf32>
    tpu.vector_store %arg21[%c8_238, %c0_239], %721 {strides = array<i32>} : memref<16x128xf32, #tpu.memory_space<vmem>>, vector<2x64xf32>,
    %c6_240 = arith.constant 6 : index
    %c64_241 = arith.constant 64 : index
    %745 = vector.load %arg21[%c6_240, %c64_241] : memref<16x128xf32, #tpu.memory_space<vmem>>, vector<2x64xf32>
    tpu.vector_store %arg21[%c6_240, %c64_241], %743 {strides = array<i32>} : memref<16x128xf32, #tpu.memory_space<vmem>>, vector<2x64xf32>,
    %c10_242 = arith.constant 10 : index
    %c0_243 = arith.constant 0 : index
    %746 = vector.load %arg20[%c10_242, %c0_243] : memref<16x384xf32, #tpu.memory_space<vmem>>, vector<2x384xf32>
    %c4_244 = arith.constant 4 : index
    %c0_245 = arith.constant 0 : index
    %747 = vector.load %arg20[%c4_244, %c0_245] : memref<16x384xf32, #tpu.memory_space<vmem>>, vector<2x384xf32>
    %cst_246 = arith.constant dense<0.000000e+00> : vector<2x192xf32>
    %748 = tpu.matmul %721, %483, %cst_246 {dimension_numbers = #tpu.dot_dimension_numbers<[1], [0], [0], [1], [0, 0, 1, 1], [], []>} : vector<2x64xf32>, vector<64x192xf32>, vector<2x192xf32> -> vector<2x192xf32>
    %cst_247 = arith.constant dense<0.000000e+00> : vector<2x192xf32>
    %749 = tpu.matmul %743, %485, %cst_247 {dimension_numbers = #tpu.dot_dimension_numbers<[1], [0], [0], [1], [0, 0, 1, 1], [], []>} : vector<2x64xf32>, vector<64x192xf32>, vector<2x192xf32> -> vector<2x192xf32>
    %750 = vector.extract_strided_slice %746 {offsets = [0, 0], sizes = [2, 192], strides = [1, 1]} : vector<2x384xf32> to vector<2x192xf32>
    %751 = vector.extract_strided_slice %750 {offsets = [0, 0], sizes = [2, 128], strides = [1, 1]} : vector<2x192xf32> to vector<2x128xf32>
    %752 = vector.extract_strided_slice %748 {offsets = [0, 0], sizes = [2, 128], strides = [1, 1]} : vector<2x192xf32> to vector<2x128xf32>
    %753 = arith.addf %751, %752 : vector<2x128xf32>
    %754 = arith.negf %753 : vector<2x128xf32>
    %755 = math.exp %754 : vector<2x128xf32>
    %cst_248 = arith.constant 1.000000e+00 : f32
    %756 = vector.broadcast %cst_248 : f32 to vector<2x128xf32>
    %757 = arith.addf %756, %755 : vector<2x128xf32>
    %758 = arith.divf %756, %757 : vector<2x128xf32>
    %759 = vector.extract_strided_slice %758 {offsets = [0, 0], sizes = [2, 64], strides = [1, 1]} : vector<2x128xf32> to vector<2x64xf32>
    %760 = vector.extract_strided_slice %758 {offsets = [0, 64], sizes = [2, 64], strides = [1, 1]} : vector<2x128xf32> to vector<2x64xf32>
    %761 = vector.extract_strided_slice %750 {offsets = [0, 128], sizes = [2, 64], strides = [1, 1]} : vector<2x192xf32> to vector<2x64xf32>
    %762 = vector.extract_strided_slice %748 {offsets = [0, 128], sizes = [2, 64], strides = [1, 1]} : vector<2x192xf32> to vector<2x64xf32>
    %763 = arith.addf %762, %489 : vector<2x64xf32>
    %764 = arith.mulf %759, %763 : vector<2x64xf32>
    %765 = arith.addf %761, %764 : vector<2x64xf32>
    %766 = math.tanh %765 : vector<2x64xf32>
    %cst_249 = arith.constant 1.000000e+00 : f32
    %767 = vector.broadcast %cst_249 : f32 to vector<2x64xf32>
    %768 = arith.subf %767, %760 : vector<2x64xf32>
    %769 = arith.mulf %768, %766 : vector<2x64xf32>
    %770 = arith.mulf %760, %721 : vector<2x64xf32>
    %771 = arith.addf %769, %770 : vector<2x64xf32>
    %772 = vector.extract_strided_slice %747 {offsets = [0, 192], sizes = [2, 192], strides = [1, 1]} : vector<2x384xf32> to vector<2x192xf32>
    %773 = vector.extract_strided_slice %772 {offsets = [0, 0], sizes = [2, 128], strides = [1, 1]} : vector<2x192xf32> to vector<2x128xf32>
    %774 = vector.extract_strided_slice %749 {offsets = [0, 0], sizes = [2, 128], strides = [1, 1]} : vector<2x192xf32> to vector<2x128xf32>
    %775 = arith.addf %773, %774 : vector<2x128xf32>
    %776 = arith.negf %775 : vector<2x128xf32>
    %777 = math.exp %776 : vector<2x128xf32>
    %cst_250 = arith.constant 1.000000e+00 : f32
    %778 = vector.broadcast %cst_250 : f32 to vector<2x128xf32>
    %779 = arith.addf %778, %777 : vector<2x128xf32>
    %780 = arith.divf %778, %779 : vector<2x128xf32>
    %781 = vector.extract_strided_slice %780 {offsets = [0, 0], sizes = [2, 64], strides = [1, 1]} : vector<2x128xf32> to vector<2x64xf32>
    %782 = vector.extract_strided_slice %780 {offsets = [0, 64], sizes = [2, 64], strides = [1, 1]} : vector<2x128xf32> to vector<2x64xf32>
    %783 = vector.extract_strided_slice %772 {offsets = [0, 128], sizes = [2, 64], strides = [1, 1]} : vector<2x192xf32> to vector<2x64xf32>
    %784 = vector.extract_strided_slice %749 {offsets = [0, 128], sizes = [2, 64], strides = [1, 1]} : vector<2x192xf32> to vector<2x64xf32>
    %785 = arith.addf %784, %493 : vector<2x64xf32>
    %786 = arith.mulf %781, %785 : vector<2x64xf32>
    %787 = arith.addf %783, %786 : vector<2x64xf32>
    %788 = math.tanh %787 : vector<2x64xf32>
    %cst_251 = arith.constant 1.000000e+00 : f32
    %789 = vector.broadcast %cst_251 : f32 to vector<2x64xf32>
    %790 = arith.subf %789, %782 : vector<2x64xf32>
    %791 = arith.mulf %790, %788 : vector<2x64xf32>
    %792 = arith.mulf %782, %743 : vector<2x64xf32>
    %793 = arith.addf %791, %792 : vector<2x64xf32>
    %c10_252 = arith.constant 10 : index
    %c0_253 = arith.constant 0 : index
    %794 = vector.load %arg21[%c10_252, %c0_253] : memref<16x128xf32, #tpu.memory_space<vmem>>, vector<2x64xf32>
    tpu.vector_store %arg21[%c10_252, %c0_253], %771 {strides = array<i32>} : memref<16x128xf32, #tpu.memory_space<vmem>>, vector<2x64xf32>,
    %c4_254 = arith.constant 4 : index
    %c64_255 = arith.constant 64 : index
    %795 = vector.load %arg21[%c4_254, %c64_255] : memref<16x128xf32, #tpu.memory_space<vmem>>, vector<2x64xf32>
    tpu.vector_store %arg21[%c4_254, %c64_255], %793 {strides = array<i32>} : memref<16x128xf32, #tpu.memory_space<vmem>>, vector<2x64xf32>,
    %c12_256 = arith.constant 12 : index
    %c0_257 = arith.constant 0 : index
    %796 = vector.load %arg20[%c12_256, %c0_257] : memref<16x384xf32, #tpu.memory_space<vmem>>, vector<2x384xf32>
    %c2_258 = arith.constant 2 : index
    %c0_259 = arith.constant 0 : index
    %797 = vector.load %arg20[%c2_258, %c0_259] : memref<16x384xf32, #tpu.memory_space<vmem>>, vector<2x384xf32>
    %cst_260 = arith.constant dense<0.000000e+00> : vector<2x192xf32>
    %798 = tpu.matmul %771, %483, %cst_260 {dimension_numbers = #tpu.dot_dimension_numbers<[1], [0], [0], [1], [0, 0, 1, 1], [], []>} : vector<2x64xf32>, vector<64x192xf32>, vector<2x192xf32> -> vector<2x192xf32>
    %cst_261 = arith.constant dense<0.000000e+00> : vector<2x192xf32>
    %799 = tpu.matmul %793, %485, %cst_261 {dimension_numbers = #tpu.dot_dimension_numbers<[1], [0], [0], [1], [0, 0, 1, 1], [], []>} : vector<2x64xf32>, vector<64x192xf32>, vector<2x192xf32> -> vector<2x192xf32>
    %800 = vector.extract_strided_slice %796 {offsets = [0, 0], sizes = [2, 192], strides = [1, 1]} : vector<2x384xf32> to vector<2x192xf32>
    %801 = vector.extract_strided_slice %800 {offsets = [0, 0], sizes = [2, 128], strides = [1, 1]} : vector<2x192xf32> to vector<2x128xf32>
    %802 = vector.extract_strided_slice %798 {offsets = [0, 0], sizes = [2, 128], strides = [1, 1]} : vector<2x192xf32> to vector<2x128xf32>
    %803 = arith.addf %801, %802 : vector<2x128xf32>
    %804 = arith.negf %803 : vector<2x128xf32>
    %805 = math.exp %804 : vector<2x128xf32>
    %cst_262 = arith.constant 1.000000e+00 : f32
    %806 = vector.broadcast %cst_262 : f32 to vector<2x128xf32>
    %807 = arith.addf %806, %805 : vector<2x128xf32>
    %808 = arith.divf %806, %807 : vector<2x128xf32>
    %809 = vector.extract_strided_slice %808 {offsets = [0, 0], sizes = [2, 64], strides = [1, 1]} : vector<2x128xf32> to vector<2x64xf32>
    %810 = vector.extract_strided_slice %808 {offsets = [0, 64], sizes = [2, 64], strides = [1, 1]} : vector<2x128xf32> to vector<2x64xf32>
    %811 = vector.extract_strided_slice %800 {offsets = [0, 128], sizes = [2, 64], strides = [1, 1]} : vector<2x192xf32> to vector<2x64xf32>
    %812 = vector.extract_strided_slice %798 {offsets = [0, 128], sizes = [2, 64], strides = [1, 1]} : vector<2x192xf32> to vector<2x64xf32>
    %813 = arith.addf %812, %489 : vector<2x64xf32>
    %814 = arith.mulf %809, %813 : vector<2x64xf32>
    %815 = arith.addf %811, %814 : vector<2x64xf32>
    %816 = math.tanh %815 : vector<2x64xf32>
    %cst_263 = arith.constant 1.000000e+00 : f32
    %817 = vector.broadcast %cst_263 : f32 to vector<2x64xf32>
    %818 = arith.subf %817, %810 : vector<2x64xf32>
    %819 = arith.mulf %818, %816 : vector<2x64xf32>
    %820 = arith.mulf %810, %771 : vector<2x64xf32>
    %821 = arith.addf %819, %820 : vector<2x64xf32>
    %822 = vector.extract_strided_slice %797 {offsets = [0, 192], sizes = [2, 192], strides = [1, 1]} : vector<2x384xf32> to vector<2x192xf32>
    %823 = vector.extract_strided_slice %822 {offsets = [0, 0], sizes = [2, 128], strides = [1, 1]} : vector<2x192xf32> to vector<2x128xf32>
    %824 = vector.extract_strided_slice %799 {offsets = [0, 0], sizes = [2, 128], strides = [1, 1]} : vector<2x192xf32> to vector<2x128xf32>
    %825 = arith.addf %823, %824 : vector<2x128xf32>
    %826 = arith.negf %825 : vector<2x128xf32>
    %827 = math.exp %826 : vector<2x128xf32>
    %cst_264 = arith.constant 1.000000e+00 : f32
    %828 = vector.broadcast %cst_264 : f32 to vector<2x128xf32>
    %829 = arith.addf %828, %827 : vector<2x128xf32>
    %830 = arith.divf %828, %829 : vector<2x128xf32>
    %831 = vector.extract_strided_slice %830 {offsets = [0, 0], sizes = [2, 64], strides = [1, 1]} : vector<2x128xf32> to vector<2x64xf32>
    %832 = vector.extract_strided_slice %830 {offsets = [0, 64], sizes = [2, 64], strides = [1, 1]} : vector<2x128xf32> to vector<2x64xf32>
    %833 = vector.extract_strided_slice %822 {offsets = [0, 128], sizes = [2, 64], strides = [1, 1]} : vector<2x192xf32> to vector<2x64xf32>
    %834 = vector.extract_strided_slice %799 {offsets = [0, 128], sizes = [2, 64], strides = [1, 1]} : vector<2x192xf32> to vector<2x64xf32>
    %835 = arith.addf %834, %493 : vector<2x64xf32>
    %836 = arith.mulf %831, %835 : vector<2x64xf32>
    %837 = arith.addf %833, %836 : vector<2x64xf32>
    %838 = math.tanh %837 : vector<2x64xf32>
    %cst_265 = arith.constant 1.000000e+00 : f32
    %839 = vector.broadcast %cst_265 : f32 to vector<2x64xf32>
    %840 = arith.subf %839, %832 : vector<2x64xf32>
    %841 = arith.mulf %840, %838 : vector<2x64xf32>
    %842 = arith.mulf %832, %793 : vector<2x64xf32>
    %843 = arith.addf %841, %842 : vector<2x64xf32>
    %c12_266 = arith.constant 12 : index
    %c0_267 = arith.constant 0 : index
    %844 = vector.load %arg21[%c12_266, %c0_267] : memref<16x128xf32, #tpu.memory_space<vmem>>, vector<2x64xf32>
    tpu.vector_store %arg21[%c12_266, %c0_267], %821 {strides = array<i32>} : memref<16x128xf32, #tpu.memory_space<vmem>>, vector<2x64xf32>,
    %c2_268 = arith.constant 2 : index
    %c64_269 = arith.constant 64 : index
    %845 = vector.load %arg21[%c2_268, %c64_269] : memref<16x128xf32, #tpu.memory_space<vmem>>, vector<2x64xf32>
    tpu.vector_store %arg21[%c2_268, %c64_269], %843 {strides = array<i32>} : memref<16x128xf32, #tpu.memory_space<vmem>>, vector<2x64xf32>,
    %c14_270 = arith.constant 14 : index
    %c0_271 = arith.constant 0 : index
    %846 = vector.load %arg20[%c14_270, %c0_271] : memref<16x384xf32, #tpu.memory_space<vmem>>, vector<2x384xf32>
    %c0_272 = arith.constant 0 : index
    %c0_273 = arith.constant 0 : index
    %847 = vector.load %arg20[%c0_272, %c0_273] : memref<16x384xf32, #tpu.memory_space<vmem>>, vector<2x384xf32>
    %cst_274 = arith.constant dense<0.000000e+00> : vector<2x192xf32>
    %848 = tpu.matmul %821, %483, %cst_274 {dimension_numbers = #tpu.dot_dimension_numbers<[1], [0], [0], [1], [0, 0, 1, 1], [], []>} : vector<2x64xf32>, vector<64x192xf32>, vector<2x192xf32> -> vector<2x192xf32>
    %cst_275 = arith.constant dense<0.000000e+00> : vector<2x192xf32>
    %849 = tpu.matmul %843, %485, %cst_275 {dimension_numbers = #tpu.dot_dimension_numbers<[1], [0], [0], [1], [0, 0, 1, 1], [], []>} : vector<2x64xf32>, vector<64x192xf32>, vector<2x192xf32> -> vector<2x192xf32>
    %850 = vector.extract_strided_slice %846 {offsets = [0, 0], sizes = [2, 192], strides = [1, 1]} : vector<2x384xf32> to vector<2x192xf32>
    %851 = vector.extract_strided_slice %850 {offsets = [0, 0], sizes = [2, 128], strides = [1, 1]} : vector<2x192xf32> to vector<2x128xf32>
    %852 = vector.extract_strided_slice %848 {offsets = [0, 0], sizes = [2, 128], strides = [1, 1]} : vector<2x192xf32> to vector<2x128xf32>
    %853 = arith.addf %851, %852 : vector<2x128xf32>
    %854 = arith.negf %853 : vector<2x128xf32>
    %855 = math.exp %854 : vector<2x128xf32>
    %cst_276 = arith.constant 1.000000e+00 : f32
    %856 = vector.broadcast %cst_276 : f32 to vector<2x128xf32>
    %857 = arith.addf %856, %855 : vector<2x128xf32>
    %858 = arith.divf %856, %857 : vector<2x128xf32>
    %859 = vector.extract_strided_slice %858 {offsets = [0, 0], sizes = [2, 64], strides = [1, 1]} : vector<2x128xf32> to vector<2x64xf32>
    %860 = vector.extract_strided_slice %858 {offsets = [0, 64], sizes = [2, 64], strides = [1, 1]} : vector<2x128xf32> to vector<2x64xf32>
    %861 = vector.extract_strided_slice %850 {offsets = [0, 128], sizes = [2, 64], strides = [1, 1]} : vector<2x192xf32> to vector<2x64xf32>
    %862 = vector.extract_strided_slice %848 {offsets = [0, 128], sizes = [2, 64], strides = [1, 1]} : vector<2x192xf32> to vector<2x64xf32>
    %863 = arith.addf %862, %489 : vector<2x64xf32>
    %864 = arith.mulf %859, %863 : vector<2x64xf32>
    %865 = arith.addf %861, %864 : vector<2x64xf32>
    %866 = math.tanh %865 : vector<2x64xf32>
    %cst_277 = arith.constant 1.000000e+00 : f32
    %867 = vector.broadcast %cst_277 : f32 to vector<2x64xf32>
    %868 = arith.subf %867, %860 : vector<2x64xf32>
    %869 = arith.mulf %868, %866 : vector<2x64xf32>
    %870 = arith.mulf %860, %821 : vector<2x64xf32>
    %871 = arith.addf %869, %870 : vector<2x64xf32>
    %872 = vector.extract_strided_slice %847 {offsets = [0, 192], sizes = [2, 192], strides = [1, 1]} : vector<2x384xf32> to vector<2x192xf32>
    %873 = vector.extract_strided_slice %872 {offsets = [0, 0], sizes = [2, 128], strides = [1, 1]} : vector<2x192xf32> to vector<2x128xf32>
    %874 = vector.extract_strided_slice %849 {offsets = [0, 0], sizes = [2, 128], strides = [1, 1]} : vector<2x192xf32> to vector<2x128xf32>
    %875 = arith.addf %873, %874 : vector<2x128xf32>
    %876 = arith.negf %875 : vector<2x128xf32>
    %877 = math.exp %876 : vector<2x128xf32>
    %cst_278 = arith.constant 1.000000e+00 : f32
    %878 = vector.broadcast %cst_278 : f32 to vector<2x128xf32>
    %879 = arith.addf %878, %877 : vector<2x128xf32>
    %880 = arith.divf %878, %879 : vector<2x128xf32>
    %881 = vector.extract_strided_slice %880 {offsets = [0, 0], sizes = [2, 64], strides = [1, 1]} : vector<2x128xf32> to vector<2x64xf32>
    %882 = vector.extract_strided_slice %880 {offsets = [0, 64], sizes = [2, 64], strides = [1, 1]} : vector<2x128xf32> to vector<2x64xf32>
    %883 = vector.extract_strided_slice %872 {offsets = [0, 128], sizes = [2, 64], strides = [1, 1]} : vector<2x192xf32> to vector<2x64xf32>
    %884 = vector.extract_strided_slice %849 {offsets = [0, 128], sizes = [2, 64], strides = [1, 1]} : vector<2x192xf32> to vector<2x64xf32>
    %885 = arith.addf %884, %493 : vector<2x64xf32>
    %886 = arith.mulf %881, %885 : vector<2x64xf32>
    %887 = arith.addf %883, %886 : vector<2x64xf32>
    %888 = math.tanh %887 : vector<2x64xf32>
    %cst_279 = arith.constant 1.000000e+00 : f32
    %889 = vector.broadcast %cst_279 : f32 to vector<2x64xf32>
    %890 = arith.subf %889, %882 : vector<2x64xf32>
    %891 = arith.mulf %890, %888 : vector<2x64xf32>
    %892 = arith.mulf %882, %843 : vector<2x64xf32>
    %893 = arith.addf %891, %892 : vector<2x64xf32>
    %c14_280 = arith.constant 14 : index
    %c0_281 = arith.constant 0 : index
    %894 = vector.load %arg21[%c14_280, %c0_281] : memref<16x128xf32, #tpu.memory_space<vmem>>, vector<2x64xf32>
    tpu.vector_store %arg21[%c14_280, %c0_281], %871 {strides = array<i32>} : memref<16x128xf32, #tpu.memory_space<vmem>>, vector<2x64xf32>,
    %c0_282 = arith.constant 0 : index
    %c64_283 = arith.constant 64 : index
    %895 = vector.load %arg21[%c0_282, %c64_283] : memref<16x128xf32, #tpu.memory_space<vmem>>, vector<2x64xf32>
    tpu.vector_store %arg21[%c0_282, %c64_283], %893 {strides = array<i32>} : memref<16x128xf32, #tpu.memory_space<vmem>>, vector<2x64xf32>,
    %c0_284 = arith.constant 0 : index
    %c0_285 = arith.constant 0 : index
    %896 = vector.load %arg21[%c0_284, %c0_285] : memref<16x128xf32, #tpu.memory_space<vmem>>, vector<16x128xf32>
    %cst_286 = arith.constant 0.000000e+00 : f32
    %897 = vector.broadcast %cst_286 : f32 to vector<16x128xf32>
    %898 = arith.maximumf %896, %897 : vector<16x128xf32>
    %c0_287 = arith.constant 0 : index
    %c0_288 = arith.constant 0 : index
    %899 = vector.load %arg15[%c0_287, %c0_288] : memref<128x64xf32, #tpu.memory_space<vmem>>, vector<128x64xf32>
    %cst_289 = arith.constant dense<0.000000e+00> : vector<16x64xf32>
    %900 = tpu.matmul %898, %899, %cst_289 {dimension_numbers = #tpu.dot_dimension_numbers<[1], [0], [0], [1], [0, 0, 1, 1], [], []>} : vector<16x128xf32>, vector<128x64xf32>, vector<16x64xf32> -> vector<16x64xf32>
    %c0_290 = arith.constant 0 : index
    %c0_291 = arith.constant 0 : index
    %901 = vector.load %arg16[%c0_290, %c0_291] : memref<1x64xf32, #tpu.memory_space<vmem>>, vector<1x64xf32>
    %902 = vector.broadcast %901 : vector<1x64xf32> to vector<16x64xf32>
    %903 = arith.addf %900, %902 : vector<16x64xf32>
    %cst_292 = arith.constant 0.000000e+00 : f32
    %904 = vector.broadcast %cst_292 : f32 to vector<16x64xf32>
    %905 = arith.maximumf %903, %904 : vector<16x64xf32>
    %c0_293 = arith.constant 0 : index
    %c0_294 = arith.constant 0 : index
    %906 = vector.load %arg17[%c0_293, %c0_294] : memref<64x32xf32, #tpu.memory_space<vmem>>, vector<64x32xf32>
    %cst_295 = arith.constant dense<0.000000e+00> : vector<16x32xf32>
    %907 = tpu.matmul %905, %906, %cst_295 {dimension_numbers = #tpu.dot_dimension_numbers<[1], [0], [0], [1], [0, 0, 1, 1], [], []>} : vector<16x64xf32>, vector<64x32xf32>, vector<16x32xf32> -> vector<16x32xf32>
    %c0_296 = arith.constant 0 : index
    %c0_297 = arith.constant 0 : index
    %908 = vector.load %arg18[%c0_296, %c0_297] : memref<1x32xf32, #tpu.memory_space<vmem>>, vector<1x32xf32>
    %909 = vector.broadcast %908 : vector<1x32xf32> to vector<16x32xf32>
    %910 = arith.addf %907, %909 : vector<16x32xf32>
    %911 = arith.addf %910, %5 : vector<16x32xf32>
    %c0_298 = arith.constant 0 : index
    %c0_299 = arith.constant 0 : index
    %912 = vector.load %arg19[%c0_298, %c0_299] : memref<16x32xf32, #tpu.memory_space<vmem>>, vector<16x32xf32>
    tpu.vector_store %arg19[%c0_298, %c0_299], %911 {strides = array<i32>} : memref<16x32xf32, #tpu.memory_space<vmem>>, vector<16x32xf32>,
    return
  }
}

</mosaic_0001>

<bundles_post_ra>
// kernel: generator_forward.1
= control target key start
LH: loop header
LB: loop body
LE: loop exit
PB: predicated region body
PF: predicated region fallthrough
CT: control target
= control target key end

     0   :  { %vm78_vm0 = vcmask 261120   ;;  %vm219_vm1 = vcmask 523264   ;;  %vm727_vm2 = vcmask 517120   ;;  %vm955_vm3 = vcmask 519170   ;;  %s7359_s0 = inlined_call_operand.vmem [shape: f32[16,32], index: 0, kind: input, shape index: {}]   ;;  %s7360_s5 = inlined_call_operand.vmem [shape: f32[32,64], index: 5, kind: input, shape index: {}]   ;;  %s7361_s1 = inlined_call_operand.<no memory space> [shape: f32[1,1], index: 1, kind: input, shape index: {}]   ;;  %s7362_s2 = inlined_call_operand.<no memory space> [shape: f32[1,1], index: 2, kind: input, shape index: {}]   ;;  %s7363_s6 = inlined_call_operand.vmem [shape: f32[1,64], index: 6, kind: input, shape index: {}]   ;;  %s7364_s7 = inlined_call_operand.vmem [shape: f32[64,384], index: 7, kind: input, shape index: {}]   ;;  %s7365_s8 = inlined_call_operand.vmem [shape: f32[2,64,192], index: 8, kind: input, shape index: {}]   ;;  %s7366_s3 = inlined_call_operand.<no memory space> [shape: f32[1,1], index: 3, kind: input, shape index: {}]   ;;  %s7367_s4 = inlined_call_operand.<no memory space> [shape: f32[1,1], index: 4, kind: input, shape index: {}]   ;;  %s7368_s9 = inlined_call_operand.vmem [shape: f32[1,384], index: 9, kind: input, shape index: {}]   ;;  %s7369_s10 = inlined_call_operand.vmem [shape: f32[2,1,64], index: 10, kind: input, shape index: {}]   ;;  %s7370_s11 = inlined_call_operand.vmem [shape: f32[128,384], index: 11, kind: input, shape index: {}]   ;;  %s7371_s12 = inlined_call_operand.vmem [shape: f32[2,64,192], index: 12, kind: input, shape index: {}]   ;;  %s7372_s13 = inlined_call_operand.vmem [shape: f32[1,384], index: 13, kind: input, shape index: {}]   ;;  %s7373_s14 = inlined_call_operand.vmem [shape: f32[2,1,64], index: 14, kind: input, shape index: {}]   ;;  %s7374_s15 = inlined_call_operand.vmem [shape: f32[128,64], index: 15, kind: input, shape index: {}]   ;;  %s7375_s17 = inlined_call_operand.vmem [shape: f32[64,32], index: 17, kind: input, shape index: {}]   ;;  %s7376_s16 = inlined_call_operand.vmem [shape: f32[1,64], index: 16, kind: input, shape index: {}]   ;;  %s7377_s18 = inlined_call_operand.vmem [shape: f32[1,32], index: 18, kind: input, shape index: {}]   ;;  %s7378_s19 = inlined_call_operand.vmem [shape: f32[16,32], index: 19, kind: output, shape index: {}]  }
   0x1   :  { %7383 = sst [smem:[#allocation8_spill]] %s7359_s0  ;;  %v4599_v47 = vld [vmem:[%s7363_s6] ss:$0 sm:$0xff]  ;;  %vm1414_vm4 = vcmask 523270   ;;  %vm1186_vm5 = vcmask 521220   ;;  %vm961_vm6 = vcmask 1046020  }
   0x2   :  { %7384 = sst [smem:[#allocation9_spill]] %s7360_s5  ;;  %vm733_vm7 = vcmask 1048070   ;;  %vm1420_vm8 = vcmask 1041920   ;;  %vm1192_vm9 = vcmask 1043970  }
   0x3   :  { %7385 = sst [smem:[#allocation10_spill]] %s7361_s1 }
   0x4   :  { %7386 = sst [smem:[#allocation11_spill]] %s7362_s2 }
   0x5   :  { %s7387_s20 = sld [smem:[#allocation8_spill]] }
   0x6   :  { %s7388_s25 = sld [smem:[#allocation9_spill]] }
   0x7   :  { %s7389_s23 = sld [smem:[#allocation10_spill]] }
   0x8   :  { %s7390_s26 = sld [smem:[#allocation11_spill]] }
   0xb   :  { %v66_v0 = vld [vmem:[%s7387_s20] sm:$0xff]  ;;  %v67_v1 = vld [vmem:[%s7387_s20 + $0x8] sm:$0xff] }
   0xc   :  { %v68_v2 = vmax.f32 %v66_v0, 1e-08  ;;  %v69_v3 = vmax.f32 %v67_v1, 1e-08  ;;  %v128_v31 = vld [vmem:[%s7388_s25 + $0x18] sm:$0xff]  ;;  %v127_v33 = vld [vmem:[%s7388_s25 + $0x10] sm:$0xff] }
   0xd   :  { %4786 = vmatprep.subr.mxu0 %v128_v31  ;;  %v126_v35 = vld [vmem:[%s7388_s25 + $0x8] sm:$0xff]  ;;  %v125_v36 = vld [vmem:[%s7388_s25] sm:$0xff] }
   0xe   :  { %4919 = vlog2.f32 %v68_v2  ;;  %4787 = vmatpush3.msra.mxu0 %v128_v31  ;;  %v122_v42 = vstv %s7390_s26  ;;  %v269_v31 = vld [vmem:[%s7364_s7 + $0x18] sm:$0xff] }
   0xf   :  { %4921 = vlog2.f32 %v69_v3  ;;  %4788 = vmatprep.subr.mxu0 %v127_v33 }
  0x10   :  { %4789 = vmatpush3.msra.mxu0 %v127_v33 }
  0x11   :  { %4790 = vmatprep.subr.mxu0 %v126_v35 }
  0x12   :  { %4791 = vmatpush3.msra.mxu0 %v126_v35  ;;  %v266_v35 = vld [vmem:[%s7364_s7] sm:$0xff] }
  0x13   :  { %4792 = vmatprep.subr.mxu0 %v125_v36 }
  0x14   :  { %4793 = vmatpush3.msra.mxu0 %v125_v36  ;;  %v268_v36 = vld [vmem:[%s7364_s7 + $0x10] sm:$0xff] }
  0x1b   :  { %v4920_v4 = vpop.eup %4919 }
  0x1c   :  { %v4922_v5 = vpop.eup %4921  ;;  %v71_v6 = vmul.f32 0.6931472, %v4920_v4 }
  0x1d   :  { %v73_v7 = vmul.f32 0.6931472, %v4922_v5 }
  0x1e   :  { %v5359_v8 = vmul.f32 0.4342945, %v71_v6  ;;  %v288_v6 = vld [vmem:[%s7364_s7 + $0xb0] sm:$0xff] }
  0x1f   :  { %v5361_v9 = vmul.f32 0.4342945, %v73_v7  ;;  %v287_v7 = vld [vmem:[%s7364_s7 + $0xa8] sm:$0xff]  ;;  %329 = vmatprep.subr.mxu1 %v288_v6 }
  0x20   :  { %v79_v10 = vsel %vm78_vm0, %v5359_v8, 0.0  ;;  %330 = vmatpush1.msra.mxu1 %v287_v7  ;;  %v5622_v6 = vld [vmem:[%s7365_s8 + $0xa8] sm:$0xff]  ;;  %v5629_v7 = vld [vmem:[%s7365_s8 + $0x18] sm:$0xff] }
  0x21   :  { %v80_v11 = vsel %vm78_vm0, %v5361_v9, 0.0 }
  0x22   :  { %v81_v12 = vadd.f32 %v80_v11, %v79_v10  ;;  %v289_v10 = vld [vmem:[%s7364_s7 + $0xb8] sm:$0xff] }
  0x23   :  { %4797 = vmatprep.subr.mxu0 %v289_v10  ;;  %v285_v11 = vld [vmem:[%s7364_s7 + $0x98] sm:$0xff] }
  0x24   :  { %82 = vadd.xlane.f32.xlu0 %v81_v12  ;;  %v284_v12 = vld [vmem:[%s7364_s7 + $0x90] sm:$0xff]  ;;  %331 = vmatprep.subr.mxu1 %v285_v11 }
  0x25   :  { %332 = vmatpush1.msra.mxu1 %v284_v12  ;;  %v5641_v11 = vld [vmem:[%s7365_s8 + $0x10] sm:$0xff]  ;;  %v5646_v12 = vld [vmem:[%s7365_s8 + $0x98] sm:$0xff] }
  0xad   :  { %v83_v13 = vpop.xlane.xlu0 %82 }
  0xae   :  { %v84_v14 = vrot.slane %v83_v13, 4 }
  0xb0   :  { %v85_v15 = vadd.f32 %v84_v14, %v83_v13  ;;  %v286_v13 = vld [vmem:[%s7364_s7 + $0xa0] sm:$0xff] }
  0xb1   :  { %v282_v14 = vld [vmem:[%s7364_s7 + $0x80] sm:$0xff] }
  0xb2   :  { %v86_v16 = vrot.slane %v85_v15, 2  ;;  %333 = vmatprep.subr.mxu1 %v282_v14  ;;  %v5658_v14 = vld [vmem:[%s7365_s8 + $0x90] sm:$0xff] }
  0xb4   :  { %v87_v17 = vadd.f32 %v86_v16, %v85_v15  ;;  %v283_v15 = vld [vmem:[%s7364_s7 + $0x88] sm:$0xff]  ;;  %v281_v16 = vld [vmem:[%s7364_s7 + $0x78] sm:$0xff] }
  0xb5   :  { %334 = vmatpush1.msra.mxu1 %v281_v16  ;;  %v5672_v16 = vld [vmem:[%s7365_s8 + $0x88] sm:$0xff] }
  0xb6   :  { %v88_v18 = vrot.slane %v87_v17, 1 }
  0xb8   :  { %v89_v19 = vadd.f32 %v88_v18, %v87_v17  ;;  %v279_v17 = vld [vmem:[%s7364_s7 + $0x68] sm:$0xff]  ;;  %v280_v18 = vld [vmem:[%s7364_s7 + $0x70] sm:$0xff] }
  0xb9   :  { %335 = vmatprep.subr.mxu1 %v279_v17  ;;  %v5679_v17 = vld [vmem:[%s7365_s8 + $0x80] sm:$0xff] }
  0xba   :  { %4905 = vpush %v89_v19  ;;  %v278_v19 = vld [vmem:[%s7364_s7 + $0x60] sm:$0xff] }
  0xbb   :  { %336 = vmatpush1.msra.mxu1 %v278_v19 }
  0xeb   :  { %s4906_s22 = spop %4905 }
  0xec   :  { %s93_s1 = smul.f32 0.001953125, %s4906_s22 }
  0xee   :  { %v94_v20 = vstv %s93_s1 }
  0xef   :  { %v95_v21 = vsub.f32 %v5359_v8, %v94_v20  ;;  %v96_v22 = vsub.f32 %v5361_v9, %v94_v20  ;;  %v276_v20 = vld [vmem:[%s7364_s7 + $0x50] sm:$0xff] }
  0xf0   :  { %337 = vmatprep.subr.mxu1 %v276_v20 }
  0xf1   :  { %v97_v23 = vmul.f32 %v95_v21, %v95_v21  ;;  %v98_v24 = vmul.f32 %v96_v22, %v96_v22 }
  0xf3   :  { %v99_v25 = vsel %vm78_vm0, %v97_v23, 0.0  ;;  %v100_v26 = vsel %vm78_vm0, %v98_v24, 0.0  ;;  %v275_v23 = vld [vmem:[%s7364_s7 + $0x48] sm:$0xff]  ;;  %v277_v24 = vld [vmem:[%s7364_s7 + $0x58] sm:$0xff] }
  0xf4   :  { %v101_v27 = vadd.f32 %v100_v26, %v99_v25  ;;  %338 = vmatpush1.msra.mxu1 %v275_v23  ;;  %v273_v26 = vld [vmem:[%s7364_s7 + $0x38] sm:$0xff] }
  0xf5   :  { %339 = vmatprep.subr.mxu1 %v273_v26 }
  0xf6   :  { %102 = vadd.xlane.f32.xlu0 %v101_v27  ;;  %v272_v27 = vld [vmem:[%s7364_s7 + $0x30] sm:$0xff] }
  0xf7   :  { %340 = vmatpush1.msra.mxu1 %v272_v27 }
 0x17f   :  { %v103_v28 = vpop.xlane.xlu0 %102 }
 0x180   :  { %v104_v29 = vrot.slane %v103_v28, 4 }
 0x182   :  { %v105_v30 = vadd.f32 %v104_v29, %v103_v28  ;;  %v274_v28 = vld [vmem:[%s7364_s7 + $0x40] sm:$0xff] }
 0x184   :  { %v106_v32 = vrot.slane %v105_v30, 2 }
 0x186   :  { %v107_v34 = vadd.f32 %v106_v32, %v105_v30  ;;  %v270_v30 = vld [vmem:[%s7364_s7 + $0x20] sm:$0xff]  ;;  %v271_v32 = vld [vmem:[%s7364_s7 + $0x28] sm:$0xff] }
 0x187   :  { %341 = vmatprep.subr.mxu1 %v270_v30 }
 0x188   :  { %v108_v37 = vrot.slane %v107_v34, 1  ;;  %342 = vmatpush1.msra.mxu1 %v269_v31 }
 0x18a   :  { %v109_v38 = vadd.f32 %v108_v37, %v107_v34  ;;  %v267_v34 = vld [vmem:[%s7364_s7 + $0x8] sm:$0xff] }
 0x18b   :  { %343 = vmatprep.subr.mxu1 %v267_v34 }
 0x18c   :  { %4907 = vpush %v109_v38  ;;  %344 = vmatpush1.msra.mxu1 %v266_v35  ;;  %v5481_v38 = vld [vmem:[%s7365_s8 + $0x78] sm:$0xff] }
 0x18d   :  { %542 = vmatprep.subr.mxu1 %v5481_v38 }
 0x1bd   :  { %s4908_s30 = spop %4907 }
 0x1be   :  { %s113_s20 = smul.f32 0.001953125, %s4908_s30 }
 0x1c0   :  { %s114_s21 = sadd.f32 1e-05, %s113_s20 }
 0x1c2   :  { %v115_v39 = vstv %s114_s21 }
 0x1c3   :  { %4923 = vrsqrt.f32 %v115_v39  ;;  %v5251_v39 = vmov 0.0  }
 0x1c4   :  { %377 = vmatprep.mubr.f32.mxu1 %v5251_v39 }
 0x1d0   :  { %v4924_v40 = vpop.eup %4923 }
 0x1d1   :  { %4909 = vpush %v4924_v40 }
 0x202   :  { %s4910_s5 = spop %4909 }
 0x203   :  { %s118_s24 = smul.f32 %s4910_s5, %s7389_s23 }
 0x205   :  { %v119_v41 = vstv %s118_s24 }
 0x206   :  { %v120_v43 = vmul.f32 %v119_v41, %v95_v21  ;;  %v121_v44 = vmul.f32 %v119_v41, %v96_v22  ;;  %v5488_v41 = vld [vmem:[%s7365_s8 + $0xf8] sm:$0xff] }
 0x208   :  { %v123_v45 = vadd.f32 %v122_v42, %v120_v43  ;;  %v124_v46 = vadd.f32 %v122_v42, %v121_v44 }
 0x20a   :  { %4794 = vmatprep.mubr.msk.f32.mxu0 %vm78_vm0, %v123_v45  ;;  %v263_v45 = vstv %s7367_s4  ;;  %s5252_s4 = smov 64  }
 0x20b   :  { %4795 = vmatmul.mubr.msk.f32.vlgmr.msra.gmra.mxu0 %vm78_vm0, %v124_v46 }
 0x20c   :  { %4798 = vmatpush3.msra.mxu0 %v289_v10  ;;  %v5634_v10 = vld [vmem:[%s7365_s8 + $0xa0] sm:$0xff] }
 0x20d   :  { %4799 = vmatprep.subr.mxu0 %v286_v13 }
 0x20e   :  { %4800 = vmatpush3.msra.mxu0 %v286_v13  ;;  %v5653_v13 = vld [vmem:[%s7365_s8 + $0x8] sm:$0xff] }
 0x20f   :  { %4801 = vmatprep.subr.mxu0 %v283_v15 }
 0x210   :  { %4802 = vmatpush3.msra.mxu0 %v283_v15  ;;  %v5665_v15 = vld [vmem:[%s7365_s8] sm:$0xff] }
 0x211   :  { %4803 = vmatprep.subr.mxu0 %v280_v18 }
 0x212   :  { %4804 = vmatpush3.msra.mxu0 %v280_v18  ;;  %v292_v18 = vlaneseq }
 0x213   :  { %4805 = vmatprep.subr.mxu0 %v277_v24 }
 0x214   :  { %4806 = vmatpush3.msra.mxu0 %v277_v24  ;;  %v5724_v19 = vshrl.u32 %v292_v18, 7 }
 0x215   :  { %4807 = vmatprep.subr.mxu0 %v274_v28 }
 0x216   :  { %4808 = vmatpush3.msra.mxu0 %v274_v28  ;;  %v294_v20 = vsub.s32 0, %v5724_v19  ;;  %v7382_v23 = vsub.s32 1, %v5724_v19 }
 0x217   :  { %4809 = vmatprep.subr.mxu0 %v271_v32 }
 0x218   :  { %4810 = vmatpush3.msra.mxu0 %v271_v32 }
 0x219   :  { %4811 = vmatprep.subr.mxu0 %v268_v36 }
 0x21a   :  { %4812 = vmatpush3.msra.mxu0 %v268_v36 }
 0x21b   :  { %613 = vmatprep.subr.mxu0 %v5488_v41 }
 0x2cb   :  { %v4796_v48 = vpop.f32.mrf.mxu0 }
 0x2cc   :  { %v214_v49 = vadd.f32 %v4796_v48, %v4599_v47 }
 0x2cd   :  { %v208_v50 = vpop.f32.mrf.mxu0 }
 0x2ce   :  { %v209_v51 = vadd.f32 %v4599_v47, %v208_v50  ;;  %v221_v53 = vsel %vm219_vm1, %v214_v49, 0.0  ;;  %v5502_v50 = vld [vmem:[%s7365_s8 + $0x70] sm:$0xff] }
 0x2d0   :  { %v220_v52 = vsel %vm219_vm1, %v209_v51, 0.0 }
 0x2d1   :  { %v222_v54 = vadd.f32 %v221_v53, %v220_v52  ;;  %v5512_v52 = vld [vmem:[%s7365_s8 + $0xf0] sm:$0xff]  ;;  %v5519_v53 = vld [vmem:[%s7365_s8 + $0x60] sm:$0xff] }
 0x2d3   :  { %223 = vadd.xlane.f32.xlu1 %v222_v54  ;;  %v5524_v54 = vld [vmem:[%s7365_s8 + $0xe8] sm:$0xff] }
 0x35c   :  { %v224_v55 = vpop.xlane.xlu1 %223 }
 0x35d   :  { %v225_v56 = vrot.slane %v224_v55, 4 }
 0x35f   :  { %v226_v57 = vadd.f32 %v225_v56, %v224_v55  ;;  %v5531_v55 = vld [vmem:[%s7365_s8 + $0x58] sm:$0xff]  ;;  %v5538_v56 = vld [vmem:[%s7365_s8 + $0xe0] sm:$0xff] }
 0x361   :  { %v227_v58 = vrot.slane %v226_v57, 2 }
 0x363   :  { %v228_v59 = vadd.f32 %v227_v58, %v226_v57  ;;  %v5545_v57 = vld [vmem:[%s7365_s8 + $0x50] sm:$0xff]  ;;  %v5550_v58 = vld [vmem:[%s7365_s8 + $0xd8] sm:$0xff] }
 0x365   :  { %v229_v60 = vrot.slane %v228_v59, 1 }
 0x367   :  { %v230_v61 = vadd.f32 %v229_v60, %v228_v59  ;;  %v5557_v59 = vld [vmem:[%s7365_s8 + $0x48] sm:$0xff]  ;;  %v5562_v60 = vld [vmem:[%s7365_s8 + $0xd0] sm:$0xff] }
 0x369   :  { %4911 = vpush %v230_v61  ;;  %v5569_v61 = vld [vmem:[%s7365_s8 + $0x40] sm:$0xff] }
 0x39a   :  { %s4912_s6 = spop %4911 }
 0x39b   :  { %s234_s29 = smul.f32 0.0009765625, %s4912_s6 }
 0x39d   :  { %v235_v62 = vstv %s234_s29 }
 0x39e   :  { %v5396_v63 = vsub.f32 %v209_v51, %v235_v62  ;;  %v5398_v0 = vsub.f32 %v214_v49, %v235_v62  ;;  %v5507_v51 = vld [vmem:[%s7365_s8 + $0x68] sm:$0xff] }
 0x39f   :  { %v5574_v62 = vld [vmem:[%s7365_s8 + $0xc8] sm:$0xff] }
 0x3a0   :  { %v238_v1 = vmul.f32 %v5396_v63, %v5396_v63  ;;  %v239_v2 = vmul.f32 %v5398_v0, %v5398_v0 }
 0x3a2   :  { %v240_v3 = vsel %vm219_vm1, %v238_v1, 0.0  ;;  %v241_v4 = vsel %vm219_vm1, %v239_v2, 0.0  ;;  %v5593_v1 = vld [vmem:[%s7365_s8 + $0x30] sm:$0xff]  ;;  %v5598_v2 = vld [vmem:[%s7365_s8 + $0xb8] sm:$0xff] }
 0x3a3   :  { %v242_v5 = vadd.f32 %v241_v4, %v240_v3  ;;  %v5605_v3 = vld [vmem:[%s7365_s8 + $0x28] sm:$0xff]  ;;  %v5610_v4 = vld [vmem:[%s7365_s8 + $0xb0] sm:$0xff] }
 0x3a5   :  { %243 = vadd.xlane.f32.xlu1 %v242_v5  ;;  %v5617_v5 = vld [vmem:[%s7365_s8 + $0x20] sm:$0xff] }
 0x42e   :  { %v244_v21 = vpop.xlane.xlu1 %243 }
 0x42f   :  { %v245_v22 = vrot.slane %v244_v21, 4 }
 0x431   :  { %v246_v25 = vadd.f32 %v245_v22, %v244_v21  ;;  %v290_v21 = vld [vmem:[%s7368_s9] sm:$0x7]  ;;  %v7381_v22 = vsub.s32 2, %v5724_v19 }
 0x432   :  { %v295_v24 = vrot.slane %v290_v21, %v294_v20  ;;  %v299_v26 = vrot.slane %v290_v21, %v7382_v23 }
 0x433   :  { %v247_v29 = vrot.slane %v246_v25, 2 }
 0x435   :  { %v248_v33 = vadd.f32 %v247_v29, %v246_v25  ;;  %v303_v25 = vrot.slane %v290_v21, %v7381_v22 }
 0x437   :  { %v249_v37 = vrot.slane %v248_v33, 1 }
 0x439   :  { %v250_v40 = vadd.f32 %v249_v37, %v248_v33 }
 0x43b   :  { %4913 = vpush %v250_v40 }
 0x46c   :  { %s4914_s7 = spop %4913 }
 0x46d   :  { %s254_s5 = smul.f32 0.0009765625, %s4914_s7 }
 0x46f   :  { %s255_s22 = sadd.f32 1e-05, %s254_s5 }
 0x471   :  { %v256_v42 = vstv %s255_s22 }
 0x472   :  { %4925 = vrsqrt.f32 %v256_v42 }
 0x47f   :  { %v4926_v43 = vpop.eup %4925 }
 0x480   :  { %4915 = vpush %v4926_v43  ;;  %v5741_v43 = vld [vmem:[%s7369_s10 + $0x1] ss:$0 sm:$0xff] }
 0x4b1   :  { %s4916_s1 = spop %4915 }
 0x4b2   :  { %s259_s25 = smul.f32 %s4916_s1, %s7366_s3 }
 0x4b4   :  { %v260_v44 = vstv %s259_s25 }
 0x4b5   :  { %v261_v46 = vmul.f32 %v260_v44, %v5396_v63  ;;  %v262_v47 = vmul.f32 %v260_v44, %v5398_v0  ;;  %v5581_v63 = vld [vmem:[%s7365_s8 + $0x38] sm:$0xff]  ;;  %v5586_v0 = vld [vmem:[%s7365_s8 + $0xc0] sm:$0xff] }
 0x4b7   :  { %v264_v48 = vadd.f32 %v263_v45, %v261_v46  ;;  %v265_v49 = vadd.f32 %v263_v45, %v262_v47 }
 0x4b9   :  { %4602 = vmatmul.mubr.msk.f32.vlgmr.msra.gmra.mxu1 %vm219_vm1, %v264_v48  ;;  %4813 = vmatprep.mubr.msk.f32.mxu0 %vm219_vm1, %v264_v48 }
 0x4ba   :  { %543 = vmatpush1.msra.mxu1 %v5502_v50  ;;  %4814 = vmatmul.mubr.msk.f32.vlgmr.msra.gmra.mxu0 %vm219_vm1, %v265_v49 }
 0x4bb   :  { %544 = vmatprep.subr.mxu1 %v5507_v51  ;;  %614 = vmatpush1.msra.mxu0 %v5512_v52 }
 0x4bc   :  { %545 = vmatpush1.msra.mxu1 %v5519_v53  ;;  %615 = vmatprep.subr.mxu0 %v5524_v54 }
 0x4bd   :  { %383 = vmatprep.mubr.f32.mxu1 %v5251_v39  ;;  %546 = vmatprep.subr.mxu1 %v5531_v55 }
 0x4be   :  { %616 = vmatpush1.msra.mxu0 %v5538_v56  ;;  %4603 = vmatmul.mubr.msk.f32.gmra.mxu1 %vm219_vm1, %v265_v49 }
 0x4bf   :  { %547 = vmatpush1.msra.mxu1 %v5545_v57  ;;  %617 = vmatprep.subr.mxu0 %v5550_v58 }
 0x4c0   :  { %548 = vmatprep.subr.mxu1 %v5557_v59  ;;  %618 = vmatpush1.msra.mxu0 %v5562_v60 }
 0x4c1   :  { %549 = vmatpush1.msra.mxu1 %v5569_v61  ;;  %619 = vmatprep.subr.mxu0 %v5574_v62 }
 0x4c2   :  { %550 = vmatprep.subr.mxu1 %v5581_v63  ;;  %620 = vmatpush1.msra.mxu0 %v5586_v0 }
 0x4c3   :  { %551 = vmatpush1.msra.mxu1 %v5593_v1  ;;  %621 = vmatprep.subr.mxu0 %v5598_v2 }
 0x4c4   :  { %552 = vmatprep.subr.mxu1 %v5605_v3  ;;  %622 = vmatpush1.msra.mxu0 %v5610_v4 }
 0x4c5   :  { %553 = vmatpush1.msra.mxu1 %v5617_v5  ;;  %623 = vmatprep.subr.mxu0 %v5622_v6 }
 0x4c6   :  { %554 = vmatprep.subr.mxu1 %v5629_v7  ;;  %624 = vmatpush1.msra.mxu0 %v5634_v10 }
 0x4c7   :  { %555 = vmatpush1.msra.mxu1 %v5641_v11  ;;  %625 = vmatprep.subr.mxu0 %v5646_v12 }
 0x4c8   :  { %556 = vmatprep.subr.mxu1 %v5653_v13  ;;  %626 = vmatpush1.msra.mxu0 %v5658_v14 }
 0x4c9   :  { %557 = vmatpush1.msra.mxu1 %v5665_v15  ;;  %590 = vmatprep.mubr.f32.mxu1 %v5251_v39 }
 0x4ca   :  { %627 = vmatprep.subr.mxu0 %v5672_v16  ;;  %591 = vmatmul.mubr.f32.vlgmr.msra.gmra.mxu1 %v5251_v39 }
 0x4cb   :  { %628 = vmatpush1.msra.mxu0 %v5679_v17  ;;  %661 = vmatprep.mubr.f32.mxu0 %v5251_v39 }
 0x4cc   :  { %662 = vmatmul.mubr.f32.vlgmr.msra.gmra.mxu0 %v5251_v39  ;;  %831 = vmatprep.subr.mxu0 %v5488_v41 }
 0x4cd   :  { %832 = vmatpush1.msra.mxu0 %v5512_v52  ;;  %879 = vmatprep.mubr.f32.mxu0 %v5251_v39 }
 0x4ce   :  { %833 = vmatprep.subr.mxu0 %v5524_v54  ;;  %757 = vmatprep.subr.mxu1 %v5481_v38 }
 0x4cf   :  { %834 = vmatpush1.msra.mxu0 %v5538_v56  ;;  %758 = vmatpush1.msra.mxu1 %v5502_v50 }
 0x4d0   :  { %835 = vmatprep.subr.mxu0 %v5550_v58  ;;  %759 = vmatprep.subr.mxu1 %v5507_v51 }
 0x4d1   :  { %836 = vmatpush1.msra.mxu0 %v5562_v60  ;;  %760 = vmatpush1.msra.mxu1 %v5519_v53 }
 0x4d2   :  { %837 = vmatprep.subr.mxu0 %v5574_v62  ;;  %761 = vmatprep.subr.mxu1 %v5531_v55 }
 0x4d3   :  { %838 = vmatpush1.msra.mxu0 %v5586_v0  ;;  %762 = vmatpush1.msra.mxu1 %v5545_v57 }
 0x4d4   :  { %839 = vmatprep.subr.mxu0 %v5598_v2  ;;  %763 = vmatprep.subr.mxu1 %v5557_v59 }
 0x4d5   :  { %840 = vmatpush1.msra.mxu0 %v5610_v4  ;;  %764 = vmatpush1.msra.mxu1 %v5569_v61 }
 0x4d6   :  { %841 = vmatprep.subr.mxu0 %v5622_v6  ;;  %765 = vmatprep.subr.mxu1 %v5581_v63 }
 0x4d7   :  { %842 = vmatpush1.msra.mxu0 %v5634_v10  ;;  %766 = vmatpush1.msra.mxu1 %v5593_v1 }
 0x4d8   :  { %843 = vmatprep.subr.mxu0 %v5646_v12  ;;  %767 = vmatprep.subr.mxu1 %v5605_v3 }
 0x4d9   :  { %844 = vmatpush1.msra.mxu0 %v5658_v14  ;;  %768 = vmatpush1.msra.mxu1 %v5617_v5 }
 0x4da   :  { %845 = vmatprep.subr.mxu0 %v5672_v16  ;;  %769 = vmatprep.subr.mxu1 %v5629_v7 }
 0x4db   :  { %846 = vmatpush1.msra.mxu0 %v5679_v17  ;;  %770 = vmatpush1.msra.mxu1 %v5641_v11 }
 0x4dc   :  { %771 = vmatprep.subr.mxu1 %v5653_v13  ;;  %805 = vmatprep.mubr.f32.mxu1 %v5251_v39 }
 0x4dd   :  { %772 = vmatpush1.msra.mxu1 %v5665_v15  ;;  %1062 = vmatprep.subr.mxu0 %v5488_v41 }
 0x4de   :  { %988 = vmatprep.subr.mxu1 %v5481_v38 }
 0x579   :  { %v379_v27 = vpop.f32.mrf.mxu1 }
 0x57a   :  { %v380_v28 = vadd.f32 %v379_v27, %v295_v24  ;;  %v4815_v29 = vpop.f32.mrf.mxu0 }
 0x57b   :  { %v462_v30 = vadd.f32 %v4815_v29, %v303_v25  ;;  %v381_v31 = vpop.f32.mrf.mxu1 }
 0x57c   :  { %465 = vst [vmem:[#allocation2 + $0x28] sm:$0xff] %v380_v28  ;;  %v382_v32 = vadd.f32 %v381_v31, %v299_v26  ;;  %v456_v33 = vpop.f32.mrf.mxu0 }
 0x57d   :  { %470 = vst [vmem:[#allocation2 + $0x20] sm:$0xff] %v462_v30  ;;  %v457_v34 = vadd.f32 %v456_v33, %v303_v25 }
 0x57e   :  { %466 = vst [vmem:[#allocation2 + $0x10] sm:$0xff] %v382_v32  ;;  %v385_v35 = vpop.f32.mrf.mxu1  ;;  %v5749_v32 = vld [vmem:[%s7369_s10] ss:$0 sm:$0xff] }
 0x57f   :  { %467 = vst [vmem:[#allocation2 + $0x8] sm:$0xff] %v457_v34  ;;  %v386_v36 = vadd.f32 %v385_v35, %v295_v24 }
 0x580   :  { %v387_v37 = vpop.f32.mrf.mxu1 }
 0x581   :  { %468 = vst [vmem:[#allocation2] sm:$0xff] %v386_v36  ;;  %v388_v40 = vadd.f32 %v387_v37, %v299_v26 }
 0x583   :  { %469 = vst [vmem:[#allocation2 + $0x18] sm:$0xff] %v388_v40  ;;  %v519_v49 = vld [vmem:[#allocation2 + $0x28] sm:$0x3] }
 0x58a   :  { %v592_v48 = vpop.f32.mrf.mxu1  ;;  %v521_v25 = vld [vmem:[#allocation2 + $0x18] sm:$0xc0] }
 0x58b   :  { %v668_v18 = vadd.f32 %v592_v48, %v519_v49 }
 0x58c   :  { %v663_v42 = vpop.f32.mrf.mxu0  ;;  %v594_v33 = vpop.f32.mrf.mxu1 }
 0x58d   :  { %v688_v44 = vrot.slane %v663_v42, 2  ;;  %v4625_v21 = vmul.f32 -1.442695, %v668_v18  ;;  %v675_v34 = vadd.f32 %v5749_v32, %v594_v33 }
 0x58e   :  { %v665_v45 = vpop.f32.mrf.mxu0 }
 0x58f   :  { %v706_v46 = vadd.f32 %v5741_v43, %v665_v45  ;;  %689 = vrot.lane.b32.xlu0 %v688_v44, %s5252_s4  ;;  %4927 = vpow2.f32 %v4625_v21  ;;  %v522_v44 = vld [vmem:[#allocation2 + $0x20] sm:$0xc0] }
 0x591   :  { %v708_v47 = vrot.slane %v706_v46, 2  ;;  %v520_v46 = vld [vmem:[#allocation2 + $0x10] sm:$0x3] }
 0x593   :  { %709 = vrot.lane.b32.xlu1 %v708_v47, %s5252_s4 }
 0x59c   :  { %v4928_v28 = vpop.eup %4927 }
 0x59d   :  { %v672_v29 = vadd.f32 1.0, %v4928_v28 }
 0x601   :  { %v690_v24 = vpop.permute.xlu0 %689 }
 0x602   :  { %v692_v26 = vadd.f32 %v690_v24, %v521_v25  ;;  %v693_v18 = vadd.f32 %v690_v24, %v522_v44 }
 0x604   :  { %v4626_v27 = vmul.f32 -1.442695, %v692_v26  ;;  %v4627_v21 = vmul.f32 -1.442695, %v693_v18  ;;  %v737_v18 = vld [vmem:[#allocation2 + $0x18] sm:$0x30] }
 0x605   :  { %v710_v37 = vpop.permute.xlu1 %709 }
 0x606   :  { %4929 = vpow2.f32 %v4626_v27 }
 0x607   :  { %4931 = vrcp.f32 %v672_v29 }
 0x613   :  { %v4930_v30 = vpop.eup %4929 }
 0x614   :  { %v700_v31 = vadd.f32 1.0, %v4930_v30  ;;  %v4932_v35 = vpop.eup %4931 }
 0x615   :  { %v676_v40 = vmul.f32 %v4932_v35, %v675_v34  ;;  %v679_v34 = vsub.f32 1.0, %v4932_v35 }
 0x616   :  { %4933 = vrcp.f32 %v700_v31 }
 0x617   :  { %v677_v47 = vadd.f32 %v676_v40, %v520_v46  ;;  %v685_v40 = vmul.f32 0.0, %v4932_v35 }
 0x623   :  { %v4934_v36 = vpop.eup %4933 }
 0x624   :  { %v712_v42 = vmul.f32 %v4934_v36, %v710_v37 }
 0x626   :  { %v713_v45 = vadd.f32 %v712_v42, %v522_v44 }
 0x628   :  { %4935 = vtanh.f32 %v713_v45 }
 0x629   :  { %4937 = vtanh.f32 %v677_v47 }
 0x62a   :  { %4939 = vpow2.f32 %v4627_v21 }
 0x635   :  { %v4936_v48 = vpop.eup %4935 }
 0x636   :  { %717 = vrot.lane.b32.xlu1 %v4936_v48, %s5252_s4  ;;  %v4938_v49 = vpop.eup %4937 }
 0x637   :  { %v4940_v25 = vpop.eup %4939 }
 0x638   :  { %v701_v26 = vadd.f32 1.0, %v4940_v25 }
 0x63a   :  { %681 = vrot.lane.b32.xlu1 %v4938_v49, %s5252_s4  ;;  %4941 = vrcp.f32 %v701_v26 }
 0x647   :  { %v4942_v27 = vpop.eup %4941 }
 0x648   :  { %v715_v28 = vsub.f32 1.0, %v4942_v27  ;;  %v721_v30 = vmul.f32 0.0, %v4942_v27  ;;  %v735_v27 = vld [vmem:[#allocation2 + $0x28] sm:$0xc] }
 0x6a8   :  { %v718_v29 = vpop.permute.xlu1 %717 }
 0x6a9   :  { %v720_v31 = vmul.f32 %v718_v29, %v715_v28 }
 0x6ab   :  { %v5754_v33 = vadd.f32 %v721_v30, %v720_v31 }
 0x6ac   :  { %v682_v36 = vpop.permute.xlu1 %681 }
 0x6ad   :  { %v812_v37 = vrot.slane %v5754_v33, 6  ;;  %v684_v42 = vmul.f32 %v682_v36, %v679_v34 }
 0x6af   :  { %v5757_v45 = vadd.f32 %v685_v40, %v684_v42  ;;  %4629 = vmatmul.mubr.msk.f32.vlgmr.msra.gmra.mxu0 %vm219_vm1, %v812_v37 }
 0x6b0   :  { %1063 = vmatpush1.msra.mxu0 %v5512_v52  ;;  %1110 = vmatprep.mubr.f32.mxu0 %v5251_v39 }
 0x6b1   :  { %724 = vrot.lane.b32.xlu0 %v5757_v45, %s5252_s4  ;;  %1064 = vmatprep.subr.mxu0 %v5524_v54 }
 0x6b2   :  { %1065 = vmatpush1.msra.mxu0 %v5538_v56 }
 0x6b3   :  { %1066 = vmatprep.subr.mxu0 %v5550_v58 }
 0x6b4   :  { %1067 = vmatpush1.msra.mxu0 %v5562_v60 }
 0x6b5   :  { %1068 = vmatprep.subr.mxu0 %v5574_v62 }
 0x6b6   :  { %1069 = vmatpush1.msra.mxu0 %v5586_v0 }
 0x6b7   :  { %1070 = vmatprep.subr.mxu0 %v5598_v2 }
 0x6b8   :  { %1071 = vmatpush1.msra.mxu0 %v5610_v4 }
 0x6b9   :  { %1072 = vmatprep.subr.mxu0 %v5622_v6 }
 0x6ba   :  { %1073 = vmatpush1.msra.mxu0 %v5634_v10 }
 0x6bb   :  { %1074 = vmatprep.subr.mxu0 %v5646_v12 }
 0x6bc   :  { %1075 = vmatpush1.msra.mxu0 %v5658_v14 }
 0x6bd   :  { %1076 = vmatprep.subr.mxu0 %v5672_v16 }
 0x6be   :  { %1077 = vmatpush1.msra.mxu0 %v5679_v17 }
 0x6bf   :  { %1293 = vmatprep.subr.mxu0 %v5488_v41 }
 0x723   :  { %v725_v24 = vpop.permute.xlu0 %724 }
 0x724   :  { %728 = vst.msk [vmem:[#allocation3] sm:$0x3] %vm727_vm2, %v725_v24  ;;  %4628 = vmatmul.mubr.msk.f32.vlgmr.msra.gmra.mxu1 %vm219_vm1, %v725_v24 }
 0x725   :  { %989 = vmatpush1.msra.mxu1 %v5502_v50  ;;  %1036 = vmatprep.mubr.f32.mxu1 %v5251_v39 }
 0x726   :  { %990 = vmatprep.subr.mxu1 %v5507_v51 }
 0x727   :  { %991 = vmatpush1.msra.mxu1 %v5519_v53 }
 0x728   :  { %992 = vmatprep.subr.mxu1 %v5531_v55 }
 0x729   :  { %993 = vmatpush1.msra.mxu1 %v5545_v57 }
 0x72a   :  { %994 = vmatprep.subr.mxu1 %v5557_v59 }
 0x72b   :  { %995 = vmatpush1.msra.mxu1 %v5569_v61 }
 0x72c   :  { %996 = vmatprep.subr.mxu1 %v5581_v63 }
 0x72d   :  { %997 = vmatpush1.msra.mxu1 %v5593_v1 }
 0x72e   :  { %998 = vmatprep.subr.mxu1 %v5605_v3 }
 0x72f   :  { %999 = vmatpush1.msra.mxu1 %v5617_v5 }
 0x730   :  { %1000 = vmatprep.subr.mxu1 %v5629_v7 }
 0x731   :  { %1001 = vmatpush1.msra.mxu1 %v5641_v11 }
 0x732   :  { %1002 = vmatprep.subr.mxu1 %v5653_v13 }
 0x733   :  { %1003 = vmatpush1.msra.mxu1 %v5665_v15 }
 0x734   :  { %1219 = vmatprep.subr.mxu1 %v5481_v38 }
 0x76f   :  { %v881_v35 = vpop.f32.mrf.mxu0 }
 0x770   :  { %v914_v44 = vrot.slane %v881_v35, 4 }
 0x771   :  { %v883_v46 = vpop.f32.mrf.mxu0 }
 0x772   :  { %v932_v47 = vadd.f32 %v5741_v43, %v883_v46  ;;  %915 = vrot.lane.b32.xlu1 %v914_v44, %s5252_s4  ;;  %v909_v44 = vrot.slane %v5757_v45, 6 }
 0x774   :  { %v934_v48 = vrot.slane %v932_v47, 4 }
 0x776   :  { %935 = vrot.lane.b32.xlu0 %v934_v48, %s5252_s4 }
 0x7e4   :  { %v807_v49 = vpop.f32.mrf.mxu1  ;;  %v916_v21 = vpop.permute.xlu1 %915 }
 0x7e5   :  { %v887_v25 = vrot.slane %v807_v49, 6  ;;  %v918_v26 = vadd.f32 %v916_v21, %v737_v18  ;;  %v738_v49 = vld [vmem:[#allocation2 + $0x20] sm:$0x30] }
 0x7e6   :  { %v809_v40 = vpop.f32.mrf.mxu1 }
 0x7e7   :  { %v889_v28 = vadd.f32 %v887_v25, %v735_v27  ;;  %v4631_v29 = vmul.f32 -1.442695, %v918_v26  ;;  %v896_v42 = vadd.f32 %v5749_v32, %v809_v40  ;;  %v736_v27 = vld [vmem:[#allocation2 + $0x10] sm:$0xc] }
 0x7e8   :  { %v936_v35 = vpop.permute.xlu0 %935 }
 0x7e9   :  { %v4630_v30 = vmul.f32 -1.442695, %v889_v28  ;;  %4943 = vpow2.f32 %v4631_v29  ;;  %v898_v46 = vrot.slane %v896_v42, 6  ;;  %v947_v42 = vrot.slane %v5754_v33, 2 }
 0x7eb   :  { %4945 = vpow2.f32 %v4630_v30 }
 0x7f6   :  { %v4944_v31 = vpop.eup %4943 }
 0x7f7   :  { %v926_v34 = vadd.f32 1.0, %v4944_v31  ;;  %v919_v31 = vadd.f32 %v916_v21, %v738_v49 }
 0x7f8   :  { %v4946_v36 = vpop.eup %4945 }
 0x7f9   :  { %v893_v37 = vadd.f32 1.0, %v4946_v36  ;;  %4947 = vrcp.f32 %v926_v34  ;;  %v4632_v34 = vmul.f32 -1.442695, %v919_v31 }
 0x7fb   :  { %4949 = vrcp.f32 %v893_v37 }
 0x806   :  { %v4948_v24 = vpop.eup %4947 }
 0x807   :  { %v938_v47 = vmul.f32 %v4948_v24, %v936_v35 }
 0x808   :  { %v4950_v48 = vpop.eup %4949 }
 0x809   :  { %v900_v18 = vmul.f32 %v4950_v48, %v898_v46  ;;  %v939_v25 = vadd.f32 %v938_v47, %v738_v49  ;;  %v911_v26 = vmul.f32 %v4950_v48, %v909_v44  ;;  %v903_v46 = vsub.f32 1.0, %v4950_v48 }
 0x80b   :  { %v901_v28 = vadd.f32 %v900_v18, %v736_v27  ;;  %4951 = vtanh.f32 %v939_v25 }
 0x80d   :  { %4953 = vtanh.f32 %v901_v28 }
 0x80e   :  { %4955 = vpow2.f32 %v4632_v34  ;;  %v965_v34 = vld [vmem:[#allocation2 + $0x18] sm:$0xc] }
 0x818   :  { %v4952_v29 = vpop.eup %4951 }
 0x819   :  { %943 = vrot.lane.b32.xlu0 %v4952_v29, %s5252_s4 }
 0x81a   :  { %v4954_v30 = vpop.eup %4953 }
 0x81b   :  { %905 = vrot.lane.b32.xlu1 %v4954_v30, %s5252_s4  ;;  %v4956_v45 = vpop.eup %4955 }
 0x81c   :  { %v927_v36 = vadd.f32 1.0, %v4956_v45 }
 0x81e   :  { %4957 = vrcp.f32 %v927_v36 }
 0x82b   :  { %v4958_v37 = vpop.eup %4957 }
 0x82c   :  { %v941_v40 = vsub.f32 1.0, %v4958_v37  ;;  %v949_v35 = vmul.f32 %v4958_v37, %v947_v42  ;;  %v963_v42 = vld [vmem:[#allocation2 + $0x28] sm:$0x30] }
 0x88b   :  { %v944_v24 = vpop.permute.xlu0 %943 }
 0x88c   :  { %v946_v44 = vmul.f32 %v944_v24, %v941_v40 }
 0x88d   :  { %v906_v47 = vpop.permute.xlu1 %905 }
 0x88e   :  { %v5806_v18 = vadd.f32 %v949_v35, %v946_v44  ;;  %v908_v25 = vmul.f32 %v906_v47, %v903_v46 }
 0x890   :  { %v1043_v27 = vrot.slane %v5806_v18, 4  ;;  %v5809_v21 = vadd.f32 %v911_v26, %v908_v25 }
 0x892   :  { %4634 = vmatmul.mubr.msk.f32.vlgmr.msra.gmra.mxu0 %vm219_vm1, %v1043_v27  ;;  %v967_v49 = vrot.slane %v5809_v21, 2 }
 0x893   :  { %1294 = vmatpush1.msra.mxu0 %v5512_v52  ;;  %1341 = vmatprep.mubr.f32.mxu0 %v5251_v39 }
 0x894   :  { %968 = vrot.lane.b32.xlu1 %v967_v49, %s5252_s4  ;;  %1295 = vmatprep.subr.mxu0 %v5524_v54 }
 0x895   :  { %1296 = vmatpush1.msra.mxu0 %v5538_v56 }
 0x896   :  { %1297 = vmatprep.subr.mxu0 %v5550_v58 }
 0x897   :  { %1298 = vmatpush1.msra.mxu0 %v5562_v60 }
 0x898   :  { %1299 = vmatprep.subr.mxu0 %v5574_v62 }
 0x899   :  { %1300 = vmatpush1.msra.mxu0 %v5586_v0 }
 0x89a   :  { %1301 = vmatprep.subr.mxu0 %v5598_v2 }
 0x89b   :  { %1302 = vmatpush1.msra.mxu0 %v5610_v4 }
 0x89c   :  { %1303 = vmatprep.subr.mxu0 %v5622_v6 }
 0x89d   :  { %1304 = vmatpush1.msra.mxu0 %v5634_v10 }
 0x89e   :  { %1305 = vmatprep.subr.mxu0 %v5646_v12 }
 0x89f   :  { %1306 = vmatpush1.msra.mxu0 %v5658_v14 }
 0x8a0   :  { %1307 = vmatprep.subr.mxu0 %v5672_v16 }
 0x8a1   :  { %1308 = vmatpush1.msra.mxu0 %v5679_v17 }
 0x8a2   :  { %1520 = vmatprep.subr.mxu0 %v5488_v41 }
 0x906   :  { %v969_v48 = vpop.permute.xlu1 %968 }
 0x907   :  { %4633 = vmatmul.mubr.msk.f32.vlgmr.msra.gmra.mxu1 %vm219_vm1, %v969_v48 }
 0x908   :  { %1220 = vmatpush1.msra.mxu1 %v5502_v50  ;;  %1267 = vmatprep.mubr.f32.mxu1 %v5251_v39 }
 0x909   :  { %1221 = vmatprep.subr.mxu1 %v5507_v51 }
 0x90a   :  { %1222 = vmatpush1.msra.mxu1 %v5519_v53 }
 0x90b   :  { %1223 = vmatprep.subr.mxu1 %v5531_v55 }
 0x90c   :  { %1224 = vmatpush1.msra.mxu1 %v5545_v57 }
 0x90d   :  { %1225 = vmatprep.subr.mxu1 %v5557_v59 }
 0x90e   :  { %1226 = vmatpush1.msra.mxu1 %v5569_v61 }
 0x90f   :  { %1227 = vmatprep.subr.mxu1 %v5581_v63 }
 0x910   :  { %1228 = vmatpush1.msra.mxu1 %v5593_v1 }
 0x911   :  { %1229 = vmatprep.subr.mxu1 %v5605_v3 }
 0x912   :  { %1230 = vmatpush1.msra.mxu1 %v5617_v5 }
 0x913   :  { %1231 = vmatprep.subr.mxu1 %v5629_v7 }
 0x914   :  { %1232 = vmatpush1.msra.mxu1 %v5641_v11 }
 0x915   :  { %1233 = vmatprep.subr.mxu1 %v5653_v13 }
 0x916   :  { %1234 = vmatpush1.msra.mxu1 %v5665_v15 }
 0x917   :  { %1447 = vmatprep.subr.mxu1 %v5481_v38 }
 0x952   :  { %v1112_v26 = vpop.f32.mrf.mxu0 }
 0x953   :  { %v1145_v28 = vrot.slane %v1112_v26, 6 }
 0x954   :  { %v1114_v29 = vpop.f32.mrf.mxu0 }
 0x955   :  { %v1163_v30 = vadd.f32 %v5741_v43, %v1114_v29  ;;  %1146 = vrot.lane.b32.xlu0 %v1145_v28, %s5252_s4 }
 0x957   :  { %v1165_v31 = vrot.slane %v1163_v30, 6 }
 0x959   :  { %1166 = vrot.lane.b32.xlu1 %v1165_v31, %s5252_s4 }
 0x9c7   :  { %v1147_v45 = vpop.permute.xlu0 %1146  ;;  %v1038_v36 = vpop.f32.mrf.mxu1 }
 0x9c8   :  { %v1149_v37 = vadd.f32 %v1147_v45, %v965_v34  ;;  %v1118_v40 = vrot.slane %v1038_v36, 4  ;;  %v966_v34 = vld [vmem:[#allocation2 + $0x20] sm:$0xc] }
 0x9c9   :  { %v1040_v49 = vpop.f32.mrf.mxu1 }
 0x9ca   :  { %v4636_v24 = vmul.f32 -1.442695, %v1149_v37  ;;  %v1120_v35 = vadd.f32 %v1118_v40, %v963_v42  ;;  %v1127_v48 = vadd.f32 %v5749_v32, %v1040_v49  ;;  %v964_v40 = vld [vmem:[#allocation2 + $0x10] sm:$0x30] }
 0x9cb   :  { %v1167_v28 = vpop.permute.xlu1 %1166 }
 0x9cc   :  { %4959 = vpow2.f32 %v4636_v24  ;;  %v4635_v44 = vmul.f32 -1.442695, %v1120_v35  ;;  %v1129_v29 = vrot.slane %v1127_v48, 4  ;;  %v1178_v48 = vrot.slane %v5806_v18, 2 }
 0x9ce   :  { %4961 = vpow2.f32 %v4635_v44  ;;  %v1150_v44 = vadd.f32 %v1147_v45, %v966_v34 }
 0x9d9   :  { %v4960_v46 = vpop.eup %4959 }
 0x9da   :  { %v1157_v47 = vadd.f32 1.0, %v4960_v46  ;;  %v4637_v46 = vmul.f32 -1.442695, %v1150_v44 }
 0x9db   :  { %v4962_v25 = vpop.eup %4961 }
 0x9dc   :  { %4963 = vrcp.f32 %v1157_v47  ;;  %v1124_v27 = vadd.f32 1.0, %v4962_v25 }
 0x9de   :  { %4965 = vrcp.f32 %v1124_v27 }
 0x9e9   :  { %v4964_v26 = vpop.eup %4963 }
 0x9ea   :  { %v1169_v30 = vmul.f32 %v4964_v26, %v1167_v28 }
 0x9eb   :  { %v4966_v31 = vpop.eup %4965 }
 0x9ec   :  { %v1131_v36 = vmul.f32 %v4966_v31, %v1129_v29  ;;  %v1170_v37 = vadd.f32 %v1169_v30, %v966_v34  ;;  %v1134_v30 = vsub.f32 1.0, %v4966_v31 }
 0x9ee   :  { %v1132_v42 = vadd.f32 %v1131_v36, %v964_v40  ;;  %4967 = vtanh.f32 %v1170_v37  ;;  %v1140_v36 = vrot.slane %v5809_v21, 6 }
 0x9f0   :  { %4969 = vtanh.f32 %v1132_v42  ;;  %v1142_v42 = vmul.f32 %v4966_v31, %v1140_v36 }
 0x9f1   :  { %4971 = vpow2.f32 %v4637_v46 }
 0x9fb   :  { %v4968_v24 = vpop.eup %4967 }
 0x9fc   :  { %1174 = vrot.lane.b32.xlu1 %v4968_v24, %s5252_s4 }
 0x9fd   :  { %v4970_v35 = vpop.eup %4969 }
 0x9fe   :  { %1136 = vrot.lane.b32.xlu0 %v4970_v35, %s5252_s4  ;;  %v4972_v47 = vpop.eup %4971 }
 0x9ff   :  { %v1158_v25 = vadd.f32 1.0, %v4972_v47 }
 0xa01   :  { %4973 = vrcp.f32 %v1158_v25 }
 0xa0e   :  { %v4974_v27 = vpop.eup %4973 }
 0xa0f   :  { %v1172_v49 = vsub.f32 1.0, %v4974_v27  ;;  %v1180_v28 = vmul.f32 %v4974_v27, %v1178_v48  ;;  %v1194_v27 = vld [vmem:[#allocation2 + $0x28] sm:$0xc0] }
 0xa6e   :  { %v1175_v26 = vpop.permute.xlu1 %1174 }
 0xa6f   :  { %v1177_v29 = vmul.f32 %v1175_v26, %v1172_v49 }
 0xa70   :  { %v1137_v37 = vpop.permute.xlu0 %1136 }
 0xa71   :  { %v5857_v40 = vadd.f32 %v1180_v28, %v1177_v29  ;;  %v1139_v45 = vmul.f32 %v1137_v37, %v1134_v30 }
 0xa73   :  { %v1274_v34 = vrot.slane %v5857_v40, 2  ;;  %v5860_v24 = vadd.f32 %v1142_v42, %v1139_v45 }
 0xa75   :  { %4639 = vmatmul.mubr.msk.f32.vlgmr.msra.gmra.mxu0 %vm219_vm1, %v1274_v34  ;;  %v1198_v35 = vrot.slane %v5860_v24, 4 }
 0xa76   :  { %1521 = vmatpush1.msra.mxu0 %v5512_v52  ;;  %1568 = vmatprep.mubr.f32.mxu0 %v5251_v39 }
 0xa77   :  { %1199 = vrot.lane.b32.xlu0 %v1198_v35, %s5252_s4  ;;  %1522 = vmatprep.subr.mxu0 %v5524_v54  ;;  %v1197_v35 = vld [vmem:[#allocation2 + $0x20] sm:$0x3] }
 0xa78   :  { %1523 = vmatpush1.msra.mxu0 %v5538_v56 }
 0xa79   :  { %1524 = vmatprep.subr.mxu0 %v5550_v58 }
 0xa7a   :  { %1525 = vmatpush1.msra.mxu0 %v5562_v60 }
 0xa7b   :  { %1526 = vmatprep.subr.mxu0 %v5574_v62 }
 0xa7c   :  { %1527 = vmatpush1.msra.mxu0 %v5586_v0 }
 0xa7d   :  { %1528 = vmatprep.subr.mxu0 %v5598_v2 }
 0xa7e   :  { %1529 = vmatpush1.msra.mxu0 %v5610_v4 }
 0xa7f   :  { %1530 = vmatprep.subr.mxu0 %v5622_v6 }
 0xa80   :  { %1531 = vmatpush1.msra.mxu0 %v5634_v10 }
 0xa81   :  { %1532 = vmatprep.subr.mxu0 %v5646_v12 }
 0xa82   :  { %1533 = vmatpush1.msra.mxu0 %v5658_v14 }
 0xa83   :  { %1534 = vmatprep.subr.mxu0 %v5672_v16 }
 0xa84   :  { %1535 = vmatpush1.msra.mxu0 %v5679_v17 }
 0xa85   :  { %1739 = vmatprep.subr.mxu0 %v5488_v41 }
 0xae9   :  { %v1200_v31 = vpop.permute.xlu0 %1199 }
 0xaea   :  { %4638 = vmatmul.mubr.msk.f32.vlgmr.msra.gmra.mxu1 %vm219_vm1, %v1200_v31 }
 0xaeb   :  { %1448 = vmatpush1.msra.mxu1 %v5502_v50  ;;  %1495 = vmatprep.mubr.f32.mxu1 %v5251_v39 }
 0xaec   :  { %1449 = vmatprep.subr.mxu1 %v5507_v51 }
 0xaed   :  { %1450 = vmatpush1.msra.mxu1 %v5519_v53  ;;  %v1196_v53 = vld [vmem:[#allocation2 + $0x18] sm:$0x3] }
 0xaee   :  { %1451 = vmatprep.subr.mxu1 %v5531_v55 }
 0xaef   :  { %1452 = vmatpush1.msra.mxu1 %v5545_v57 }
 0xaf0   :  { %1453 = vmatprep.subr.mxu1 %v5557_v59 }
 0xaf1   :  { %1454 = vmatpush1.msra.mxu1 %v5569_v61 }
 0xaf2   :  { %1455 = vmatprep.subr.mxu1 %v5581_v63 }
 0xaf3   :  { %1456 = vmatpush1.msra.mxu1 %v5593_v1 }
 0xaf4   :  { %1457 = vmatprep.subr.mxu1 %v5605_v3 }
 0xaf5   :  { %1458 = vmatpush1.msra.mxu1 %v5617_v5 }
 0xaf6   :  { %1459 = vmatprep.subr.mxu1 %v5629_v7 }
 0xaf7   :  { %1460 = vmatpush1.msra.mxu1 %v5641_v11 }
 0xaf8   :  { %1461 = vmatprep.subr.mxu1 %v5653_v13 }
 0xaf9   :  { %1462 = vmatpush1.msra.mxu1 %v5665_v15 }
 0xafa   :  { %1665 = vmatprep.subr.mxu1 %v5481_v38 }
 0xb35   :  { %v1343_v41 = vpop.f32.mrf.mxu0 }
 0xb36   :  { %1376 = vrot.lane.b32.xlu1 %v1343_v41, %s5252_s4 }
 0xb37   :  { %v1345_v50 = vpop.f32.mrf.mxu0 }
 0xb38   :  { %v1393_v51 = vadd.f32 %v5741_v43, %v1345_v50 }
 0xb3a   :  { %1395 = vrot.lane.b32.xlu0 %v1393_v51, %s5252_s4 }
 0xba8   :  { %v1377_v55 = vpop.permute.xlu1 %1376 }
 0xba9   :  { %v1379_v44 = vadd.f32 %v1377_v55, %v1196_v53  ;;  %v1195_v53 = vld [vmem:[#allocation2 + $0x10] sm:$0xc0] }
 0xbaa   :  { %v1269_v46 = vpop.f32.mrf.mxu1 }
 0xbab   :  { %v4641_v47 = vmul.f32 -1.442695, %v1379_v44  ;;  %v1349_v25 = vrot.slane %v1269_v46, 2 }
 0xbac   :  { %v1271_v30 = vpop.f32.mrf.mxu1  ;;  %v1396_v42 = vpop.permute.xlu0 %1395 }
 0xbad   :  { %4975 = vpow2.f32 %v4641_v47  ;;  %v1351_v49 = vadd.f32 %v1349_v25, %v1194_v27  ;;  %v1358_v36 = vadd.f32 %v5749_v32, %v1271_v30  ;;  %v1380_v25 = vadd.f32 %v1377_v55, %v1197_v35 }
 0xbaf   :  { %v4640_v48 = vmul.f32 -1.442695, %v1351_v49  ;;  %v1360_v31 = vrot.slane %v1358_v36, 2  ;;  %v4642_v27 = vmul.f32 -1.442695, %v1380_v25 }
 0xbb0   :  { %v1423_v25 = vld [vmem:[#allocation2 + $0x18] sm:$0x3] }
 0xbb1   :  { %4977 = vpow2.f32 %v4640_v48 }
 0xbba   :  { %v4976_v38 = vpop.eup %4975 }
 0xbbb   :  { %v1387_v26 = vadd.f32 1.0, %v4976_v38 }
 0xbbd   :  { %4979 = vrcp.f32 %v1387_v26 }
 0xbbe   :  { %v4978_v28 = vpop.eup %4977 }
 0xbbf   :  { %v1355_v29 = vadd.f32 1.0, %v4978_v28 }
 0xbc1   :  { %4981 = vrcp.f32 %v1355_v29 }
 0xbca   :  { %v4980_v37 = vpop.eup %4979 }
 0xbcb   :  { %v1398_v45 = vmul.f32 %v4980_v37, %v1396_v42  ;;  %v1371_v42 = vrot.slane %v5860_v24, 6 }
 0xbcd   :  { %v1399_v41 = vadd.f32 %v1398_v45, %v1197_v35 }
 0xbce   :  { %v4982_v50 = vpop.eup %4981 }
 0xbcf   :  { %v1362_v51 = vmul.f32 %v4982_v50, %v1360_v31  ;;  %4983 = vtanh.f32 %v1399_v41  ;;  %v1365_v37 = vsub.f32 1.0, %v4982_v50  ;;  %v1373_v31 = vmul.f32 %v4982_v50, %v1371_v42 }
 0xbd1   :  { %v1363_v44 = vadd.f32 %v1362_v51, %v1195_v53  ;;  %v1425_v51 = vld [vmem:[#allocation2 + $0x8] sm:$0xc0] }
 0xbd3   :  { %4985 = vtanh.f32 %v1363_v44 }
 0xbd4   :  { %4987 = vpow2.f32 %v4642_v27 }
 0xbdc   :  { %v4984_v46 = vpop.eup %4983 }
 0xbdd   :  { %1403 = vrot.lane.b32.xlu1 %v4984_v46, %s5252_s4 }
 0xbe0   :  { %v4986_v47 = vpop.eup %4985 }
 0xbe1   :  { %1367 = vrot.lane.b32.xlu0 %v4986_v47, %s5252_s4  ;;  %v4988_v49 = vpop.eup %4987 }
 0xbe2   :  { %v1388_v48 = vadd.f32 1.0, %v4988_v49 }
 0xbe4   :  { %4989 = vrcp.f32 %v1388_v48 }
 0xbf1   :  { %v4990_v38 = vpop.eup %4989 }
 0xbf2   :  { %v1401_v26 = vsub.f32 1.0, %v4990_v38  ;;  %v1408_v29 = vmul.f32 %v4990_v38, %v1274_v34 }
 0xc4f   :  { %v1404_v28 = vpop.permute.xlu1 %1403 }
 0xc50   :  { %v1406_v30 = vmul.f32 %v1404_v28, %v1401_v26 }
 0xc52   :  { %v5910_v36 = vadd.f32 %v1408_v29, %v1406_v30 }
 0xc53   :  { %v1368_v45 = vpop.permute.xlu0 %1367 }
 0xc54   :  { %v1370_v55 = vmul.f32 %v1368_v45, %v1365_v37  ;;  %4644 = vmatmul.mubr.msk.f32.vlgmr.msra.gmra.mxu0 %vm219_vm1, %v5910_v36  ;;  %v1629_v42 = vrot.slane %v5910_v36, 2 }
 0xc55   :  { %1740 = vmatpush1.msra.mxu0 %v5512_v52  ;;  %1787 = vmatprep.mubr.f32.mxu0 %v5251_v39  ;;  %v5940_v52 = vld [vmem:[%s7365_s8 + $0xf8] sm:$0xff] }
 0xc56   :  { %v5917_v35 = vadd.f32 %v1373_v31, %v1370_v55  ;;  %1741 = vmatprep.subr.mxu0 %v5524_v54 }
 0xc57   :  { %1742 = vmatpush1.msra.mxu0 %v5538_v56  ;;  %v5947_v56 = vld [vmem:[%s7365_s8 + $0x70] sm:$0xff] }
 0xc58   :  { %v1426_v34 = vrot.slane %v5917_v35, 6  ;;  %1743 = vmatprep.subr.mxu0 %v5550_v58  ;;  %v5954_v58 = vld [vmem:[%s7365_s8 + $0x68] sm:$0xff] }
 0xc59   :  { %1744 = vmatpush1.msra.mxu0 %v5562_v60  ;;  %v5960_v60 = vld [vmem:[%s7365_s8 + $0x60] sm:$0xff] }
 0xc5a   :  { %1427 = vrot.lane.b32.xlu1 %v1426_v34, %s5252_s4  ;;  %1745 = vmatprep.subr.mxu0 %v5574_v62  ;;  %v5966_v62 = vld [vmem:[%s7365_s8 + $0x58] sm:$0xff] }
 0xc5b   :  { %1746 = vmatpush1.msra.mxu0 %v5586_v0 }
 0xc5c   :  { %1747 = vmatprep.subr.mxu0 %v5598_v2  ;;  %v1424_v2 = vld [vmem:[#allocation2 + $0x10] sm:$0xc0] }
 0xc5d   :  { %1748 = vmatpush1.msra.mxu0 %v5610_v4 }
 0xc5e   :  { %1749 = vmatprep.subr.mxu0 %v5622_v6  ;;  %v1422_v6 = vld [vmem:[#allocation2] sm:$0x3] }
 0xc5f   :  { %1750 = vmatpush1.msra.mxu0 %v5634_v10 }
 0xc60   :  { %1751 = vmatprep.subr.mxu0 %v5646_v12 }
 0xc61   :  { %1752 = vmatpush1.msra.mxu0 %v5658_v14 }
 0xc62   :  { %1753 = vmatprep.subr.mxu0 %v5672_v16 }
 0xc63   :  { %1754 = vmatpush1.msra.mxu0 %v5679_v17 }
 0xc64   :  { %1968 = vmatprep.subr.mxu0 %v5940_v52 }
 0xccc   :  { %v1428_v54 = vpop.permute.xlu1 %1427 }
 0xccd   :  { %4643 = vmatmul.mubr.msk.f32.vlgmr.msra.gmra.mxu1 %vm219_vm1, %v1428_v54 }
 0xcce   :  { %1666 = vmatpush1.msra.mxu1 %v5947_v56  ;;  %1713 = vmatprep.mubr.f32.mxu1 %v5251_v39 }
 0xccf   :  { %1667 = vmatprep.subr.mxu1 %v5954_v58 }
 0xcd0   :  { %1668 = vmatpush1.msra.mxu1 %v5960_v60 }
 0xcd1   :  { %1669 = vmatprep.subr.mxu1 %v5966_v62 }
 0xcd2   :  { %1670 = vmatpush1.msra.mxu1 %v5545_v57  ;;  %v5983_v57 = vld [vmem:[%s7365_s8 + $0x78] sm:$0xff] }
 0xcd3   :  { %1671 = vmatprep.subr.mxu1 %v5557_v59 }
 0xcd4   :  { %1672 = vmatpush1.msra.mxu1 %v5569_v61 }
 0xcd5   :  { %1673 = vmatprep.subr.mxu1 %v5581_v63 }
 0xcd6   :  { %1674 = vmatpush1.msra.mxu1 %v5593_v1 }
 0xcd7   :  { %1675 = vmatprep.subr.mxu1 %v5605_v3 }
 0xcd8   :  { %1676 = vmatpush1.msra.mxu1 %v5617_v5 }
 0xcd9   :  { %1677 = vmatprep.subr.mxu1 %v5629_v7 }
 0xcda   :  { %1678 = vmatpush1.msra.mxu1 %v5641_v11 }
 0xcdb   :  { %1679 = vmatprep.subr.mxu1 %v5653_v13 }
 0xcdc   :  { %1680 = vmatpush1.msra.mxu1 %v5665_v15 }
 0xcdd   :  { %1894 = vmatprep.subr.mxu1 %v5983_v57 }
 0xd14   :  { %v1570_v59 = vpop.f32.mrf.mxu0 }
 0xd15   :  { %v1596_v61 = vrot.slane %v1570_v59, 2 }
 0xd16   :  { %v1572_v63 = vpop.f32.mrf.mxu0 }
 0xd17   :  { %v1614_v0 = vadd.f32 %v5741_v43, %v1572_v63  ;;  %1597 = vrot.lane.b32.xlu0 %v1596_v61, %s5252_s4 }
 0xd19   :  { %v1616_v1 = vrot.slane %v1614_v0, 2 }
 0xd1b   :  { %1617 = vrot.lane.b32.xlu1 %v1616_v1, %s5252_s4 }
 0xd89   :  { %v1598_v3 = vpop.permute.xlu0 %1597 }
 0xd8a   :  { %v1600_v4 = vadd.f32 %v1598_v3, %v1424_v2  ;;  %v1601_v38 = vadd.f32 %v1598_v3, %v1425_v51  ;;  %v6004_v3 = vld [vmem:[%s7365_s8 + $0xf0] sm:$0xff] }
 0xd8c   :  { %v4646_v5 = vmul.f32 -1.442695, %v1600_v4  ;;  %v4647_v26 = vmul.f32 -1.442695, %v1601_v38  ;;  %v6019_v4 = vld [vmem:[%s7365_s8 + $0xe0] sm:$0xff] }
 0xd8d   :  { %v1497_v7 = vpop.f32.mrf.mxu1  ;;  %v1618_v17 = vpop.permute.xlu1 %1617  ;;  %v6167_v38 = vld [vmem:[%s7365_s8] sm:$0xff] }
 0xd8e   :  { %4991 = vpow2.f32 %v4646_v5  ;;  %v1575_v10 = vadd.f32 %v1497_v7, %v1422_v6  ;;  %v6025_v5 = vld [vmem:[%s7365_s8 + $0xd8] sm:$0xff]  ;;  %v6031_v6 = vld [vmem:[%s7365_s8 + $0xd0] sm:$0xff]  ;;  %v6037_v7 = vld [vmem:[%s7365_s8 + $0xc8] sm:$0xff] }
 0xd8f   :  { %v1499_v41 = vpop.f32.mrf.mxu1 }
 0xd90   :  { %v4645_v11 = vmul.f32 -1.442695, %v1575_v10  ;;  %v1582_v44 = vadd.f32 %v5749_v32, %v1499_v41  ;;  %v6043_v10 = vld [vmem:[%s7365_s8 + $0xc0] sm:$0xff] }
 0xd91   :  { %v6091_v41 = vld [vmem:[%s7365_s8 + $0x80] sm:$0xff] }
 0xd92   :  { %4993 = vpow2.f32 %v4645_v11  ;;  %v6049_v11 = vld [vmem:[%s7365_s8 + $0xb8] sm:$0xff] }
 0xd9b   :  { %v4992_v12 = vpop.eup %4991 }
 0xd9c   :  { %v1608_v13 = vadd.f32 1.0, %v4992_v12  ;;  %v6055_v12 = vld [vmem:[%s7365_s8 + $0xb0] sm:$0xff] }
 0xd9e   :  { %4995 = vrcp.f32 %v1608_v13  ;;  %v6061_v13 = vld [vmem:[%s7365_s8 + $0xa8] sm:$0xff] }
 0xd9f   :  { %v4994_v14 = vpop.eup %4993 }
 0xda0   :  { %v1579_v15 = vadd.f32 1.0, %v4994_v14  ;;  %v6067_v14 = vld [vmem:[%s7365_s8 + $0xa0] sm:$0xff] }
 0xda2   :  { %4997 = vrcp.f32 %v1579_v15  ;;  %v6073_v15 = vld [vmem:[%s7365_s8 + $0x98] sm:$0xff] }
 0xdab   :  { %v4996_v16 = vpop.eup %4995 }
 0xdac   :  { %v1620_v50 = vmul.f32 %v4996_v16, %v1618_v17  ;;  %v6079_v16 = vld [vmem:[%s7365_s8 + $0x90] sm:$0xff]  ;;  %v6085_v17 = vld [vmem:[%s7365_s8 + $0x88] sm:$0xff] }
 0xdae   :  { %v1621_v53 = vadd.f32 %v1620_v50, %v1425_v51  ;;  %v6107_v51 = vld [vmem:[%s7365_s8 + $0x50] sm:$0xff] }
 0xdaf   :  { %v4998_v46 = vpop.eup %4997 }
 0xdb0   :  { %4999 = vtanh.f32 %v1621_v53  ;;  %v1583_v47 = vmul.f32 %v4998_v46, %v1582_v44  ;;  %v1586_v59 = vsub.f32 1.0, %v4998_v46  ;;  %v1593_v0 = vmul.f32 %v4998_v46, %v1426_v34  ;;  %v6013_v34 = vld [vmem:[%s7365_s8 + $0xe8] sm:$0xff]  ;;  %v6119_v53 = vld [vmem:[%s7365_s8 + $0x40] sm:$0xff]  ;;  %v6125_v44 = vld [vmem:[%s7365_s8 + $0x38] sm:$0xff] }
 0xdb1   :  { %v6131_v46 = vld [vmem:[%s7365_s8 + $0x30] sm:$0xff] }
 0xdb2   :  { %v1584_v27 = vadd.f32 %v1583_v47, %v1423_v25  ;;  %v6137_v47 = vld [vmem:[%s7365_s8 + $0x28] sm:$0xff]  ;;  %v6143_v25 = vld [vmem:[%s7365_s8 + $0x20] sm:$0xff] }
 0xdb4   :  { %5001 = vtanh.f32 %v1584_v27  ;;  %v6149_v27 = vld [vmem:[%s7365_s8 + $0x18] sm:$0xff] }
 0xdb5   :  { %5003 = vpow2.f32 %v4647_v26 }
 0xdbd   :  { %v5000_v49 = vpop.eup %4999 }
 0xdbe   :  { %1625 = vrot.lane.b32.xlu0 %v5000_v49, %s5252_s4  ;;  %v6155_v49 = vld [vmem:[%s7365_s8 + $0x10] sm:$0xff] }
 0xdc1   :  { %v5002_v48 = vpop.eup %5001 }
 0xdc2   :  { %1588 = vrot.lane.b32.xlu1 %v5002_v48, %s5252_s4  ;;  %v5004_v28 = vpop.eup %5003  ;;  %v6161_v48 = vld [vmem:[%s7365_s8 + $0x8] sm:$0xff] }
 0xdc3   :  { %v1609_v29 = vadd.f32 1.0, %v5004_v28 }
 0xdc5   :  { %5005 = vrcp.f32 %v1609_v29 }
 0xdd2   :  { %v5006_v30 = vpop.eup %5005 }
 0xdd3   :  { %v1623_v37 = vsub.f32 1.0, %v5006_v30  ;;  %v1631_v31 = vmul.f32 %v5006_v30, %v1629_v42  ;;  %v1645_v42 = vld [vmem:[#allocation2 + $0x10] sm:$0x30] }
 0xe30   :  { %v1626_v45 = vpop.permute.xlu0 %1625 }
 0xe31   :  { %v1628_v55 = vmul.f32 %v1626_v45, %v1623_v37 }
 0xe33   :  { %v5993_v54 = vadd.f32 %v1631_v31, %v1628_v55 }
 0xe34   :  { %v1589_v61 = vpop.permute.xlu1 %1588 }
 0xe35   :  { %v1720_v63 = vrot.slane %v5993_v54, 6  ;;  %v1591_v1 = vmul.f32 %v1589_v61, %v1586_v59  ;;  %v1643_v61 = vld [vmem:[#allocation2] sm:$0xc] }
 0xe37   :  { %v5998_v2 = vadd.f32 %v1593_v0, %v1591_v1  ;;  %4649 = vmatmul.mubr.msk.f32.vlgmr.msra.gmra.mxu0 %vm219_vm1, %v1720_v63 }
 0xe38   :  { %1969 = vmatpush1.msra.mxu0 %v6004_v3  ;;  %2016 = vmatprep.mubr.f32.mxu0 %v5251_v39 }
 0xe39   :  { %1634 = vrot.lane.b32.xlu0 %v5998_v2, %s5252_s4  ;;  %1970 = vmatprep.subr.mxu0 %v6013_v34 }
 0xe3a   :  { %1971 = vmatpush1.msra.mxu0 %v6019_v4 }
 0xe3b   :  { %1972 = vmatprep.subr.mxu0 %v6025_v5 }
 0xe3c   :  { %1973 = vmatpush1.msra.mxu0 %v6031_v6 }
 0xe3d   :  { %1974 = vmatprep.subr.mxu0 %v6037_v7 }
 0xe3e   :  { %1975 = vmatpush1.msra.mxu0 %v6043_v10 }
 0xe3f   :  { %1976 = vmatprep.subr.mxu0 %v6049_v11 }
 0xe40   :  { %1977 = vmatpush1.msra.mxu0 %v6055_v12 }
 0xe41   :  { %1978 = vmatprep.subr.mxu0 %v6061_v13 }
 0xe42   :  { %1979 = vmatpush1.msra.mxu0 %v6067_v14 }
 0xe43   :  { %1980 = vmatprep.subr.mxu0 %v6073_v15 }
 0xe44   :  { %1981 = vmatpush1.msra.mxu0 %v6079_v16 }
 0xe45   :  { %1982 = vmatprep.subr.mxu0 %v6085_v17 }
 0xe46   :  { %1983 = vmatpush1.msra.mxu0 %v6091_v41 }
 0xe47   :  { %2197 = vmatprep.subr.mxu0 %v5940_v52  ;;  %v6113_v52 = vld [vmem:[%s7365_s8 + $0x48] sm:$0xff] }
 0xeab   :  { %v6095_v50 = vpop.permute.xlu0 %1634 }
 0xeac   :  { %4648 = vmatmul.mubr.msk.f32.vlgmr.msra.gmra.mxu1 %vm219_vm1, %v6095_v50 }
 0xead   :  { %1895 = vmatpush1.msra.mxu1 %v5947_v56  ;;  %1942 = vmatprep.mubr.f32.mxu1 %v5251_v39 }
 0xeae   :  { %1896 = vmatprep.subr.mxu1 %v5954_v58 }
 0xeaf   :  { %1897 = vmatpush1.msra.mxu1 %v5960_v60 }
 0xeb0   :  { %1898 = vmatprep.subr.mxu1 %v5966_v62 }
 0xeb1   :  { %1899 = vmatpush1.msra.mxu1 %v6107_v51 }
 0xeb2   :  { %1900 = vmatprep.subr.mxu1 %v6113_v52 }
 0xeb3   :  { %1901 = vmatpush1.msra.mxu1 %v6119_v53 }
 0xeb4   :  { %1902 = vmatprep.subr.mxu1 %v6125_v44 }
 0xeb5   :  { %1903 = vmatpush1.msra.mxu1 %v6131_v46 }
 0xeb6   :  { %1904 = vmatprep.subr.mxu1 %v6137_v47 }
 0xeb7   :  { %1905 = vmatpush1.msra.mxu1 %v6143_v25 }
 0xeb8   :  { %1906 = vmatprep.subr.mxu1 %v6149_v27 }
 0xeb9   :  { %1907 = vmatpush1.msra.mxu1 %v6155_v49 }
 0xeba   :  { %1908 = vmatprep.subr.mxu1 %v6161_v48 }
 0xebb   :  { %1909 = vmatpush1.msra.mxu1 %v6167_v38 }
 0xebc   :  { %2123 = vmatprep.subr.mxu1 %v5983_v57 }
 0xef7   :  { %v1789_v26 = vpop.f32.mrf.mxu0 }
 0xef8   :  { %v1822_v28 = vrot.slane %v1789_v26, 4 }
 0xef9   :  { %v1791_v29 = vpop.f32.mrf.mxu0 }
 0xefa   :  { %v1840_v30 = vadd.f32 %v5741_v43, %v1791_v29  ;;  %1823 = vrot.lane.b32.xlu1 %v1822_v28, %s5252_s4 }
 0xefc   :  { %v1842_v37 = vrot.slane %v1840_v30, 4 }
 0xefe   :  { %1843 = vrot.lane.b32.xlu0 %v1842_v37, %s5252_s4 }
 0xf6c   :  { %v1824_v45 = vpop.permute.xlu1 %1823  ;;  %v1715_v31 = vpop.f32.mrf.mxu1 }
 0xf6d   :  { %v1826_v55 = vadd.f32 %v1824_v45, %v1645_v42  ;;  %v1795_v59 = vrot.slane %v1715_v31, 6  ;;  %v1817_v42 = vrot.slane %v5998_v2, 6 }
 0xf6e   :  { %v1717_v28 = vpop.f32.mrf.mxu1 }
 0xf6f   :  { %v4651_v63 = vmul.f32 -1.442695, %v1826_v55  ;;  %v1797_v0 = vadd.f32 %v1795_v59, %v1643_v61  ;;  %v1804_v29 = vadd.f32 %v5749_v32, %v1717_v28  ;;  %v1646_v59 = vld [vmem:[#allocation2 + $0x8] sm:$0x30] }
 0xf70   :  { %v1844_v37 = vpop.permute.xlu0 %1843  ;;  %v1827_v32 = vadd.f32 %v1824_v45, %v1646_v59 }
 0xf71   :  { %5007 = vpow2.f32 %v4651_v63  ;;  %v4650_v57 = vmul.f32 -1.442695, %v1797_v0  ;;  %v1806_v31 = vrot.slane %v1804_v29, 6 }
 0xf73   :  { %5009 = vpow2.f32 %v4650_v57  ;;  %v1644_v57 = vld [vmem:[#allocation2 + $0x18] sm:$0xc] }
 0xf7e   :  { %v5008_v1 = vpop.eup %5007 }
 0xf7f   :  { %v1834_v26 = vadd.f32 1.0, %v5008_v1 }
 0xf80   :  { %v5010_v22 = vpop.eup %5009 }
 0xf81   :  { %5011 = vrcp.f32 %v1834_v26  ;;  %v1801_v43 = vadd.f32 1.0, %v5010_v22 }
 0xf83   :  { %5013 = vrcp.f32 %v1801_v43  ;;  %v4652_v43 = vmul.f32 -1.442695, %v1827_v32 }
 0xf8e   :  { %v5012_v30 = vpop.eup %5011 }
 0xf8f   :  { %v1846_v23 = vmul.f32 %v5012_v30, %v1844_v37 }
 0xf90   :  { %v5014_v55 = vpop.eup %5013 }
 0xf91   :  { %v1808_v61 = vmul.f32 %v5014_v55, %v1806_v31  ;;  %v1847_v63 = vadd.f32 %v1846_v23, %v1646_v59  ;;  %v1819_v0 = vmul.f32 %v5014_v55, %v1817_v42  ;;  %v1855_v23 = vrot.slane %v5993_v54, 2 }
 0xf93   :  { %v1809_v1 = vadd.f32 %v1808_v61, %v1644_v57  ;;  %5015 = vtanh.f32 %v1847_v63  ;;  %v1811_v61 = vsub.f32 1.0, %v5014_v55 }
 0xf95   :  { %5017 = vtanh.f32 %v1809_v1 }
 0xf96   :  { %5019 = vpow2.f32 %v4652_v43 }
 0xfa0   :  { %v5016_v22 = vpop.eup %5015 }
 0xfa1   :  { %1851 = vrot.lane.b32.xlu0 %v5016_v22, %s5252_s4 }
 0xfa2   :  { %v5018_v26 = vpop.eup %5017 }
 0xfa3   :  { %1813 = vrot.lane.b32.xlu1 %v5018_v26, %s5252_s4  ;;  %v5020_v2 = vpop.eup %5019 }
 0xfa4   :  { %v1835_v28 = vadd.f32 1.0, %v5020_v2 }
 0xfa6   :  { %5021 = vrcp.f32 %v1835_v28 }
 0xfb3   :  { %v5022_v29 = vpop.eup %5021 }
 0xfb4   :  { %v1849_v30 = vsub.f32 1.0, %v5022_v29  ;;  %v1857_v42 = vmul.f32 %v5022_v29, %v1855_v23 }
0x1013   :  { %v1852_v37 = vpop.permute.xlu0 %1851 }
0x1014   :  { %v1854_v31 = vmul.f32 %v1852_v37, %v1849_v30 }
0x1015   :  { %v1814_v63 = vpop.permute.xlu1 %1813 }
0x1016   :  { %v6179_v57 = vadd.f32 %v1857_v42, %v1854_v31  ;;  %v1816_v1 = vmul.f32 %v1814_v63, %v1811_v61 }
0x1018   :  { %v1949_v22 = vrot.slane %v6179_v57, 4  ;;  %v6182_v45 = vadd.f32 %v1819_v0, %v1816_v1  ;;  %v1870_v0 = vld [vmem:[#allocation2 + $0x18] sm:$0x30]  ;;  %v2084_v42 = vrot.slane %v6179_v57, 2 }
0x101a   :  { %4654 = vmatmul.mubr.msk.f32.vlgmr.msra.gmra.mxu0 %vm219_vm1, %v1949_v22  ;;  %v1873_v59 = vrot.slane %v6182_v45, 2  ;;  %v2046_v22 = vrot.slane %v6182_v45, 6 }
0x101b   :  { %2198 = vmatpush1.msra.mxu0 %v6004_v3  ;;  %2245 = vmatprep.mubr.f32.mxu0 %v5251_v39 }
0x101c   :  { %1874 = vrot.lane.b32.xlu1 %v1873_v59, %s5252_s4  ;;  %2199 = vmatprep.subr.mxu0 %v6013_v34 }
0x101d   :  { %2200 = vmatpush1.msra.mxu0 %v6019_v4 }
0x101e   :  { %2201 = vmatprep.subr.mxu0 %v6025_v5 }
0x101f   :  { %2202 = vmatpush1.msra.mxu0 %v6031_v6  ;;  %v1871_v6 = vld [vmem:[#allocation2 + $0x10] sm:$0xc] }
0x1020   :  { %2203 = vmatprep.subr.mxu0 %v6037_v7 }
0x1021   :  { %2204 = vmatpush1.msra.mxu0 %v6043_v10 }
0x1022   :  { %2205 = vmatprep.subr.mxu0 %v6049_v11 }
0x1023   :  { %2206 = vmatpush1.msra.mxu0 %v6055_v12  ;;  %v1869_v12 = vld [vmem:[#allocation2] sm:$0x30] }
0x1024   :  { %2207 = vmatprep.subr.mxu0 %v6061_v13 }
0x1025   :  { %2208 = vmatpush1.msra.mxu0 %v6067_v14 }
0x1026   :  { %2209 = vmatprep.subr.mxu0 %v6073_v15 }
0x1027   :  { %2210 = vmatpush1.msra.mxu0 %v6079_v16 }
0x1028   :  { %2211 = vmatprep.subr.mxu0 %v6085_v17 }
0x1029   :  { %2212 = vmatpush1.msra.mxu0 %v6091_v41 }
0x108e   :  { %v1875_v3 = vpop.permute.xlu1 %1874 }
0x108f   :  { %4653 = vmatmul.mubr.msk.f32.vlgmr.msra.gmra.mxu1 %vm219_vm1, %v1875_v3 }
0x1090   :  { %2124 = vmatpush1.msra.mxu1 %v5947_v56  ;;  %2171 = vmatprep.mubr.f32.mxu1 %v5251_v39 }
0x1091   :  { %2125 = vmatprep.subr.mxu1 %v5954_v58 }
0x1092   :  { %2126 = vmatpush1.msra.mxu1 %v5960_v60 }
0x1093   :  { %2127 = vmatprep.subr.mxu1 %v5966_v62  ;;  %v6223_v62 = vld [vmem:[%s7369_s10 + $0x1] ss:$0 sm:$0xff] }
0x1094   :  { %2128 = vmatpush1.msra.mxu1 %v6107_v51 }
0x1095   :  { %2129 = vmatprep.subr.mxu1 %v6113_v52 }
0x1096   :  { %2130 = vmatpush1.msra.mxu1 %v6119_v53  ;;  %v6231_v53 = vld [vmem:[%s7369_s10] ss:$0 sm:$0xff] }
0x1097   :  { %2131 = vmatprep.subr.mxu1 %v6125_v44 }
0x1098   :  { %2132 = vmatpush1.msra.mxu1 %v6131_v46 }
0x1099   :  { %2133 = vmatprep.subr.mxu1 %v6137_v47 }
0x109a   :  { %2134 = vmatpush1.msra.mxu1 %v6143_v25 }
0x109b   :  { %2135 = vmatprep.subr.mxu1 %v6149_v27 }
0x109c   :  { %2136 = vmatpush1.msra.mxu1 %v6155_v49 }
0x109d   :  { %2137 = vmatprep.subr.mxu1 %v6161_v48  ;;  %v1872_v48 = vld [vmem:[#allocation2 + $0x8] sm:$0xc] }
0x109e   :  { %2138 = vmatpush1.msra.mxu1 %v6167_v38 }
0x10da   :  { %v2018_v56 = vpop.f32.mrf.mxu0 }
0x10db   :  { %v2051_v58 = vrot.slane %v2018_v56, 6 }
0x10dc   :  { %v2020_v60 = vpop.f32.mrf.mxu0 }
0x10dd   :  { %v2069_v34 = vadd.f32 %v6223_v62, %v2020_v60  ;;  %2052 = vrot.lane.b32.xlu0 %v2051_v58, %s5252_s4 }
0x10df   :  { %v2071_v4 = vrot.slane %v2069_v34, 6 }
0x10e1   :  { %2072 = vrot.lane.b32.xlu1 %v2071_v4, %s5252_s4 }
0x114f   :  { %v1944_v5 = vpop.f32.mrf.mxu1  ;;  %v2053_v7 = vpop.permute.xlu0 %2052 }
0x1150   :  { %v2024_v10 = vrot.slane %v1944_v5, 4  ;;  %v2055_v11 = vadd.f32 %v2053_v7, %v1871_v6  ;;  %v2056_v2 = vadd.f32 %v2053_v7, %v1872_v48 }
0x1151   :  { %v1946_v52 = vpop.f32.mrf.mxu1 }
0x1152   :  { %v2026_v13 = vadd.f32 %v2024_v10, %v1869_v12  ;;  %v4656_v14 = vmul.f32 -1.442695, %v2055_v11  ;;  %v2033_v44 = vadd.f32 %v6231_v53, %v1946_v52  ;;  %v4657_v28 = vmul.f32 -1.442695, %v2056_v2  ;;  %v2100_v11 = vld [vmem:[#allocation2 + $0x10] sm:$0x3] }
0x1153   :  { %v2073_v47 = vpop.permute.xlu1 %2072 }
0x1154   :  { %v4655_v15 = vmul.f32 -1.442695, %v2026_v13  ;;  %5023 = vpow2.f32 %v4656_v14  ;;  %v2035_v25 = vrot.slane %v2033_v44, 4 }
0x1156   :  { %5025 = vpow2.f32 %v4655_v15 }
0x1161   :  { %v5024_v16 = vpop.eup %5023 }
0x1162   :  { %v2063_v17 = vadd.f32 1.0, %v5024_v16 }
0x1163   :  { %v5026_v41 = vpop.eup %5025 }
0x1164   :  { %v2030_v51 = vadd.f32 1.0, %v5026_v41  ;;  %5027 = vrcp.f32 %v2063_v17  ;;  %v2098_v17 = vld [vmem:[#allocation2] sm:$0xc0] }
0x1166   :  { %5029 = vrcp.f32 %v2030_v51 }
0x1171   :  { %v5028_v46 = vpop.eup %5027 }
0x1172   :  { %v2075_v27 = vmul.f32 %v5028_v46, %v2073_v47 }
0x1173   :  { %v5030_v49 = vpop.eup %5029 }
0x1174   :  { %v2037_v38 = vmul.f32 %v5030_v49, %v2035_v25  ;;  %v2076_v55 = vadd.f32 %v2075_v27, %v1872_v48  ;;  %v2040_v1 = vsub.f32 1.0, %v5030_v49  ;;  %v2048_v56 = vmul.f32 %v5030_v49, %v2046_v22  ;;  %v2353_v22 = vld [vmem:[%s7370_s11 + $0xd8] sm:$0xff] }
0x1176   :  { %v2038_v26 = vadd.f32 %v2037_v38, %v1870_v0  ;;  %5031 = vtanh.f32 %v2076_v55  ;;  %v6257_v38 = vld [vmem:[#allocation2 + $0x8] sm:$0x3] }
0x1178   :  { %5033 = vtanh.f32 %v2038_v26 }
0x1179   :  { %5035 = vpow2.f32 %v4657_v28 }
0x1183   :  { %v5032_v32 = vpop.eup %5031 }
0x1184   :  { %2080 = vrot.lane.b32.xlu1 %v5032_v32, %s5252_s4 }
0x1185   :  { %v5034_v43 = vpop.eup %5033 }
0x1186   :  { %2042 = vrot.lane.b32.xlu0 %v5034_v43, %s5252_s4  ;;  %v5036_v29 = vpop.eup %5035  ;;  %v2099_v43 = vld [vmem:[#allocation2 + $0x18] sm:$0xc0] }
0x1187   :  { %v2064_v30 = vadd.f32 1.0, %v5036_v29  ;;  %v2365_v29 = vld [vmem:[%s7370_s11 + $0x138] sm:$0xff] }
0x1189   :  { %5037 = vrcp.f32 %v2064_v30  ;;  %v2363_v30 = vld [vmem:[%s7370_s11 + $0x128] sm:$0xff] }
0x1196   :  { %v5038_v23 = vpop.eup %5037 }
0x1197   :  { %v2078_v37 = vsub.f32 1.0, %v5038_v23  ;;  %v2086_v61 = vmul.f32 %v5038_v23, %v2084_v42  ;;  %v2362_v23 = vld [vmem:[%s7370_s11 + $0x120] sm:$0xff]  ;;  %v2364_v42 = vld [vmem:[%s7370_s11 + $0x130] sm:$0xff] }
0x11f6   :  { %v2081_v31 = vpop.permute.xlu1 %2080 }
0x11f7   :  { %v2083_v63 = vmul.f32 %v2081_v31, %v2078_v37  ;;  %v2359_v37 = vld [vmem:[%s7370_s11 + $0x108] sm:$0xff]  ;;  %v2357_v31 = vld [vmem:[%s7370_s11 + $0xf8] sm:$0xff] }
0x11f8   :  { %v2043_v59 = vpop.permute.xlu0 %2042 }
0x11f9   :  { %v6238_v3 = vadd.f32 %v2086_v61, %v2083_v63  ;;  %v2045_v58 = vmul.f32 %v2043_v59, %v2040_v1  ;;  %v2356_v61 = vld [vmem:[%s7370_s11 + $0xf0] sm:$0xff]  ;;  %v2354_v63 = vld [vmem:[%s7370_s11 + $0xe0] sm:$0xff]  ;;  %v2361_v1 = vld [vmem:[%s7370_s11 + $0x118] sm:$0xff] }
0x11fa   :  { %v2351_v59 = vld [vmem:[%s7370_s11 + $0xc8] sm:$0xff] }
0x11fb   :  { %v2178_v60 = vrot.slane %v6238_v3, 2  ;;  %v6241_v34 = vadd.f32 %v2048_v56, %v2045_v58  ;;  %v2358_v56 = vld [vmem:[%s7370_s11 + $0x100] sm:$0xff]  ;;  %v2348_v58 = vld [vmem:[%s7370_s11 + $0xb0] sm:$0xff] }
0x11fd   :  { %4659 = vmatmul.mubr.msk.f32.vlgmr.msra.gmra.mxu0 %vm219_vm1, %v2178_v60  ;;  %v2102_v4 = vrot.slane %v6241_v34, 4 }
0x11ff   :  { %2103 = vrot.lane.b32.xlu0 %v2102_v4, %s5252_s4  ;;  %v2355_v4 = vld [vmem:[%s7370_s11 + $0xe8] sm:$0xff] }
0x1271   :  { %v2104_v5 = vpop.permute.xlu0 %2103 }
0x1272   :  { %4658 = vmatmul.mubr.msk.f32.vlgmr.msra.gmra.mxu1 %vm219_vm1, %v2104_v5  ;;  %v2347_v5 = vld [vmem:[%s7370_s11 + $0xa8] sm:$0xff] }
0x1273   :  { %2455 = vmatprep.mubr.f32.mxu1 %v5251_v39 }
0x12bd   :  { %v2247_v6 = vpop.f32.mrf.mxu0 }
0x12be   :  { %2280 = vrot.lane.b32.xlu1 %v2247_v6, %s5252_s4  ;;  %v2345_v6 = vld [vmem:[%s7370_s11 + $0x98] sm:$0xff] }
0x12bf   :  { %v2249_v7 = vpop.f32.mrf.mxu0 }
0x12c0   :  { %v2297_v10 = vadd.f32 %v6223_v62, %v2249_v7  ;;  %v2352_v7 = vld [vmem:[%s7370_s11 + $0xd0] sm:$0xff] }
0x12c2   :  { %2299 = vrot.lane.b32.xlu0 %v2297_v10, %s5252_s4  ;;  %v2344_v10 = vld [vmem:[%s7370_s11 + $0x90] sm:$0xff] }
0x1330   :  { %v6253_v12 = vpop.permute.xlu1 %2280 }
0x1331   :  { %v2283_v13 = vadd.f32 %v6253_v12, %v2100_v11  ;;  %v2342_v11 = vld [vmem:[%s7370_s11 + $0x80] sm:$0xff] }
0x1332   :  { %v2173_v14 = vpop.f32.mrf.mxu1 }
0x1333   :  { %v4661_v15 = vmul.f32 -1.442695, %v2283_v13  ;;  %v2253_v16 = vrot.slane %v2173_v14, 2  ;;  %v2349_v13 = vld [vmem:[%s7370_s11 + $0xb8] sm:$0xff] }
0x1334   :  { %v2175_v47 = vpop.f32.mrf.mxu1  ;;  %v2300_v49 = vpop.permute.xlu0 %2299  ;;  %v2341_v14 = vld [vmem:[%s7370_s11 + $0x78] sm:$0xff] }
0x1335   :  { %5039 = vpow2.f32 %v4661_v15  ;;  %v2255_v41 = vadd.f32 %v2253_v16, %v2098_v17  ;;  %v2262_v25 = vadd.f32 %v6231_v53, %v2175_v47  ;;  %v2339_v15 = vld [vmem:[%s7370_s11 + $0x68] sm:$0xff]  ;;  %v2346_v16 = vld [vmem:[%s7370_s11 + $0xa0] sm:$0xff] }
0x1336   :  { %v2338_v17 = vld [vmem:[%s7370_s11 + $0x60] sm:$0xff]  ;;  %v2335_v47 = vld [vmem:[%s7370_s11 + $0x48] sm:$0xff] }
0x1337   :  { %v4660_v51 = vmul.f32 -1.442695, %v2255_v41  ;;  %v2264_v55 = vrot.slane %v2262_v25, 2  ;;  %v2336_v41 = vld [vmem:[%s7370_s11 + $0x50] sm:$0xff]  ;;  %v2333_v25 = vld [vmem:[%s7370_s11 + $0x38] sm:$0xff] }
0x1339   :  { %5041 = vpow2.f32 %v4660_v51  ;;  %v2343_v51 = vld [vmem:[%s7370_s11 + $0x88] sm:$0xff] }
0x1342   :  { %v5040_v52 = vpop.eup %5039 }
0x1343   :  { %v2291_v44 = vadd.f32 1.0, %v5040_v52  ;;  %v2284_v52 = vadd.f32 %v6253_v12, %v6257_v38  ;;  %v2332_v12 = vld [vmem:[%s7370_s11 + $0x30] sm:$0xff] }
0x1345   :  { %5043 = vrcp.f32 %v2291_v44  ;;  %v4662_v44 = vmul.f32 -1.442695, %v2284_v52  ;;  %v6548_v52 = vld [vmem:[%s7371_s12 + $0xd0] sm:$0xff] }
0x1346   :  { %v5042_v46 = vpop.eup %5041 }
0x1347   :  { %v2259_v62 = vadd.f32 1.0, %v5042_v46 }
0x1349   :  { %5045 = vrcp.f32 %v2259_v62 }
0x1352   :  { %v5044_v27 = vpop.eup %5043 }
0x1353   :  { %v2302_v48 = vmul.f32 %v5044_v27, %v2300_v49  ;;  %v2340_v27 = vld [vmem:[%s7370_s11 + $0x70] sm:$0xff]  ;;  %v2330_v49 = vld [vmem:[%s7370_s11 + $0x20] sm:$0xff] }
0x1355   :  { %v2303_v0 = vadd.f32 %v2302_v48, %v6257_v38  ;;  %v2337_v48 = vld [vmem:[%s7370_s11 + $0x58] sm:$0xff] }
0x1356   :  { %v6260_v26 = vpop.eup %5045 }
0x1357   :  { %v2266_v32 = vmul.f32 %v6260_v26, %v2264_v55  ;;  %5047 = vtanh.f32 %v2303_v0  ;;  %v2329_v55 = vld [vmem:[%s7370_s11 + $0x18] sm:$0xff]  ;;  %v2327_v0 = vld [vmem:[%s7370_s11 + $0x8] sm:$0xff] }
0x1359   :  { %v2267_v2 = vadd.f32 %v2266_v32, %v2099_v43  ;;  %v2334_v32 = vld [vmem:[%s7370_s11 + $0x40] sm:$0xff] }
0x135a   :  { %v2326_v43 = vld [vmem:[%s7370_s11] sm:$0xff] }
0x135b   :  { %5049 = vtanh.f32 %v2267_v2  ;;  %v2331_v2 = vld [vmem:[%s7370_s11 + $0x28] sm:$0xff] }
0x135c   :  { %5051 = vpow2.f32 %v4662_v44  ;;  %v6553_v44 = vld [vmem:[%s7371_s12 + $0x28] sm:$0xff] }
0x1364   :  { %v5048_v28 = vpop.eup %5047 }
0x1365   :  { %2307 = vrot.lane.b32.xlu1 %v5048_v28, %s5252_s4  ;;  %v6433_v28 = vld [vmem:[%s7371_s12 + $0x78] sm:$0xff] }
0x1368   :  { %v5050_v53 = vpop.eup %5049 }
0x1369   :  { %2271 = vrot.lane.b32.xlu0 %v5050_v53, %s5252_s4  ;;  %952 = vrot.lane.b32.xlu1 %v5809_v21, %s5252_s4  ;;  %v2372_v21 = vld [vmem:[%s7370_s11 + $0x170] sm:$0xff]  ;;  %v5052_v46 = vpop.eup %5051 }
0x136a   :  { %2391 = vmatprep.subr.mxu1 %v2372_v21  ;;  %v2292_v62 = vadd.f32 1.0, %v5052_v46  ;;  %v6560_v46 = vld [vmem:[%s7371_s12 + $0xc8] sm:$0xff] }
0x136c   :  { %5053 = vrcp.f32 %v2292_v62  ;;  %v6565_v62 = vld [vmem:[%s7371_s12 + $0x20] sm:$0xff] }
0x136d   :  { %1183 = vrot.lane.b32.xlu0 %v5860_v24, %s5252_s4  ;;  %1411 = vrot.lane.b32.xlu1 %v5917_v35, %s5252_s4  ;;  %v2371_v24 = vld [vmem:[%s7370_s11 + $0x168] sm:$0xff]  ;;  %v2370_v35 = vld [vmem:[%s7370_s11 + $0x160] sm:$0xff] }
0x136e   :  { %2392 = vmatpush1.msra.mxu1 %v2371_v24 }
0x1371   :  { %730 = vrot.lane.b32.xlu0 %v5754_v33, %s5252_s4  ;;  %958 = vrot.lane.b32.xlu1 %v5806_v18, %s5252_s4  ;;  %v2369_v33 = vld [vmem:[%s7370_s11 + $0x158] sm:$0xff]  ;;  %v2368_v18 = vld [vmem:[%s7370_s11 + $0x150] sm:$0xff] }
0x1372   :  { %2393 = vmatprep.subr.mxu1 %v2369_v33 }
0x1373   :  { %2394 = vmatpush1.msra.mxu1 %v2368_v18  ;;  %v2328_v18 = vld [vmem:[%s7370_s11 + $0x10] sm:$0xff] }
0x1375   :  { %1189 = vrot.lane.b32.xlu0 %v5857_v40, %s5252_s4  ;;  %1417 = vrot.lane.b32.xlu1 %v5910_v36, %s5252_s4  ;;  %v2373_v40 = vld [vmem:[%s7370_s11 + $0x178] sm:$0xff]  ;;  %v2366_v36 = vld [vmem:[%s7370_s11 + $0x140] sm:$0xff] }
0x1376   :  { %4816 = vmatprep.subr.mxu0 %v2373_v40  ;;  %2395 = vmatprep.subr.mxu1 %v2366_v36  ;;  %v2269_v36 = vsub.f32 1.0, %v6260_v26 }
0x1377   :  { %4817 = vmatpush3.msra.mxu0 %v2373_v40  ;;  %2396 = vmatpush1.msra.mxu1 %v2365_v29 }
0x1378   :  { %4818 = vmatprep.subr.mxu0 %v2370_v35  ;;  %2397 = vmatprep.subr.mxu1 %v2363_v30 }
0x1379   :  { %1639 = vrot.lane.b32.xlu0 %v5993_v54, %s5252_s4  ;;  %1865 = vrot.lane.b32.xlu1 %v6179_v57, %s5252_s4  ;;  %v2367_v54 = vld [vmem:[%s7370_s11 + $0x148] sm:$0xff]  ;;  %v2360_v57 = vld [vmem:[%s7370_s11 + $0x110] sm:$0xff]  ;;  %v5054_v38 = vpop.eup %5053 }
0x137a   :  { %4819 = vmatpush3.msra.mxu0 %v2370_v35  ;;  %2398 = vmatpush1.msra.mxu1 %v2362_v23  ;;  %v2305_v53 = vsub.f32 1.0, %v5054_v38  ;;  %v2312_v24 = vmul.f32 %v5054_v38, %v2178_v60  ;;  %v2275_v35 = vrot.slane %v6241_v34, 6  ;;  %v6608_v38 = vld [vmem:[%s7371_s12 + $0xa8] sm:$0xff] }
0x137b   :  { %4820 = vmatprep.subr.mxu0 %v2367_v54  ;;  %2399 = vmatprep.subr.mxu1 %v2360_v57 }
0x137c   :  { %4821 = vmatpush3.msra.mxu0 %v2367_v54  ;;  %2400 = vmatpush1.msra.mxu1 %v2359_v37  ;;  %v2277_v60 = vmul.f32 %v6260_v26, %v2275_v35 }
0x137d   :  { %2094 = vrot.lane.b32.xlu0 %v6238_v3, %s5252_s4  ;;  %4822 = vmatprep.subr.mxu0 %v2364_v42  ;;  %v6446_v3 = vld [vmem:[%s7371_s12 + $0xf8] sm:$0xff] }
0x137e   :  { %2401 = vmatprep.subr.mxu1 %v2357_v31  ;;  %4823 = vmatpush3.msra.mxu0 %v2364_v42 }
0x137f   :  { %2402 = vmatpush1.msra.mxu1 %v2356_v61  ;;  %4824 = vmatprep.subr.mxu0 %v2361_v1 }
0x1380   :  { %2403 = vmatprep.subr.mxu1 %v2354_v63  ;;  %4825 = vmatpush3.msra.mxu0 %v2361_v1 }
0x1381   :  { %1860 = vrot.lane.b32.xlu0 %v6182_v45, %s5252_s4  ;;  %v2350_v45 = vld [vmem:[%s7370_s11 + $0xc0] sm:$0xff]  ;;  %2404 = vmatpush1.msra.mxu1 %v2353_v22 }
0x1382   :  { %2405 = vmatprep.subr.mxu1 %v2351_v59  ;;  %4826 = vmatprep.subr.mxu0 %v2358_v56 }
0x1383   :  { %2406 = vmatpush1.msra.mxu1 %v2350_v45  ;;  %4827 = vmatpush3.msra.mxu0 %v2358_v56 }
0x1384   :  { %2407 = vmatprep.subr.mxu1 %v2348_v58  ;;  %4828 = vmatprep.subr.mxu0 %v2355_v4 }
0x1385   :  { %2408 = vmatpush1.msra.mxu1 %v2347_v5  ;;  %4829 = vmatpush3.msra.mxu0 %v2355_v4  ;;  %v6478_v4 = vld [vmem:[%s7371_s12 + $0x68] sm:$0xff]  ;;  %v6483_v5 = vld [vmem:[%s7371_s12 + $0x60] sm:$0xff] }
0x1386   :  { %2409 = vmatprep.subr.mxu1 %v2345_v6  ;;  %4830 = vmatprep.subr.mxu0 %v2352_v7  ;;  %v6490_v6 = vld [vmem:[%s7371_s12 + $0x58] sm:$0xff] }
0x1387   :  { %2410 = vmatpush1.msra.mxu1 %v2344_v10  ;;  %4831 = vmatpush3.msra.mxu0 %v2352_v7  ;;  %v6496_v7 = vld [vmem:[%s7371_s12 + $0x50] sm:$0xff] }
0x1388   :  { %2411 = vmatprep.subr.mxu1 %v2342_v11  ;;  %4832 = vmatprep.subr.mxu0 %v2349_v13  ;;  %v6502_v11 = vld [vmem:[%s7371_s12 + $0xf0] sm:$0xff] }
0x1389   :  { %2412 = vmatpush1.msra.mxu1 %v2341_v14  ;;  %4833 = vmatpush3.msra.mxu0 %v2349_v13  ;;  %v6507_v13 = vld [vmem:[%s7371_s12 + $0x48] sm:$0xff] }
0x138a   :  { %2413 = vmatprep.subr.mxu1 %v2339_v15  ;;  %4834 = vmatprep.subr.mxu0 %v2346_v16  ;;  %v6513_v14 = vld [vmem:[%s7371_s12 + $0xe8] sm:$0xff]  ;;  %v6518_v15 = vld [vmem:[%s7371_s12 + $0x40] sm:$0xff] }
0x138b   :  { %2414 = vmatpush1.msra.mxu1 %v2338_v17  ;;  %4835 = vmatpush3.msra.mxu0 %v2346_v16  ;;  %v6524_v16 = vld [vmem:[%s7371_s12 + $0xe0] sm:$0xff]  ;;  %v6529_v17 = vld [vmem:[%s7371_s12 + $0x38] sm:$0xff] }
0x138c   :  { %2415 = vmatprep.subr.mxu1 %v2336_v41  ;;  %4836 = vmatprep.subr.mxu0 %v2343_v51  ;;  %v6536_v41 = vld [vmem:[%s7371_s12 + $0xd8] sm:$0xff] }
0x138d   :  { %4837 = vmatpush3.msra.mxu0 %v2343_v51  ;;  %2416 = vmatpush1.msra.mxu1 %v2335_v47  ;;  %v6541_v51 = vld [vmem:[%s7371_s12 + $0x30] sm:$0xff]  ;;  %v6572_v47 = vld [vmem:[%s7371_s12 + $0xc0] sm:$0xff] }
0x138e   :  { %4838 = vmatprep.subr.mxu0 %v2340_v27  ;;  %2417 = vmatprep.subr.mxu1 %v2333_v25  ;;  %v6577_v25 = vld [vmem:[%s7371_s12 + $0x18] sm:$0xff] }
0x138f   :  { %4839 = vmatpush3.msra.mxu0 %v2340_v27  ;;  %2418 = vmatpush1.msra.mxu1 %v2332_v12  ;;  %v6584_v27 = vld [vmem:[%s7371_s12 + $0xb8] sm:$0xff]  ;;  %v6589_v12 = vld [vmem:[%s7371_s12 + $0x10] sm:$0xff] }
0x1390   :  { %4840 = vmatprep.subr.mxu0 %v2337_v48  ;;  %2419 = vmatprep.subr.mxu1 %v2330_v49  ;;  %v6596_v49 = vld [vmem:[%s7371_s12 + $0xb0] sm:$0xff] }
0x1391   :  { %4841 = vmatpush3.msra.mxu0 %v2337_v48  ;;  %2420 = vmatpush1.msra.mxu1 %v2329_v55  ;;  %v6601_v48 = vld [vmem:[%s7371_s12 + $0x8] sm:$0xff]  ;;  %v6613_v55 = vld [vmem:[%s7371_s12] sm:$0xff] }
0x1392   :  { %4842 = vmatprep.subr.mxu0 %v2334_v32  ;;  %2421 = vmatprep.subr.mxu1 %v2327_v0  ;;  %v6620_v0 = vld [vmem:[%s7371_s12 + $0xa0] sm:$0xff] }
0x1393   :  { %4843 = vmatpush3.msra.mxu0 %v2334_v32  ;;  %2422 = vmatpush1.msra.mxu1 %v2326_v43  ;;  %v6627_v32 = vld [vmem:[%s7371_s12 + $0x98] sm:$0xff]  ;;  %v6634_v43 = vld [vmem:[%s7371_s12 + $0x90] sm:$0xff] }
0x1394   :  { %4844 = vmatprep.subr.mxu0 %v2331_v2  ;;  %2617 = vmatprep.subr.mxu1 %v6433_v28 }
0x1395   :  { %4845 = vmatpush3.msra.mxu0 %v2331_v2  ;;  %v6641_v2 = vld [vmem:[%s7371_s12 + $0x88] sm:$0xff] }
0x1396   :  { %4846 = vmatprep.subr.mxu0 %v2328_v18 }
0x1397   :  { %4847 = vmatpush3.msra.mxu0 %v2328_v18 }
0x1398   :  { %2688 = vmatprep.subr.mxu0 %v6446_v3 }
0x13d7   :  { %v2308_v21 = vpop.permute.xlu1 %2307 }
0x13d8   :  { %v2310_v33 = vmul.f32 %v2308_v21, %v2305_v53  ;;  %v6648_v53 = vld [vmem:[%s7371_s12 + $0x80] sm:$0xff] }
0x13d9   :  { %v2374_v21 = vld [vmem:[%s7372_s13] sm:$0x7] }
0x13da   :  { %v2313_v40 = vadd.f32 %v2312_v24, %v2310_v33  ;;  %v2379_v24 = vrot.slane %v2374_v21, %v294_v20  ;;  %v7391_v33 = vsub.s32 1, %v5724_v19 }
0x13db   :  { %v953_v29 = vpop.permute.xlu1 %952  ;;  %v2272_v30 = vpop.permute.xlu0 %2271 }
0x13dc   :  { %956 = vst.msk [vmem:[#allocation3] sm:$0xc] %vm955_vm3, %v953_v29  ;;  %v2274_v23 = vmul.f32 %v2272_v30, %v2269_v36  ;;  %2320 = vrot.lane.b32.xlu1 %v2313_v40, %s5252_s4  ;;  %v2383_v18 = vrot.slane %v2374_v21, %v7391_v33  ;;  %v7392_v29 = vsub.s32 2, %v5724_v19 }
0x13de   :  { %v2278_v54 = vadd.f32 %v2277_v60, %v2274_v23  ;;  %v2387_v30 = vrot.slane %v2374_v21, %v7392_v29 }
0x13df   :  { %v1412_v57 = vpop.permute.xlu1 %1411  ;;  %v1184_v37 = vpop.permute.xlu0 %1183 }
0x13e0   :  { %1415 = vst.msk [vmem:[#allocation3] sm:$0xc0] %vm1414_vm4, %v1412_v57  ;;  %2089 = vrot.lane.b32.xlu1 %v6241_v34, %s5252_s4  ;;  %2315 = vrot.lane.b32.xlu0 %v2278_v54, %s5252_s4 }
0x13e1   :  { %1187 = vst.msk [vmem:[#allocation3] sm:$0x30] %vm1186_vm5, %v1184_v37 }
0x13e3   :  { %v959_v26 = vpop.permute.xlu1 %958  ;;  %v731_v42 = vpop.permute.xlu0 %730 }
0x13e4   :  { %962 = vst.msk [vmem:[#allocation3 + $0x8] sm:$0x30] %vm961_vm6, %v959_v26 }
0x13e5   :  { %734 = vst.msk [vmem:[#allocation3 + $0x8] sm:$0xc0] %vm733_vm7, %v731_v42 }
0x13e7   :  { %v1418_v31 = vpop.permute.xlu1 %1417  ;;  %v1190_v61 = vpop.permute.xlu0 %1189 }
0x13e8   :  { %1421 = vst.msk [vmem:[#allocation3 + $0x8] sm:$0x3] %vm1420_vm8, %v1418_v31 }
0x13e9   :  { %1193 = vst.msk [vmem:[#allocation3 + $0x8] sm:$0xc] %vm1192_vm9, %v1190_v61 }
0x13ea   :  { %1637 = vst.msk [vmem:[#allocation3 + $0x8] sm:$0x3] %vm727_vm2, %v6095_v50  ;;  %v6473_v50 = vld [vmem:[%s7371_s12 + $0x70] sm:$0xff] }
0x13eb   :  { %v1866_v34 = vpop.permute.xlu1 %1865  ;;  %v1640_v63 = vpop.permute.xlu0 %1639 }
0x13ec   :  { %1868 = vst.msk [vmem:[#allocation3] sm:$0x30] %vm961_vm6, %v1866_v34 }
0x13ed   :  { %1642 = vst.msk [vmem:[#allocation3] sm:$0xc0] %vm733_vm7, %v1640_v63 }
0x13ef   :  { %v2095_v1 = vpop.permute.xlu0 %2094 }
0x13f0   :  { %2097 = vst.msk [vmem:[#allocation3] sm:$0xc] %vm1192_vm9, %v2095_v1 }
0x13f3   :  { %v1861_v22 = vpop.permute.xlu0 %1860 }
0x13f4   :  { %1863 = vst.msk [vmem:[#allocation3 + $0x8] sm:$0xc] %vm955_vm3, %v1861_v22  ;;  %v6703_v22 = vld [vmem:[%s7373_s14 + $0x1] ss:$0 sm:$0xff] }
0x144e   :  { %v2321_v59 = vpop.permute.xlu1 %2320 }
0x144f   :  { %2323 = vst.msk [vmem:[#allocation3] sm:$0x3] %vm1420_vm8, %v2321_v59 }
0x1452   :  { %v2090_v56 = vpop.permute.xlu1 %2089  ;;  %v2316_v45 = vpop.permute.xlu0 %2315 }
0x1453   :  { %2092 = vst.msk [vmem:[#allocation3 + $0x8] sm:$0x30] %vm1186_vm5, %v2090_v56 }
0x1454   :  { %2318 = vst.msk [vmem:[#allocation3 + $0x8] sm:$0xc0] %vm1414_vm4, %v2316_v45 }
0x1456   :  { %v2324_v58 = vld [vmem:[#allocation3] sm:$0xff] }
0x1457   :  { %2456 = vmatmul.mubr.f32.vlgmr.msra.gmra.mxu1 %v2324_v58  ;;  %4848 = vmatprep.mubr.f32.mxu0 %v2324_v58 }
0x1458   :  { %2618 = vmatpush1.msra.mxu1 %v6473_v50  ;;  %2461 = vmatprep.mubr.f32.mxu1 %v5251_v39 }
0x1459   :  { %2619 = vmatprep.subr.mxu1 %v6478_v4 }
0x145a   :  { %2620 = vmatpush1.msra.mxu1 %v6483_v5 }
0x145b   :  { %v2325_v10 = vld [vmem:[#allocation3 + $0x8] sm:$0xff]  ;;  %2621 = vmatprep.subr.mxu1 %v6490_v6 }
0x145c   :  { %2462 = vmatmul.mubr.f32.gmra.mxu1 %v2325_v10  ;;  %4849 = vmatmul.mubr.f32.vlgmr.msra.gmra.mxu0 %v2325_v10 }
0x145d   :  { %2622 = vmatpush1.msra.mxu1 %v6496_v7  ;;  %2689 = vmatpush1.msra.mxu0 %v6502_v11 }
0x145e   :  { %2623 = vmatprep.subr.mxu1 %v6507_v13  ;;  %2690 = vmatprep.subr.mxu0 %v6513_v14 }
0x145f   :  { %2624 = vmatpush1.msra.mxu1 %v6518_v15  ;;  %2691 = vmatpush1.msra.mxu0 %v6524_v16 }
0x1460   :  { %2625 = vmatprep.subr.mxu1 %v6529_v17  ;;  %2692 = vmatprep.subr.mxu0 %v6536_v41 }
0x1461   :  { %2626 = vmatpush1.msra.mxu1 %v6541_v51  ;;  %2693 = vmatpush1.msra.mxu0 %v6548_v52 }
0x1462   :  { %2627 = vmatprep.subr.mxu1 %v6553_v44  ;;  %2694 = vmatprep.subr.mxu0 %v6560_v46 }
0x1463   :  { %2628 = vmatpush1.msra.mxu1 %v6565_v62  ;;  %2695 = vmatpush1.msra.mxu0 %v6572_v47 }
0x1464   :  { %2629 = vmatprep.subr.mxu1 %v6577_v25  ;;  %2696 = vmatprep.subr.mxu0 %v6584_v27 }
0x1465   :  { %2630 = vmatpush1.msra.mxu1 %v6589_v12  ;;  %2697 = vmatpush1.msra.mxu0 %v6596_v49 }
0x1466   :  { %2631 = vmatprep.subr.mxu1 %v6601_v48  ;;  %2698 = vmatprep.subr.mxu0 %v6608_v38 }
0x1467   :  { %2632 = vmatpush1.msra.mxu1 %v6613_v55  ;;  %2665 = vmatprep.mubr.f32.mxu1 %v5251_v39 }
0x1468   :  { %2699 = vmatpush1.msra.mxu0 %v6620_v0  ;;  %2666 = vmatmul.mubr.f32.vlgmr.msra.gmra.mxu1 %v5251_v39 }
0x1469   :  { %2700 = vmatprep.subr.mxu0 %v6627_v32  ;;  %2736 = vmatprep.mubr.f32.mxu0 %v5251_v39 }
0x146a   :  { %2701 = vmatpush1.msra.mxu0 %v6634_v43  ;;  %2830 = vmatprep.subr.mxu1 %v6433_v28 }
0x146b   :  { %2702 = vmatprep.subr.mxu0 %v6641_v2  ;;  %2831 = vmatpush1.msra.mxu1 %v6473_v50 }
0x146c   :  { %2703 = vmatpush1.msra.mxu0 %v6648_v53  ;;  %2832 = vmatprep.subr.mxu1 %v6478_v4 }
0x146d   :  { %2737 = vmatmul.mubr.f32.vlgmr.msra.gmra.mxu0 %v5251_v39  ;;  %2904 = vmatprep.subr.mxu0 %v6446_v3 }
0x146e   :  { %2833 = vmatpush1.msra.mxu1 %v6483_v5  ;;  %2905 = vmatpush1.msra.mxu0 %v6502_v11 }
0x146f   :  { %2834 = vmatprep.subr.mxu1 %v6490_v6  ;;  %2906 = vmatprep.subr.mxu0 %v6513_v14 }
0x1470   :  { %2835 = vmatpush1.msra.mxu1 %v6496_v7  ;;  %2907 = vmatpush1.msra.mxu0 %v6524_v16 }
0x1471   :  { %2836 = vmatprep.subr.mxu1 %v6507_v13  ;;  %2908 = vmatprep.subr.mxu0 %v6536_v41 }
0x1472   :  { %2837 = vmatpush1.msra.mxu1 %v6518_v15  ;;  %2909 = vmatpush1.msra.mxu0 %v6548_v52 }
0x1473   :  { %2838 = vmatprep.subr.mxu1 %v6529_v17  ;;  %2910 = vmatprep.subr.mxu0 %v6560_v46 }
0x1474   :  { %2839 = vmatpush1.msra.mxu1 %v6541_v51  ;;  %2911 = vmatpush1.msra.mxu0 %v6572_v47 }
0x1475   :  { %2840 = vmatprep.subr.mxu1 %v6553_v44  ;;  %2912 = vmatprep.subr.mxu0 %v6584_v27 }
0x1476   :  { %2841 = vmatpush1.msra.mxu1 %v6565_v62  ;;  %2913 = vmatpush1.msra.mxu0 %v6596_v49 }
0x1477   :  { %2842 = vmatprep.subr.mxu1 %v6577_v25  ;;  %2914 = vmatprep.subr.mxu0 %v6608_v38 }
0x1478   :  { %2843 = vmatpush1.msra.mxu1 %v6589_v12  ;;  %2915 = vmatpush1.msra.mxu0 %v6620_v0 }
0x1479   :  { %2844 = vmatprep.subr.mxu1 %v6601_v48  ;;  %2916 = vmatprep.subr.mxu0 %v6627_v32 }
0x147a   :  { %2845 = vmatpush1.msra.mxu1 %v6613_v55  ;;  %2878 = vmatprep.mubr.f32.mxu1 %v5251_v39 }
0x147b   :  { %2917 = vmatpush1.msra.mxu0 %v6634_v43  ;;  %2952 = vmatprep.mubr.f32.mxu0 %v5251_v39 }
0x147c   :  { %2918 = vmatprep.subr.mxu0 %v6641_v2  ;;  %3059 = vmatprep.subr.mxu1 %v6433_v28 }
0x147d   :  { %2919 = vmatpush1.msra.mxu0 %v6648_v53 }
0x147e   :  { %3133 = vmatprep.subr.mxu0 %v6446_v3 }
0x1517   :  { %v2457_v40 = vpop.f32.mrf.mxu1 }
0x1518   :  { %v2458_v36 = vadd.f32 %v2457_v40, %v2379_v24 }
0x1519   :  { %v2459_v35 = vpop.f32.mrf.mxu1 }
0x151a   :  { %2543 = vst [vmem:[#allocation2 + $0x28] sm:$0xff] %v2458_v36  ;;  %v2460_v60 = vadd.f32 %v2459_v35, %v2383_v18 }
0x151c   :  { %v2463_v23 = vpop.f32.mrf.mxu1  ;;  %2544 = vst [vmem:[#allocation2 + $0x10] sm:$0xff] %v2460_v60  ;;  %v4850_v57 = vpop.f32.mrf.mxu0 }
0x151d   :  { %v2464_v54 = vadd.f32 %v2463_v23, %v2379_v24  ;;  %v2540_v37 = vadd.f32 %v4850_v57, %v2387_v30  ;;  %v6711_v24 = vld [vmem:[%s7373_s14] ss:$0 sm:$0xff] }
0x151e   :  { %v2465_v26 = vpop.f32.mrf.mxu1  ;;  %v2534_v20 = vpop.f32.mrf.mxu0 }
0x151f   :  { %2546 = vst [vmem:[#allocation2] sm:$0xff] %v2464_v54  ;;  %v2466_v42 = vadd.f32 %v2465_v26, %v2383_v18  ;;  %2548 = vst [vmem:[#allocation2 + $0x20] sm:$0xff] %v2540_v37  ;;  %v2535_v31 = vadd.f32 %v2534_v20, %v2387_v30 }
0x1521   :  { %2547 = vst [vmem:[#allocation2 + $0x18] sm:$0xff] %v2466_v42  ;;  %2545 = vst [vmem:[#allocation2 + $0x8] sm:$0xff] %v2535_v31  ;;  %v2597_v61 = vld [vmem:[#allocation2 + $0x28] sm:$0x3] }
0x1523   :  { %v2598_v35 = vld [vmem:[#allocation2 + $0x10] sm:$0x3] }
0x1528   :  { %v2667_v34 = vpop.f32.mrf.mxu1  ;;  %v2599_v23 = vld [vmem:[#allocation2 + $0x18] sm:$0xc0] }
0x1529   :  { %v2743_v63 = vadd.f32 %v2667_v34, %v2597_v61  ;;  %v2600_v61 = vld [vmem:[#allocation2 + $0x20] sm:$0xc0] }
0x152a   :  { %v2669_v33 = vpop.f32.mrf.mxu1 }
0x152b   :  { %v4682_v19 = vmul.f32 -1.442695, %v2743_v63  ;;  %v2750_v18 = vadd.f32 %v6711_v24, %v2669_v33 }
0x152d   :  { %v2738_v1 = vpop.f32.mrf.mxu0  ;;  %5055 = vpow2.f32 %v4682_v19 }
0x152e   :  { %v2763_v59 = vrot.slane %v2738_v1, 2 }
0x152f   :  { %v2740_v56 = vpop.f32.mrf.mxu0 }
0x1530   :  { %v2781_v45 = vadd.f32 %v6703_v22, %v2740_v56  ;;  %2764 = vrot.lane.b32.xlu1 %v2763_v59, %s5252_s4 }
0x1532   :  { %v2783_v58 = vrot.slane %v2781_v45, 2 }
0x1534   :  { %2784 = vrot.lane.b32.xlu0 %v2783_v58, %s5252_s4 }
0x153a   :  { %v5056_v10 = vpop.eup %5055 }
0x153b   :  { %v2747_v21 = vadd.f32 1.0, %v5056_v10 }
0x153d   :  { %5057 = vrcp.f32 %v2747_v21 }
0x154a   :  { %v5058_v40 = vpop.eup %5057 }
0x154b   :  { %v2751_v36 = vmul.f32 %v5058_v40, %v2750_v18  ;;  %v2754_v19 = vsub.f32 1.0, %v5058_v40  ;;  %v2760_v56 = vmul.f32 0.0, %v5058_v40 }
0x154d   :  { %v2752_v29 = vadd.f32 %v2751_v36, %v2598_v35 }
0x154f   :  { %5059 = vtanh.f32 %v2752_v29 }
0x155c   :  { %v5060_v30 = vpop.eup %5059 }
0x155d   :  { %2756 = vrot.lane.b32.xlu0 %v5060_v30, %s5252_s4 }
0x15a2   :  { %v2765_v60 = vpop.permute.xlu1 %2764 }
0x15a3   :  { %v2767_v54 = vadd.f32 %v2765_v60, %v2599_v23  ;;  %v2768_v58 = vadd.f32 %v2765_v60, %v2600_v61 }
0x15a5   :  { %v4683_v57 = vmul.f32 -1.442695, %v2767_v54  ;;  %v4684_v10 = vmul.f32 -1.442695, %v2768_v58 }
0x15a6   :  { %v2785_v20 = vpop.permute.xlu0 %2784 }
0x15a7   :  { %5061 = vpow2.f32 %v4683_v57 }
0x15b4   :  { %v5062_v37 = vpop.eup %5061 }
0x15b5   :  { %v2775_v26 = vadd.f32 1.0, %v5062_v37  ;;  %v2808_v37 = vld [vmem:[#allocation2 + $0x28] sm:$0xc] }
0x15b7   :  { %5063 = vrcp.f32 %v2775_v26 }
0x15c4   :  { %v5064_v42 = vpop.eup %5063 }
0x15c5   :  { %v2787_v31 = vmul.f32 %v5064_v42, %v2785_v20 }
0x15c7   :  { %v2788_v34 = vadd.f32 %v2787_v31, %v2600_v61 }
0x15c9   :  { %5065 = vtanh.f32 %v2788_v34 }
0x15ca   :  { %5067 = vpow2.f32 %v4684_v10 }
0x15cf   :  { %v2757_v63 = vpop.permute.xlu0 %2756 }
0x15d0   :  { %v2759_v1 = vmul.f32 %v2757_v63, %v2754_v19 }
0x15d2   :  { %v6716_v45 = vadd.f32 %v2760_v56, %v2759_v1 }
0x15d4   :  { %v2982_v58 = vrot.slane %v6716_v45, 6 }
0x15d6   :  { %v5066_v59 = vpop.eup %5065 }
0x15d7   :  { %2792 = vrot.lane.b32.xlu1 %v5066_v59, %s5252_s4  ;;  %v5068_v21 = vpop.eup %5067 }
0x15d8   :  { %v2776_v33 = vadd.f32 1.0, %v5068_v21 }
0x15da   :  { %5069 = vrcp.f32 %v2776_v33 }
0x15db   :  { %2799 = vrot.lane.b32.xlu1 %v6716_v45, %s5252_s4 }
0x15e7   :  { %v5070_v18 = vpop.eup %5069 }
0x15e8   :  { %v2790_v36 = vsub.f32 1.0, %v5070_v18  ;;  %v2796_v29 = vmul.f32 0.0, %v5070_v18 }
0x1649   :  { %v2793_v35 = vpop.permute.xlu1 %2792 }
0x164a   :  { %v2795_v30 = vmul.f32 %v2793_v35, %v2790_v36  ;;  %v2809_v36 = vld [vmem:[#allocation2 + $0x10] sm:$0xc] }
0x164c   :  { %v6720_v23 = vadd.f32 %v2796_v29, %v2795_v30  ;;  %v2810_v30 = vld [vmem:[#allocation2 + $0x18] sm:$0x30] }
0x164d   :  { %v2800_v40 = vpop.permute.xlu1 %2799 }
0x164e   :  { %v2885_v54 = vrot.slane %v6720_v23, 6  ;;  %2802 = vst.msk [vmem:[#allocation3] sm:$0x3] %vm727_vm2, %v2800_v40  ;;  %4685 = vmatmul.mubr.msk.f32.vlgmr.msra.gmra.mxu1 %vm219_vm1, %v2800_v40  ;;  %v2811_v40 = vld [vmem:[#allocation2 + $0x20] sm:$0x30] }
0x164f   :  { %3060 = vmatpush1.msra.mxu1 %v6473_v50  ;;  %3107 = vmatprep.mubr.f32.mxu1 %v5251_v39 }
0x1650   :  { %4686 = vmatmul.mubr.msk.f32.vlgmr.msra.gmra.mxu0 %vm219_vm1, %v2885_v54  ;;  %3061 = vmatprep.subr.mxu1 %v6478_v4 }
0x1651   :  { %3062 = vmatpush1.msra.mxu1 %v6483_v5  ;;  %3134 = vmatpush1.msra.mxu0 %v6502_v11 }
0x1652   :  { %3063 = vmatprep.subr.mxu1 %v6490_v6  ;;  %3135 = vmatprep.subr.mxu0 %v6513_v14 }
0x1653   :  { %3064 = vmatpush1.msra.mxu1 %v6496_v7  ;;  %3136 = vmatpush1.msra.mxu0 %v6524_v16 }
0x1654   :  { %3065 = vmatprep.subr.mxu1 %v6507_v13  ;;  %3137 = vmatprep.subr.mxu0 %v6536_v41 }
0x1655   :  { %3066 = vmatpush1.msra.mxu1 %v6518_v15  ;;  %3138 = vmatpush1.msra.mxu0 %v6548_v52 }
0x1656   :  { %3067 = vmatprep.subr.mxu1 %v6529_v17  ;;  %3139 = vmatprep.subr.mxu0 %v6560_v46 }
0x1657   :  { %3068 = vmatpush1.msra.mxu1 %v6541_v51  ;;  %3140 = vmatpush1.msra.mxu0 %v6572_v47 }
0x1658   :  { %3069 = vmatprep.subr.mxu1 %v6553_v44  ;;  %3141 = vmatprep.subr.mxu0 %v6584_v27 }
0x1659   :  { %3070 = vmatpush1.msra.mxu1 %v6565_v62  ;;  %3142 = vmatpush1.msra.mxu0 %v6596_v49 }
0x165a   :  { %3071 = vmatprep.subr.mxu1 %v6577_v25  ;;  %3143 = vmatprep.subr.mxu0 %v6608_v38 }
0x165b   :  { %3072 = vmatpush1.msra.mxu1 %v6589_v12  ;;  %3144 = vmatpush1.msra.mxu0 %v6620_v0 }
0x165c   :  { %3073 = vmatprep.subr.mxu1 %v6601_v48  ;;  %3145 = vmatprep.subr.mxu0 %v6627_v32 }
0x165d   :  { %3074 = vmatpush1.msra.mxu1 %v6613_v55  ;;  %3146 = vmatpush1.msra.mxu0 %v6634_v43 }
0x165e   :  { %3147 = vmatprep.subr.mxu0 %v6641_v2  ;;  %3181 = vmatprep.mubr.f32.mxu0 %v5251_v39 }
0x165f   :  { %3148 = vmatpush1.msra.mxu0 %v6648_v53  ;;  %3288 = vmatprep.subr.mxu1 %v6433_v28 }
0x1660   :  { %3362 = vmatprep.subr.mxu0 %v6446_v3 }
0x170e   :  { %v2880_v60 = vpop.f32.mrf.mxu1 }
0x170f   :  { %v2960_v57 = vrot.slane %v2880_v60, 6 }
0x1710   :  { %v2954_v26 = vpop.f32.mrf.mxu0  ;;  %v2882_v59 = vpop.f32.mrf.mxu1 }
0x1711   :  { %v2962_v42 = vadd.f32 %v2960_v57, %v2808_v37  ;;  %v2987_v20 = vrot.slane %v2954_v26, 4  ;;  %v2969_v56 = vadd.f32 %v6711_v24, %v2882_v59 }
0x1712   :  { %v2956_v31 = vpop.f32.mrf.mxu0 }
0x1713   :  { %v4687_v61 = vmul.f32 -1.442695, %v2962_v42  ;;  %v3005_v34 = vadd.f32 %v6703_v22, %v2956_v31  ;;  %2988 = vrot.lane.b32.xlu0 %v2987_v20, %s5252_s4  ;;  %v2971_v10 = vrot.slane %v2969_v56, 6 }
0x1715   :  { %5071 = vpow2.f32 %v4687_v61  ;;  %v3007_v63 = vrot.slane %v3005_v34, 4 }
0x1717   :  { %3008 = vrot.lane.b32.xlu1 %v3007_v63, %s5252_s4 }
0x1722   :  { %v5072_v19 = vpop.eup %5071 }
0x1723   :  { %v2966_v1 = vadd.f32 1.0, %v5072_v19 }
0x1725   :  { %5073 = vrcp.f32 %v2966_v1 }
0x1732   :  { %v5074_v21 = vpop.eup %5073 }
0x1733   :  { %v2973_v33 = vmul.f32 %v5074_v21, %v2971_v10  ;;  %v2984_v18 = vmul.f32 %v5074_v21, %v2982_v58  ;;  %v2976_v34 = vsub.f32 1.0, %v5074_v21  ;;  %v3020_v21 = vrot.slane %v6720_v23, 2 }
0x1735   :  { %v2974_v35 = vadd.f32 %v2973_v33, %v2809_v36 }
0x1737   :  { %5075 = vtanh.f32 %v2974_v35 }
0x1744   :  { %v5076_v29 = vpop.eup %5075 }
0x1745   :  { %2978 = vrot.lane.b32.xlu0 %v5076_v29, %s5252_s4 }
0x1785   :  { %v2989_v54 = vpop.permute.xlu0 %2988 }
0x1786   :  { %v2991_v60 = vadd.f32 %v2989_v54, %v2810_v30  ;;  %v2992_v57 = vadd.f32 %v2989_v54, %v2811_v40 }
0x1788   :  { %v4688_v37 = vmul.f32 -1.442695, %v2991_v60  ;;  %v4689_v58 = vmul.f32 -1.442695, %v2992_v57 }
0x1789   :  { %v3009_v20 = vpop.permute.xlu1 %3008 }
0x178a   :  { %5077 = vpow2.f32 %v4688_v37 }
0x1797   :  { %v5078_v26 = vpop.eup %5077 }
0x1798   :  { %v2999_v42 = vadd.f32 1.0, %v5078_v26  ;;  %v3034_v26 = vld [vmem:[#allocation2 + $0x28] sm:$0x30] }
0x179a   :  { %5079 = vrcp.f32 %v2999_v42 }
0x17a7   :  { %v5080_v45 = vpop.eup %5079 }
0x17a8   :  { %v3011_v31 = vmul.f32 %v5080_v45, %v3009_v20 }
0x17aa   :  { %v3012_v61 = vadd.f32 %v3011_v31, %v2811_v40 }
0x17ac   :  { %5081 = vtanh.f32 %v3012_v61 }
0x17ad   :  { %5083 = vpow2.f32 %v4689_v58 }
0x17b7   :  { %v2979_v63 = vpop.permute.xlu0 %2978 }
0x17b8   :  { %v2981_v19 = vmul.f32 %v2979_v63, %v2976_v34 }
0x17b9   :  { %v5082_v1 = vpop.eup %5081 }
0x17ba   :  { %v6766_v59 = vadd.f32 %v2984_v18, %v2981_v19  ;;  %3016 = vrot.lane.b32.xlu1 %v5082_v1, %s5252_s4  ;;  %v5084_v10 = vpop.eup %5083 }
0x17bb   :  { %v3000_v33 = vadd.f32 1.0, %v5084_v10 }
0x17bc   :  { %v3038_v56 = vrot.slane %v6766_v59, 2 }
0x17bd   :  { %5085 = vrcp.f32 %v3000_v33 }
0x17be   :  { %3039 = vrot.lane.b32.xlu0 %v3038_v56, %s5252_s4 }
0x17ca   :  { %v5086_v36 = vpop.eup %5085 }
0x17cb   :  { %v3014_v35 = vsub.f32 1.0, %v5086_v36  ;;  %v3022_v30 = vmul.f32 %v5086_v36, %v3020_v21 }
0x182c   :  { %v3017_v29 = vpop.permute.xlu1 %3016 }
0x182d   :  { %v3019_v40 = vmul.f32 %v3017_v29, %v3014_v35  ;;  %v3035_v35 = vld [vmem:[#allocation2 + $0x10] sm:$0x30] }
0x182f   :  { %v6772_v18 = vadd.f32 %v3022_v30, %v3019_v40  ;;  %v3036_v30 = vld [vmem:[#allocation2 + $0x18] sm:$0xc]  ;;  %v3037_v40 = vld [vmem:[#allocation2 + $0x20] sm:$0xc] }
0x1830   :  { %v3040_v54 = vpop.permute.xlu0 %3039 }
0x1831   :  { %v3114_v60 = vrot.slane %v6772_v18, 4  ;;  %4690 = vmatmul.mubr.msk.f32.vlgmr.msra.gmra.mxu1 %vm219_vm1, %v3040_v54 }
0x1832   :  { %3289 = vmatpush1.msra.mxu1 %v6473_v50  ;;  %3336 = vmatprep.mubr.f32.mxu1 %v5251_v39 }
0x1833   :  { %4691 = vmatmul.mubr.msk.f32.vlgmr.msra.gmra.mxu0 %vm219_vm1, %v3114_v60  ;;  %3290 = vmatprep.subr.mxu1 %v6478_v4 }
0x1834   :  { %3291 = vmatpush1.msra.mxu1 %v6483_v5  ;;  %3363 = vmatpush1.msra.mxu0 %v6502_v11 }
0x1835   :  { %3292 = vmatprep.subr.mxu1 %v6490_v6  ;;  %3364 = vmatprep.subr.mxu0 %v6513_v14 }
0x1836   :  { %3293 = vmatpush1.msra.mxu1 %v6496_v7  ;;  %3365 = vmatpush1.msra.mxu0 %v6524_v16 }
0x1837   :  { %3294 = vmatprep.subr.mxu1 %v6507_v13  ;;  %3366 = vmatprep.subr.mxu0 %v6536_v41 }
0x1838   :  { %3295 = vmatpush1.msra.mxu1 %v6518_v15  ;;  %3367 = vmatpush1.msra.mxu0 %v6548_v52 }
0x1839   :  { %3296 = vmatprep.subr.mxu1 %v6529_v17  ;;  %3368 = vmatprep.subr.mxu0 %v6560_v46 }
0x183a   :  { %3297 = vmatpush1.msra.mxu1 %v6541_v51  ;;  %3369 = vmatpush1.msra.mxu0 %v6572_v47 }
0x183b   :  { %3298 = vmatprep.subr.mxu1 %v6553_v44  ;;  %3370 = vmatprep.subr.mxu0 %v6584_v27 }
0x183c   :  { %3299 = vmatpush1.msra.mxu1 %v6565_v62  ;;  %3371 = vmatpush1.msra.mxu0 %v6596_v49 }
0x183d   :  { %3300 = vmatprep.subr.mxu1 %v6577_v25  ;;  %3372 = vmatprep.subr.mxu0 %v6608_v38 }
0x183e   :  { %3301 = vmatpush1.msra.mxu1 %v6589_v12  ;;  %3373 = vmatpush1.msra.mxu0 %v6620_v0 }
0x183f   :  { %3302 = vmatprep.subr.mxu1 %v6601_v48  ;;  %3374 = vmatprep.subr.mxu0 %v6627_v32 }
0x1840   :  { %3303 = vmatpush1.msra.mxu1 %v6613_v55  ;;  %3375 = vmatpush1.msra.mxu0 %v6634_v43 }
0x1841   :  { %3376 = vmatprep.subr.mxu0 %v6641_v2  ;;  %3410 = vmatprep.mubr.f32.mxu0 %v5251_v39 }
0x1842   :  { %3377 = vmatpush1.msra.mxu0 %v6648_v53  ;;  %3514 = vmatprep.subr.mxu1 %v6433_v28 }
0x1843   :  { %3587 = vmatprep.subr.mxu0 %v6446_v3 }
0x18f1   :  { %v3109_v57 = vpop.f32.mrf.mxu1 }
0x18f2   :  { %v3189_v37 = vrot.slane %v3109_v57, 4 }
0x18f3   :  { %v3183_v42 = vpop.f32.mrf.mxu0  ;;  %v3111_v56 = vpop.f32.mrf.mxu1 }
0x18f4   :  { %v3191_v45 = vadd.f32 %v3189_v37, %v3034_v26  ;;  %v3216_v20 = vrot.slane %v3183_v42, 6  ;;  %v3198_v58 = vadd.f32 %v6711_v24, %v3111_v56 }
0x18f5   :  { %v3185_v31 = vpop.f32.mrf.mxu0 }
0x18f6   :  { %v4692_v61 = vmul.f32 -1.442695, %v3191_v45  ;;  %v3234_v34 = vadd.f32 %v6703_v22, %v3185_v31  ;;  %3217 = vrot.lane.b32.xlu1 %v3216_v20, %s5252_s4  ;;  %v3200_v10 = vrot.slane %v3198_v58, 4 }
0x18f8   :  { %5087 = vpow2.f32 %v4692_v61  ;;  %v3236_v63 = vrot.slane %v3234_v34, 6 }
0x18fa   :  { %3237 = vrot.lane.b32.xlu0 %v3236_v63, %s5252_s4  ;;  %v3211_v63 = vrot.slane %v6766_v59, 6 }
0x1905   :  { %v5088_v19 = vpop.eup %5087 }
0x1906   :  { %v3195_v1 = vadd.f32 1.0, %v5088_v19 }
0x1908   :  { %5089 = vrcp.f32 %v3195_v1 }
0x1915   :  { %v5090_v33 = vpop.eup %5089 }
0x1916   :  { %v3202_v36 = vmul.f32 %v5090_v33, %v3200_v10  ;;  %v3205_v34 = vsub.f32 1.0, %v5090_v33  ;;  %v3213_v1 = vmul.f32 %v5090_v33, %v3211_v63 }
0x1918   :  { %v3203_v21 = vadd.f32 %v3202_v36, %v3035_v35 }
0x191a   :  { %5091 = vtanh.f32 %v3203_v21 }
0x1927   :  { %v5092_v29 = vpop.eup %5091 }
0x1928   :  { %3207 = vrot.lane.b32.xlu1 %v5092_v29, %s5252_s4 }
0x1968   :  { %v3218_v54 = vpop.permute.xlu1 %3217 }
0x1969   :  { %v3220_v60 = vadd.f32 %v3218_v54, %v3036_v30  ;;  %v3221_v57 = vadd.f32 %v3218_v54, %v3037_v40  ;;  %v3249_v54 = vrot.slane %v6772_v18, 2 }
0x196b   :  { %v4693_v37 = vmul.f32 -1.442695, %v3220_v60  ;;  %v4694_v35 = vmul.f32 -1.442695, %v3221_v57 }
0x196c   :  { %v3238_v20 = vpop.permute.xlu0 %3237 }
0x196d   :  { %5093 = vpow2.f32 %v4693_v37 }
0x197a   :  { %v5094_v26 = vpop.eup %5093 }
0x197b   :  { %v3228_v42 = vadd.f32 1.0, %v5094_v26 }
0x197d   :  { %5095 = vrcp.f32 %v3228_v42 }
0x198a   :  { %v5096_v45 = vpop.eup %5095 }
0x198b   :  { %v3240_v31 = vmul.f32 %v5096_v45, %v3238_v20 }
0x198d   :  { %v3241_v61 = vadd.f32 %v3240_v31, %v3037_v40  ;;  %v3263_v31 = vld [vmem:[#allocation2 + $0x28] sm:$0xc0] }
0x198f   :  { %5097 = vtanh.f32 %v3241_v61 }
0x1990   :  { %5099 = vpow2.f32 %v4694_v35 }
0x199a   :  { %v3208_v19 = vpop.permute.xlu1 %3207 }
0x199b   :  { %v3210_v56 = vmul.f32 %v3208_v19, %v3205_v34 }
0x199c   :  { %v5098_v58 = vpop.eup %5097 }
0x199d   :  { %v6817_v10 = vadd.f32 %v3213_v1, %v3210_v56  ;;  %3245 = vrot.lane.b32.xlu0 %v5098_v58, %s5252_s4  ;;  %v5100_v21 = vpop.eup %5099 }
0x199e   :  { %v3229_v29 = vadd.f32 1.0, %v5100_v21 }
0x199f   :  { %v3267_v36 = vrot.slane %v6817_v10, 4 }
0x19a0   :  { %5101 = vrcp.f32 %v3229_v29  ;;  %v3264_v29 = vld [vmem:[#allocation2 + $0x10] sm:$0xc0] }
0x19a1   :  { %3268 = vrot.lane.b32.xlu1 %v3267_v36, %s5252_s4 }
0x19ad   :  { %v5102_v30 = vpop.eup %5101 }
0x19ae   :  { %v3243_v40 = vsub.f32 1.0, %v5102_v30  ;;  %v3251_v60 = vmul.f32 %v5102_v30, %v3249_v54  ;;  %v3265_v54 = vld [vmem:[#allocation2 + $0x18] sm:$0x3] }
0x1a0f   :  { %v3246_v33 = vpop.permute.xlu0 %3245 }
0x1a10   :  { %v3248_v37 = vmul.f32 %v3246_v33, %v3243_v40 }
0x1a12   :  { %v6823_v26 = vadd.f32 %v3251_v60, %v3248_v37 }
0x1a13   :  { %v3269_v42 = vpop.permute.xlu1 %3268 }
0x1a14   :  { %v3343_v45 = vrot.slane %v6823_v26, 2  ;;  %4695 = vmatmul.mubr.msk.f32.vlgmr.msra.gmra.mxu1 %vm219_vm1, %v3269_v42 }
0x1a15   :  { %3515 = vmatpush1.msra.mxu1 %v6473_v50  ;;  %3562 = vmatprep.mubr.f32.mxu1 %v5251_v39 }
0x1a16   :  { %4696 = vmatmul.mubr.msk.f32.vlgmr.msra.gmra.mxu0 %vm219_vm1, %v3343_v45  ;;  %3516 = vmatprep.subr.mxu1 %v6478_v4 }
0x1a17   :  { %3588 = vmatpush1.msra.mxu0 %v6502_v11  ;;  %3517 = vmatpush1.msra.mxu1 %v6483_v5 }
0x1a18   :  { %3589 = vmatprep.subr.mxu0 %v6513_v14  ;;  %3518 = vmatprep.subr.mxu1 %v6490_v6 }
0x1a19   :  { %3590 = vmatpush1.msra.mxu0 %v6524_v16  ;;  %3519 = vmatpush1.msra.mxu1 %v6496_v7 }
0x1a1a   :  { %3591 = vmatprep.subr.mxu0 %v6536_v41  ;;  %3520 = vmatprep.subr.mxu1 %v6507_v13 }
0x1a1b   :  { %3592 = vmatpush1.msra.mxu0 %v6548_v52  ;;  %3521 = vmatpush1.msra.mxu1 %v6518_v15 }
0x1a1c   :  { %3593 = vmatprep.subr.mxu0 %v6560_v46  ;;  %3522 = vmatprep.subr.mxu1 %v6529_v17 }
0x1a1d   :  { %3594 = vmatpush1.msra.mxu0 %v6572_v47  ;;  %3523 = vmatpush1.msra.mxu1 %v6541_v51 }
0x1a1e   :  { %3595 = vmatprep.subr.mxu0 %v6584_v27  ;;  %3524 = vmatprep.subr.mxu1 %v6553_v44 }
0x1a1f   :  { %3596 = vmatpush1.msra.mxu0 %v6596_v49  ;;  %3525 = vmatpush1.msra.mxu1 %v6565_v62 }
0x1a20   :  { %3597 = vmatprep.subr.mxu0 %v6608_v38  ;;  %3526 = vmatprep.subr.mxu1 %v6577_v25 }
0x1a21   :  { %3598 = vmatpush1.msra.mxu0 %v6620_v0  ;;  %3527 = vmatpush1.msra.mxu1 %v6589_v12 }
0x1a22   :  { %3599 = vmatprep.subr.mxu0 %v6627_v32  ;;  %3635 = vmatprep.mubr.f32.mxu0 %v5251_v39 }
0x1a23   :  { %3600 = vmatpush1.msra.mxu0 %v6634_v43  ;;  %3528 = vmatprep.subr.mxu1 %v6601_v48 }
0x1a24   :  { %3601 = vmatprep.subr.mxu0 %v6641_v2  ;;  %3529 = vmatpush1.msra.mxu1 %v6613_v55 }
0x1a25   :  { %3602 = vmatpush1.msra.mxu0 %v6648_v53  ;;  %3732 = vmatprep.subr.mxu1 %v6433_v28 }
0x1a26   :  { %3806 = vmatprep.subr.mxu0 %v6446_v3 }
0x1ad4   :  { %v3338_v57 = vpop.f32.mrf.mxu1 }
0x1ad5   :  { %v3418_v20 = vrot.slane %v3338_v57, 2 }
0x1ad6   :  { %v3412_v61 = vpop.f32.mrf.mxu0  ;;  %v3340_v28 = vpop.f32.mrf.mxu1 }
0x1ad7   :  { %v3420_v34 = vadd.f32 %v3418_v20, %v3263_v31  ;;  %3445 = vrot.lane.b32.xlu0 %v3412_v61, %s5252_s4  ;;  %v3427_v3 = vadd.f32 %v6711_v24, %v3340_v28 }
0x1ad8   :  { %v3414_v63 = vpop.f32.mrf.mxu0 }
0x1ad9   :  { %v4697_v19 = vmul.f32 -1.442695, %v3420_v34  ;;  %v3462_v1 = vadd.f32 %v6703_v22, %v3414_v63  ;;  %v3429_v36 = vrot.slane %v3427_v3, 2  ;;  %v3266_v34 = vld [vmem:[#allocation2 + $0x20] sm:$0x3] }
0x1adb   :  { %5103 = vpow2.f32 %v4697_v19  ;;  %3464 = vrot.lane.b32.xlu1 %v3462_v1, %s5252_s4  ;;  %v3440_v1 = vrot.slane %v6817_v10, 6 }
0x1ae8   :  { %v5104_v56 = vpop.eup %5103 }
0x1ae9   :  { %v3424_v58 = vadd.f32 1.0, %v5104_v56 }
0x1aeb   :  { %5105 = vrcp.f32 %v3424_v58 }
0x1af8   :  { %v5106_v35 = vpop.eup %5105 }
0x1af9   :  { %v3431_v21 = vmul.f32 %v5106_v35, %v3429_v36  ;;  %v3434_v19 = vsub.f32 1.0, %v5106_v35  ;;  %v3442_v28 = vmul.f32 %v5106_v35, %v3440_v1 }
0x1afb   :  { %v3432_v30 = vadd.f32 %v3431_v21, %v3264_v29 }
0x1afd   :  { %5107 = vtanh.f32 %v3432_v30 }
0x1b0a   :  { %v5108_v40 = vpop.eup %5107 }
0x1b0b   :  { %3436 = vrot.lane.b32.xlu1 %v5108_v40, %s5252_s4 }
0x1b49   :  { %v3446_v33 = vpop.permute.xlu0 %3445 }
0x1b4a   :  { %v3448_v60 = vadd.f32 %v3446_v33, %v3265_v54  ;;  %v3449_v29 = vadd.f32 %v3446_v33, %v3266_v34 }
0x1b4c   :  { %v4698_v37 = vmul.f32 -1.442695, %v3448_v60  ;;  %v4699_v30 = vmul.f32 -1.442695, %v3449_v29 }
0x1b4d   :  { %v3465_v31 = vpop.permute.xlu1 %3464 }
0x1b4e   :  { %5109 = vpow2.f32 %v4698_v37 }
0x1b5b   :  { %v5110_v42 = vpop.eup %5109 }
0x1b5c   :  { %v3456_v57 = vadd.f32 1.0, %v5110_v42 }
0x1b5e   :  { %5111 = vrcp.f32 %v3456_v57 }
0x1b6b   :  { %v5112_v20 = vpop.eup %5111 }
0x1b6c   :  { %v3467_v61 = vmul.f32 %v5112_v20, %v3465_v31 }
0x1b6e   :  { %v3468_v63 = vadd.f32 %v3467_v61, %v3266_v34 }
0x1b70   :  { %5113 = vtanh.f32 %v3468_v63 }
0x1b71   :  { %5115 = vpow2.f32 %v4699_v30 }
0x1b7d   :  { %v5114_v56 = vpop.eup %5113  ;;  %v3437_v58 = vpop.permute.xlu1 %3436 }
0x1b7e   :  { %v3439_v3 = vmul.f32 %v3437_v58, %v3434_v19  ;;  %3472 = vrot.lane.b32.xlu0 %v5114_v56, %s5252_s4  ;;  %v5116_v40 = vpop.eup %5115 }
0x1b7f   :  { %v3457_v54 = vadd.f32 1.0, %v5116_v40 }
0x1b80   :  { %v6871_v36 = vadd.f32 %v3442_v28, %v3439_v3 }
0x1b81   :  { %5117 = vrcp.f32 %v3457_v54 }
0x1b82   :  { %v3493_v21 = vrot.slane %v6871_v36, 6 }
0x1b84   :  { %3494 = vrot.lane.b32.xlu0 %v3493_v21, %s5252_s4 }
0x1b8e   :  { %v5118_v60 = vpop.eup %5117 }
0x1b8f   :  { %v3470_v37 = vsub.f32 1.0, %v5118_v60  ;;  %v3477_v42 = vmul.f32 %v5118_v60, %v3343_v45 }
0x1bf0   :  { %v3473_v35 = vpop.permute.xlu0 %3472 }
0x1bf1   :  { %v3475_v57 = vmul.f32 %v3473_v35, %v3470_v37 }
0x1bf3   :  { %v6879_v20 = vadd.f32 %v3477_v42, %v3475_v57  ;;  %v6951_v57 = vld [vmem:[%s7371_s12 + $0x70] sm:$0xff] }
0x1bf5   :  { %4701 = vmatmul.mubr.msk.f32.vlgmr.msra.gmra.mxu0 %vm219_vm1, %v6879_v20  ;;  %v3696_v40 = vrot.slane %v6879_v20, 2 }
0x1bf6   :  { %v3495_v31 = vpop.permute.xlu0 %3494  ;;  %3807 = vmatpush1.msra.mxu0 %v6502_v11  ;;  %3854 = vmatprep.mubr.f32.mxu0 %v5251_v39 }
0x1bf7   :  { %4700 = vmatmul.mubr.msk.f32.vlgmr.msra.gmra.mxu1 %vm219_vm1, %v3495_v31  ;;  %3808 = vmatprep.subr.mxu0 %v6513_v14  ;;  %v6959_v31 = vld [vmem:[%s7371_s12 + $0x68] sm:$0xff] }
0x1bf8   :  { %3733 = vmatpush1.msra.mxu1 %v6473_v50  ;;  %3809 = vmatpush1.msra.mxu0 %v6524_v16  ;;  %v6919_v50 = vld [vmem:[%s7371_s12 + $0xf8] sm:$0xff] }
0x1bf9   :  { %3734 = vmatprep.subr.mxu1 %v6478_v4  ;;  %3810 = vmatprep.subr.mxu0 %v6536_v41  ;;  %v6925_v4 = vld [vmem:[%s7371_s12 + $0x78] sm:$0xff] }
0x1bfa   :  { %3735 = vmatpush1.msra.mxu1 %v6483_v5  ;;  %3811 = vmatpush1.msra.mxu0 %v6548_v52 }
0x1bfb   :  { %3736 = vmatprep.subr.mxu1 %v6490_v6  ;;  %3812 = vmatprep.subr.mxu0 %v6560_v46 }
0x1bfc   :  { %3737 = vmatpush1.msra.mxu1 %v6496_v7  ;;  %3813 = vmatpush1.msra.mxu0 %v6572_v47  ;;  %v3489_v7 = vld [vmem:[#allocation2] sm:$0x3]  ;;  %v3490_v47 = vld [vmem:[#allocation2 + $0x18] sm:$0x3] }
0x1bfd   :  { %3738 = vmatprep.subr.mxu1 %v6507_v13  ;;  %3814 = vmatprep.subr.mxu0 %v6584_v27 }
0x1bfe   :  { %3739 = vmatpush1.msra.mxu1 %v6518_v15  ;;  %3815 = vmatpush1.msra.mxu0 %v6596_v49 }
0x1bff   :  { %3740 = vmatprep.subr.mxu1 %v6529_v17  ;;  %3816 = vmatprep.subr.mxu0 %v6608_v38 }
0x1c00   :  { %3741 = vmatpush1.msra.mxu1 %v6541_v51  ;;  %3817 = vmatpush1.msra.mxu0 %v6620_v0 }
0x1c01   :  { %3742 = vmatprep.subr.mxu1 %v6553_v44  ;;  %3818 = vmatprep.subr.mxu0 %v6627_v32 }
0x1c02   :  { %3743 = vmatpush1.msra.mxu1 %v6565_v62  ;;  %3780 = vmatprep.mubr.f32.mxu1 %v5251_v39 }
0x1c03   :  { %3744 = vmatprep.subr.mxu1 %v6577_v25  ;;  %3819 = vmatpush1.msra.mxu0 %v6634_v43 }
0x1c04   :  { %3745 = vmatpush1.msra.mxu1 %v6589_v12  ;;  %3820 = vmatprep.subr.mxu0 %v6641_v2  ;;  %v3491_v12 = vld [vmem:[#allocation2 + $0x10] sm:$0xc0] }
0x1c05   :  { %3746 = vmatprep.subr.mxu1 %v6601_v48  ;;  %3821 = vmatpush1.msra.mxu0 %v6648_v53  ;;  %v3492_v53 = vld [vmem:[#allocation2 + $0x8] sm:$0xc0] }
0x1c06   :  { %3747 = vmatpush1.msra.mxu1 %v6613_v55  ;;  %4035 = vmatprep.subr.mxu0 %v6919_v50 }
0x1c07   :  { %3961 = vmatprep.subr.mxu1 %v6925_v4 }
0x1cb5   :  { %v3637_v5 = vpop.f32.mrf.mxu0 }
0x1cb6   :  { %v3663_v6 = vrot.slane %v3637_v5, 2  ;;  %v6965_v5 = vld [vmem:[%s7371_s12 + $0x60] sm:$0xff] }
0x1cb7   :  { %v3564_v11 = vpop.f32.mrf.mxu1  ;;  %v3639_v13 = vpop.f32.mrf.mxu0 }
0x1cb8   :  { %v3642_v14 = vadd.f32 %v3564_v11, %v3489_v7  ;;  %v3681_v15 = vadd.f32 %v6703_v22, %v3639_v13  ;;  %3664 = vrot.lane.b32.xlu1 %v3663_v6, %s5252_s4  ;;  %v6971_v6 = vld [vmem:[%s7371_s12 + $0xf0] sm:$0xff]  ;;  %v6977_v7 = vld [vmem:[%s7371_s12 + $0x58] sm:$0xff]  ;;  %v6983_v11 = vld [vmem:[%s7371_s12 + $0xe8] sm:$0xff] }
0x1cb9   :  { %v3566_v52 = vpop.f32.mrf.mxu1  ;;  %v6989_v13 = vld [vmem:[%s7371_s12 + $0x50] sm:$0xff] }
0x1cba   :  { %v4702_v16 = vmul.f32 -1.442695, %v3642_v14  ;;  %v3683_v17 = vrot.slane %v3681_v15, 2  ;;  %v3649_v44 = vadd.f32 %v6711_v24, %v3566_v52  ;;  %v6995_v14 = vld [vmem:[%s7371_s12 + $0xe0] sm:$0xff]  ;;  %v7001_v15 = vld [vmem:[%s7371_s12 + $0x48] sm:$0xff] }
0x1cbb   :  { %v7031_v52 = vld [vmem:[%s7371_s12 + $0xc8] sm:$0xff] }
0x1cbc   :  { %5119 = vpow2.f32 %v4702_v16  ;;  %3684 = vrot.lane.b32.xlu0 %v3683_v17, %s5252_s4  ;;  %v7007_v16 = vld [vmem:[%s7371_s12 + $0xd8] sm:$0xff]  ;;  %v7013_v17 = vld [vmem:[%s7371_s12 + $0x40] sm:$0xff] }
0x1cc9   :  { %v5120_v41 = vpop.eup %5119 }
0x1cca   :  { %v3646_v51 = vadd.f32 1.0, %v5120_v41  ;;  %v7019_v41 = vld [vmem:[%s7371_s12 + $0xd0] sm:$0xff] }
0x1ccc   :  { %5121 = vrcp.f32 %v3646_v51  ;;  %v7025_v51 = vld [vmem:[%s7371_s12 + $0x38] sm:$0xff] }
0x1cd9   :  { %v5122_v46 = vpop.eup %5121 }
0x1cda   :  { %v3650_v62 = vmul.f32 %v5122_v46, %v3649_v44  ;;  %v3653_v33 = vsub.f32 1.0, %v5122_v46  ;;  %v3660_v63 = vmul.f32 %v5122_v46, %v3493_v21  ;;  %v7037_v44 = vld [vmem:[%s7371_s12 + $0x30] sm:$0xff]  ;;  %v7043_v46 = vld [vmem:[%s7371_s12 + $0xc0] sm:$0xff] }
0x1cdc   :  { %v3651_v25 = vadd.f32 %v3650_v62, %v3490_v47  ;;  %v7049_v62 = vld [vmem:[%s7371_s12 + $0x28] sm:$0xff]  ;;  %v7055_v47 = vld [vmem:[%s7371_s12 + $0xb8] sm:$0xff] }
0x1cde   :  { %5123 = vtanh.f32 %v3651_v25  ;;  %v7061_v25 = vld [vmem:[%s7371_s12 + $0x20] sm:$0xff] }
0x1ceb   :  { %v5124_v27 = vpop.eup %5123 }
0x1cec   :  { %3655 = vrot.lane.b32.xlu0 %v5124_v27, %s5252_s4  ;;  %v7067_v27 = vld [vmem:[%s7371_s12 + $0xb0] sm:$0xff] }
0x1d2a   :  { %v3665_v49 = vpop.permute.xlu1 %3664 }
0x1d2b   :  { %v3667_v48 = vadd.f32 %v3665_v49, %v3491_v12  ;;  %v3668_v56 = vadd.f32 %v3665_v49, %v3492_v53  ;;  %v7073_v12 = vld [vmem:[%s7371_s12 + $0x18] sm:$0xff]  ;;  %v7079_v49 = vld [vmem:[%s7371_s12 + $0xa8] sm:$0xff] }
0x1d2d   :  { %v4703_v38 = vmul.f32 -1.442695, %v3667_v48  ;;  %v4704_v58 = vmul.f32 -1.442695, %v3668_v56  ;;  %v7085_v48 = vld [vmem:[%s7371_s12 + $0x10] sm:$0xff] }
0x1d2e   :  { %v3685_v43 = vpop.permute.xlu0 %3684 }
0x1d2f   :  { %5125 = vpow2.f32 %v4703_v38  ;;  %v7091_v38 = vld [vmem:[%s7371_s12 + $0xa0] sm:$0xff] }
0x1d3c   :  { %v5126_v55 = vpop.eup %5125 }
0x1d3d   :  { %v3675_v0 = vadd.f32 1.0, %v5126_v55  ;;  %v7097_v55 = vld [vmem:[%s7371_s12 + $0x8] sm:$0xff] }
0x1d3f   :  { %5127 = vrcp.f32 %v3675_v0  ;;  %v7103_v0 = vld [vmem:[%s7371_s12 + $0x98] sm:$0xff] }
0x1d4c   :  { %v5128_v32 = vpop.eup %5127 }
0x1d4d   :  { %v3687_v2 = vmul.f32 %v5128_v32, %v3685_v43  ;;  %v7109_v32 = vld [vmem:[%s7371_s12] sm:$0xff]  ;;  %v7115_v43 = vld [vmem:[%s7371_s12 + $0x90] sm:$0xff] }
0x1d4f   :  { %v3688_v45 = vadd.f32 %v3687_v2, %v3492_v53  ;;  %v7121_v2 = vld [vmem:[%s7371_s12 + $0x88] sm:$0xff]  ;;  %v7128_v53 = vld [vmem:[%s7371_s12 + $0x80] sm:$0xff] }
0x1d51   :  { %5129 = vtanh.f32 %v3688_v45 }
0x1d52   :  { %5131 = vpow2.f32 %v4704_v58 }
0x1d5e   :  { %v5130_v61 = vpop.eup %5129  ;;  %v3656_v34 = vpop.permute.xlu0 %3655 }
0x1d5f   :  { %v3658_v19 = vmul.f32 %v3656_v34, %v3653_v33  ;;  %3692 = vrot.lane.b32.xlu1 %v5130_v61, %s5252_s4  ;;  %v5132_v28 = vpop.eup %5131  ;;  %v3710_v61 = vld [vmem:[#allocation2] sm:$0xc] }
0x1d60   :  { %v3676_v3 = vadd.f32 1.0, %v5132_v28 }
0x1d61   :  { %v6936_v1 = vadd.f32 %v3660_v63, %v3658_v19 }
0x1d62   :  { %5133 = vrcp.f32 %v3676_v3 }
0x1d63   :  { %3701 = vrot.lane.b32.xlu1 %v6936_v1, %s5252_s4 }
0x1d6f   :  { %v5134_v29 = vpop.eup %5133 }
0x1d70   :  { %v3690_v30 = vsub.f32 1.0, %v5134_v29  ;;  %v3698_v21 = vmul.f32 %v5134_v29, %v3696_v40  ;;  %v3884_v40 = vrot.slane %v6936_v1, 6 }
0x1dd1   :  { %v3693_v54 = vpop.permute.xlu1 %3692 }
0x1dd2   :  { %v3695_v60 = vmul.f32 %v3693_v54, %v3690_v30 }
0x1dd4   :  { %v6941_v37 = vadd.f32 %v3698_v21, %v3695_v60 }
0x1dd5   :  { %v6943_v35 = vpop.permute.xlu1 %3701 }
0x1dd6   :  { %v3787_v42 = vrot.slane %v6941_v37, 6  ;;  %4705 = vmatmul.mubr.msk.f32.vlgmr.msra.gmra.mxu1 %vm219_vm1, %v6943_v35 }
0x1dd7   :  { %3962 = vmatpush1.msra.mxu1 %v6951_v57  ;;  %4009 = vmatprep.mubr.f32.mxu1 %v5251_v39 }
0x1dd8   :  { %4706 = vmatmul.mubr.msk.f32.vlgmr.msra.gmra.mxu0 %vm219_vm1, %v3787_v42  ;;  %3963 = vmatprep.subr.mxu1 %v6959_v31 }
0x1dd9   :  { %3964 = vmatpush1.msra.mxu1 %v6965_v5  ;;  %4036 = vmatpush1.msra.mxu0 %v6971_v6 }
0x1dda   :  { %3965 = vmatprep.subr.mxu1 %v6977_v7  ;;  %4037 = vmatprep.subr.mxu0 %v6983_v11 }
0x1ddb   :  { %3966 = vmatpush1.msra.mxu1 %v6989_v13  ;;  %4038 = vmatpush1.msra.mxu0 %v6995_v14 }
0x1ddc   :  { %3967 = vmatprep.subr.mxu1 %v7001_v15  ;;  %4039 = vmatprep.subr.mxu0 %v7007_v16 }
0x1ddd   :  { %3968 = vmatpush1.msra.mxu1 %v7013_v17  ;;  %4040 = vmatpush1.msra.mxu0 %v7019_v41 }
0x1dde   :  { %3969 = vmatprep.subr.mxu1 %v7025_v51  ;;  %4041 = vmatprep.subr.mxu0 %v7031_v52 }
0x1ddf   :  { %3970 = vmatpush1.msra.mxu1 %v7037_v44  ;;  %4042 = vmatpush1.msra.mxu0 %v7043_v46 }
0x1de0   :  { %3971 = vmatprep.subr.mxu1 %v7049_v62  ;;  %4043 = vmatprep.subr.mxu0 %v7055_v47 }
0x1de1   :  { %3972 = vmatpush1.msra.mxu1 %v7061_v25  ;;  %4044 = vmatpush1.msra.mxu0 %v7067_v27 }
0x1de2   :  { %3973 = vmatprep.subr.mxu1 %v7073_v12  ;;  %4045 = vmatprep.subr.mxu0 %v7079_v49 }
0x1de3   :  { %3974 = vmatpush1.msra.mxu1 %v7085_v48  ;;  %4046 = vmatpush1.msra.mxu0 %v7091_v38 }
0x1de4   :  { %3975 = vmatprep.subr.mxu1 %v7097_v55  ;;  %4047 = vmatprep.subr.mxu0 %v7103_v0 }
0x1de5   :  { %3976 = vmatpush1.msra.mxu1 %v7109_v32  ;;  %4048 = vmatpush1.msra.mxu0 %v7115_v43 }
0x1de6   :  { %4049 = vmatprep.subr.mxu0 %v7121_v2  ;;  %4083 = vmatprep.mubr.f32.mxu0 %v5251_v39 }
0x1de7   :  { %4050 = vmatpush1.msra.mxu0 %v7128_v53  ;;  %4190 = vmatprep.subr.mxu1 %v6925_v4 }
0x1de8   :  { %4264 = vmatprep.subr.mxu0 %v6919_v50 }
0x1e96   :  { %v3782_v45 = vpop.f32.mrf.mxu1 }
0x1e97   :  { %v3862_v33 = vrot.slane %v3782_v45, 6  ;;  %v3711_v45 = vld [vmem:[#allocation2 + $0x18] sm:$0xc] }
0x1e98   :  { %v3856_v34 = vpop.f32.mrf.mxu0  ;;  %v3784_v50 = vpop.f32.mrf.mxu1 }
0x1e99   :  { %v3864_v63 = vadd.f32 %v3862_v33, %v3710_v61  ;;  %v3889_v19 = vrot.slane %v3856_v34, 4  ;;  %v3871_v30 = vadd.f32 %v6711_v24, %v3784_v50  ;;  %v3712_v61 = vld [vmem:[#allocation2 + $0x10] sm:$0x30]  ;;  %v3713_v34 = vld [vmem:[#allocation2 + $0x8] sm:$0x30] }
0x1e9a   :  { %v3858_v56 = vpop.f32.mrf.mxu0 }
0x1e9b   :  { %v4707_v58 = vmul.f32 -1.442695, %v3864_v63  ;;  %v3907_v28 = vadd.f32 %v6703_v22, %v3858_v56  ;;  %3890 = vrot.lane.b32.xlu0 %v3889_v19, %s5252_s4  ;;  %v3873_v54 = vrot.slane %v3871_v30, 6 }
0x1e9d   :  { %5135 = vpow2.f32 %v4707_v58  ;;  %v3909_v3 = vrot.slane %v3907_v28, 4 }
0x1e9f   :  { %3910 = vrot.lane.b32.xlu1 %v3909_v3, %s5252_s4 }
0x1eaa   :  { %v5136_v29 = vpop.eup %5135 }
0x1eab   :  { %v3868_v4 = vadd.f32 1.0, %v5136_v29 }
0x1ead   :  { %5137 = vrcp.f32 %v3868_v4 }
0x1eba   :  { %v5138_v21 = vpop.eup %5137 }
0x1ebb   :  { %v3875_v60 = vmul.f32 %v5138_v21, %v3873_v54  ;;  %v3886_v42 = vmul.f32 %v5138_v21, %v3884_v40  ;;  %v3878_v50 = vsub.f32 1.0, %v5138_v21  ;;  %v3922_v21 = vrot.slane %v6941_v37, 2 }
0x1ebd   :  { %v3876_v22 = vadd.f32 %v3875_v60, %v3711_v45 }
0x1ebf   :  { %5139 = vtanh.f32 %v3876_v22 }
0x1ecc   :  { %v5140_v33 = vpop.eup %5139 }
0x1ecd   :  { %3880 = vrot.lane.b32.xlu0 %v5140_v33, %s5252_s4 }
0x1f0d   :  { %v3891_v63 = vpop.permute.xlu0 %3890 }
0x1f0e   :  { %v3893_v19 = vadd.f32 %v3891_v63, %v3712_v61  ;;  %v3894_v56 = vadd.f32 %v3891_v63, %v3713_v34 }
0x1f10   :  { %v4708_v58 = vmul.f32 -1.442695, %v3893_v19  ;;  %v4709_v22 = vmul.f32 -1.442695, %v3894_v56 }
0x1f11   :  { %v3911_v3 = vpop.permute.xlu1 %3910 }
0x1f12   :  { %5141 = vpow2.f32 %v4708_v58 }
0x1f1f   :  { %v5142_v24 = vpop.eup %5141 }
0x1f20   :  { %v3901_v28 = vadd.f32 1.0, %v5142_v24 }
0x1f22   :  { %5143 = vrcp.f32 %v3901_v28 }
0x1f2f   :  { %v5144_v1 = vpop.eup %5143 }
0x1f30   :  { %v3913_v29 = vmul.f32 %v5144_v1, %v3911_v3 }
0x1f32   :  { %v3914_v4 = vadd.f32 %v3913_v29, %v3713_v34 }
0x1f34   :  { %5145 = vtanh.f32 %v3914_v4 }
0x1f35   :  { %5147 = vpow2.f32 %v4709_v22 }
0x1f3f   :  { %v3881_v30 = vpop.permute.xlu0 %3880 }
0x1f40   :  { %v3883_v40 = vmul.f32 %v3881_v30, %v3878_v50 }
0x1f41   :  { %v5146_v54 = vpop.eup %5145 }
0x1f42   :  { %v7139_v60 = vadd.f32 %v3886_v42, %v3883_v40  ;;  %3918 = vrot.lane.b32.xlu1 %v5146_v54, %s5252_s4  ;;  %v5148_v33 = vpop.eup %5147 }
0x1f43   :  { %v3902_v61 = vadd.f32 1.0, %v5148_v33 }
0x1f44   :  { %v3940_v45 = vrot.slane %v7139_v60, 2  ;;  %v4113_v50 = vrot.slane %v7139_v60, 6 }
0x1f45   :  { %5149 = vrcp.f32 %v3902_v61 }
0x1f46   :  { %3941 = vrot.lane.b32.xlu0 %v3940_v45, %s5252_s4 }
0x1f52   :  { %v5150_v63 = vpop.eup %5149 }
0x1f53   :  { %v3916_v34 = vsub.f32 1.0, %v5150_v63  ;;  %v3924_v58 = vmul.f32 %v5150_v63, %v3922_v21 }
0x1fb4   :  { %v3919_v19 = vpop.permute.xlu1 %3918 }
0x1fb5   :  { %v3921_v24 = vmul.f32 %v3919_v19, %v3916_v34 }
0x1fb7   :  { %v7145_v42 = vadd.f32 %v3924_v58, %v3921_v24 }
0x1fb8   :  { %v3942_v28 = vpop.permute.xlu0 %3941 }
0x1fb9   :  { %v4016_v1 = vrot.slane %v7145_v42, 4  ;;  %4710 = vmatmul.mubr.msk.f32.vlgmr.msra.gmra.mxu1 %vm219_vm1, %v3942_v28  ;;  %v4151_v58 = vrot.slane %v7145_v42, 2 }
0x1fba   :  { %4191 = vmatpush1.msra.mxu1 %v6951_v57  ;;  %4238 = vmatprep.mubr.f32.mxu1 %v5251_v39 }
0x1fbb   :  { %4711 = vmatmul.mubr.msk.f32.vlgmr.msra.gmra.mxu0 %vm219_vm1, %v4016_v1  ;;  %4192 = vmatprep.subr.mxu1 %v6959_v31 }
0x1fbc   :  { %4193 = vmatpush1.msra.mxu1 %v6965_v5  ;;  %4265 = vmatpush1.msra.mxu0 %v6971_v6  ;;  %v3936_v5 = vld [vmem:[#allocation2] sm:$0x30] }
0x1fbd   :  { %4194 = vmatprep.subr.mxu1 %v6977_v7  ;;  %4266 = vmatprep.subr.mxu0 %v6983_v11 }
0x1fbe   :  { %4195 = vmatpush1.msra.mxu1 %v6989_v13  ;;  %4267 = vmatpush1.msra.mxu0 %v6995_v14 }
0x1fbf   :  { %4196 = vmatprep.subr.mxu1 %v7001_v15  ;;  %4268 = vmatprep.subr.mxu0 %v7007_v16  ;;  %v7185_v15 = vld [vmem:[%s7373_s14 + $0x1] ss:$0 sm:$0xff] }
0x1fc0   :  { %4197 = vmatpush1.msra.mxu1 %v7013_v17  ;;  %4269 = vmatpush1.msra.mxu0 %v7019_v41 }
0x1fc1   :  { %4198 = vmatprep.subr.mxu1 %v7025_v51  ;;  %4270 = vmatprep.subr.mxu0 %v7031_v52  ;;  %v7193_v52 = vld [vmem:[%s7373_s14] ss:$0 sm:$0xff] }
0x1fc2   :  { %4199 = vmatpush1.msra.mxu1 %v7037_v44  ;;  %4271 = vmatpush1.msra.mxu0 %v7043_v46 }
0x1fc3   :  { %4200 = vmatprep.subr.mxu1 %v7049_v62  ;;  %4272 = vmatprep.subr.mxu0 %v7055_v47 }
0x1fc4   :  { %4201 = vmatpush1.msra.mxu1 %v7061_v25  ;;  %4273 = vmatpush1.msra.mxu0 %v7067_v27  ;;  %v3937_v25 = vld [vmem:[#allocation2 + $0x18] sm:$0x30] }
0x1fc5   :  { %4202 = vmatprep.subr.mxu1 %v7073_v12  ;;  %4274 = vmatprep.subr.mxu0 %v7079_v49  ;;  %v3938_v49 = vld [vmem:[#allocation2 + $0x10] sm:$0xc] }
0x1fc6   :  { %4203 = vmatpush1.msra.mxu1 %v7085_v48  ;;  %4275 = vmatpush1.msra.mxu0 %v7091_v38  ;;  %v3939_v48 = vld [vmem:[#allocation2 + $0x8] sm:$0xc] }
0x1fc7   :  { %4204 = vmatprep.subr.mxu1 %v7097_v55  ;;  %4276 = vmatprep.subr.mxu0 %v7103_v0 }
0x1fc8   :  { %4205 = vmatpush1.msra.mxu1 %v7109_v32  ;;  %4277 = vmatpush1.msra.mxu0 %v7115_v43 }
0x1fc9   :  { %4278 = vmatprep.subr.mxu0 %v7121_v2  ;;  %4312 = vmatprep.mubr.f32.mxu0 %v5251_v39 }
0x1fca   :  { %4279 = vmatpush1.msra.mxu0 %v7128_v53 }
0x2079   :  { %v4011_v57 = vpop.f32.mrf.mxu1 }
0x207a   :  { %v4091_v31 = vrot.slane %v4011_v57, 4 }
0x207b   :  { %v4085_v6 = vpop.f32.mrf.mxu0  ;;  %v4013_v51 = vpop.f32.mrf.mxu1 }
0x207c   :  { %v4093_v7 = vadd.f32 %v4091_v31, %v3936_v5  ;;  %v4118_v11 = vrot.slane %v4085_v6, 6  ;;  %v4100_v44 = vadd.f32 %v7193_v52, %v4013_v51 }
0x207d   :  { %v4087_v13 = vpop.f32.mrf.mxu0 }
0x207e   :  { %v4712_v14 = vmul.f32 -1.442695, %v4093_v7  ;;  %v4136_v16 = vadd.f32 %v7185_v15, %v4087_v13  ;;  %4119 = vrot.lane.b32.xlu1 %v4118_v11, %s5252_s4  ;;  %v4102_v46 = vrot.slane %v4100_v44, 4  ;;  %v4165_v11 = vld [vmem:[#allocation2] sm:$0xc0] }
0x2080   :  { %5151 = vpow2.f32 %v4712_v14  ;;  %v4138_v39 = vrot.slane %v4136_v16, 6 }
0x2082   :  { %4139 = vrot.lane.b32.xlu0 %v4138_v39, %s5252_s4 }
0x208d   :  { %v5152_v17 = vpop.eup %5151 }
0x208e   :  { %v4097_v41 = vadd.f32 1.0, %v5152_v17 }
0x2090   :  { %5153 = vrcp.f32 %v4097_v41 }
0x209d   :  { %v5154_v62 = vpop.eup %5153 }
0x209e   :  { %v4104_v47 = vmul.f32 %v5154_v62, %v4102_v46  ;;  %v4107_v4 = vsub.f32 1.0, %v5154_v62  ;;  %v4115_v40 = vmul.f32 %v5154_v62, %v4113_v50 }
0x20a0   :  { %v4105_v27 = vadd.f32 %v4104_v47, %v3937_v25 }
0x20a2   :  { %5155 = vtanh.f32 %v4105_v27  ;;  %v4166_v27 = vld [vmem:[#allocation2 + $0x18] sm:$0xc0] }
0x20af   :  { %v5156_v12 = vpop.eup %5155 }
0x20b0   :  { %4109 = vrot.lane.b32.xlu1 %v5156_v12, %s5252_s4 }
0x20f0   :  { %v4120_v38 = vpop.permute.xlu1 %4119 }
0x20f1   :  { %v4122_v55 = vadd.f32 %v4120_v38, %v3938_v49  ;;  %v4123_v0 = vadd.f32 %v4120_v38, %v3939_v48 }
0x20f3   :  { %v4713_v32 = vmul.f32 -1.442695, %v4122_v55  ;;  %v4714_v61 = vmul.f32 -1.442695, %v4123_v0 }
0x20f4   :  { %v4140_v56 = vpop.permute.xlu0 %4139 }
0x20f5   :  { %5157 = vpow2.f32 %v4713_v32 }
0x2102   :  { %v5158_v43 = vpop.eup %5157 }
0x2103   :  { %v4130_v2 = vadd.f32 1.0, %v5158_v43 }
0x2105   :  { %5159 = vrcp.f32 %v4130_v2 }
0x2112   :  { %v5160_v53 = vpop.eup %5159 }
0x2113   :  { %v4142_v3 = vmul.f32 %v5160_v53, %v4140_v56 }
0x2115   :  { %v4143_v29 = vadd.f32 %v4142_v3, %v3939_v48 }
0x2117   :  { %5161 = vtanh.f32 %v4143_v29 }
0x2118   :  { %5163 = vpow2.f32 %v4714_v61  ;;  %v4404_v61 = vld [vmem:[%s7374_s15 + $0x48] sm:$0xff] }
0x2122   :  { %v4110_v30 = vpop.permute.xlu1 %4109 }
0x2123   :  { %v4112_v54 = vmul.f32 %v4110_v30, %v4107_v4  ;;  %v4410_v30 = vld [vmem:[%s7374_s15 + $0x78] sm:$0xff] }
0x2124   :  { %v5162_v45 = vpop.eup %5161  ;;  %4851 = vmatprep.subr.mxu1 %v4410_v30 }
0x2125   :  { %v7198_v22 = vadd.f32 %v4115_v40, %v4112_v54  ;;  %4147 = vrot.lane.b32.xlu0 %v5162_v45, %s5252_s4  ;;  %v5164_v63 = vpop.eup %5163  ;;  %v4409_v40 = vld [vmem:[%s7374_s15 + $0x70] sm:$0xff]  ;;  %v4406_v45 = vld [vmem:[%s7374_s15 + $0x58] sm:$0xff] }
0x2126   :  { %v4131_v34 = vadd.f32 1.0, %v5164_v63 }
0x2127   :  { %v4169_v33 = vrot.slane %v7198_v22, 4  ;;  %v4342_v2 = vrot.slane %v7198_v22, 6 }
0x2128   :  { %5165 = vrcp.f32 %v4131_v34  ;;  %v4402_v34 = vld [vmem:[%s7374_s15 + $0x38] sm:$0xff] }
0x2129   :  { %4170 = vrot.lane.b32.xlu1 %v4169_v33, %s5252_s4 }
0x2135   :  { %v5166_v21 = vpop.eup %5165 }
0x2136   :  { %v4145_v19 = vsub.f32 1.0, %v5166_v21  ;;  %v4153_v28 = vmul.f32 %v5166_v21, %v4151_v58 }
0x2197   :  { %v4148_v24 = vpop.permute.xlu0 %4147 }
0x2198   :  { %v4150_v1 = vmul.f32 %v4148_v24, %v4145_v19 }
0x219a   :  { %v7204_v57 = vadd.f32 %v4153_v28, %v4150_v1  ;;  %v4401_v28 = vld [vmem:[%s7374_s15 + $0x30] sm:$0xff]  ;;  %v4400_v1 = vld [vmem:[%s7374_s15 + $0x28] sm:$0xff] }
0x219b   :  { %v4171_v31 = vpop.permute.xlu1 %4170 }
0x219c   :  { %v4245_v5 = vrot.slane %v7204_v57, 2  ;;  %4715 = vmatmul.mubr.msk.f32.vlgmr.msra.gmra.mxu1 %vm219_vm1, %v4171_v31 }
0x219d   :  { %4852 = vmatpush3.msra.mxu1 %v4410_v30 }
0x219e   :  { %4716 = vmatmul.mubr.msk.f32.vlgmr.msra.gmra.mxu0 %vm219_vm1, %v4245_v5  ;;  %4853 = vmatprep.subr.mxu1 %v4409_v40 }
0x219f   :  { %4854 = vmatpush3.msra.mxu1 %v4409_v40 }
0x225c   :  { %v4240_v6 = vpop.f32.mrf.mxu1 }
0x225d   :  { %v4320_v7 = vrot.slane %v4240_v6, 2  ;;  %v4399_v6 = vld [vmem:[%s7374_s15 + $0x20] sm:$0xff] }
0x225e   :  { %v4314_v13 = vpop.f32.mrf.mxu0  ;;  %v4242_v44 = vpop.f32.mrf.mxu1 }
0x225f   :  { %v4322_v14 = vadd.f32 %v4320_v7, %v4165_v11  ;;  %4347 = vrot.lane.b32.xlu0 %v4314_v13, %s5252_s4  ;;  %v4329_v46 = vadd.f32 %v7193_v52, %v4242_v44  ;;  %v4398_v7 = vld [vmem:[%s7374_s15 + $0x18] sm:$0xff]  ;;  %v4397_v11 = vld [vmem:[%s7374_s15 + $0x10] sm:$0xff] }
0x2260   :  { %v4316_v16 = vpop.f32.mrf.mxu0 }
0x2261   :  { %v4717_v39 = vmul.f32 -1.442695, %v4322_v14  ;;  %v4364_v17 = vadd.f32 %v7185_v15, %v4316_v16  ;;  %v4331_v62 = vrot.slane %v4329_v46, 2  ;;  %v4167_v15 = vld [vmem:[#allocation2 + $0x10] sm:$0x3]  ;;  %v4396_v16 = vld [vmem:[%s7374_s15 + $0x8] sm:$0xff] }
0x2263   :  { %5167 = vpow2.f32 %v4717_v39  ;;  %4366 = vrot.lane.b32.xlu1 %v4364_v17, %s5252_s4 }
0x2270   :  { %v5168_v41 = vpop.eup %5167 }
0x2271   :  { %v4326_v51 = vadd.f32 1.0, %v5168_v41  ;;  %v4395_v41 = vld [vmem:[%s7374_s15] sm:$0xff] }
0x2273   :  { %5169 = vrcp.f32 %v4326_v51 }
0x2280   :  { %v5170_v47 = vpop.eup %5169 }
0x2281   :  { %v4333_v25 = vmul.f32 %v5170_v47, %v4331_v62  ;;  %v4336_v43 = vsub.f32 1.0, %v5170_v47  ;;  %v4344_v56 = vmul.f32 %v5170_v47, %v4342_v2  ;;  %v4500_v47 = vld [vmem:[%s7375_s17 + $0x28] sm:$0xff] }
0x2283   :  { %v4334_v12 = vadd.f32 %v4333_v25, %v4166_v27  ;;  %v4499_v25 = vld [vmem:[%s7375_s17 + $0x20] sm:$0xff] }
0x2285   :  { %5171 = vtanh.f32 %v4334_v12 }
0x2292   :  { %v5172_v49 = vpop.eup %5171 }
0x2293   :  { %4338 = vrot.lane.b32.xlu1 %v5172_v49, %s5252_s4 }
0x2297   :  { %3254 = vrot.lane.b32.xlu1 %v6817_v10, %s5252_s4 }
0x229b   :  { %2804 = vrot.lane.b32.xlu1 %v6720_v23, %s5252_s4 }
0x229f   :  { %3259 = vrot.lane.b32.xlu1 %v6823_v26, %s5252_s4 }
0x22a3   :  { %3706 = vrot.lane.b32.xlu1 %v6941_v37, %s5252_s4  ;;  %v4168_v37 = vld [vmem:[#allocation2 + $0x8] sm:$0x3] }
0x22a7   :  { %4161 = vrot.lane.b32.xlu1 %v7204_v57, %s5252_s4  ;;  %v4502_v57 = vld [vmem:[%s7375_s17 + $0x38] sm:$0xff] }
0x22a8   :  { %4886 = vmatprep.subr.mxu0 %v4502_v57 }
0x22a9   :  { %4887 = vmatpush3.msra.mxu0 %v4502_v57 }
0x22ab   :  { %3927 = vrot.lane.b32.xlu1 %v7139_v60, %s5252_s4 }
0x22d1   :  { %v7228_v52 = vpop.permute.xlu0 %4347 }
0x22d2   :  { %v4350_v10 = vadd.f32 %v7228_v52, %v4167_v15 }
0x22d4   :  { %v4718_v48 = vmul.f32 -1.442695, %v4350_v10 }
0x22d5   :  { %v4367_v55 = vpop.permute.xlu1 %4366 }
0x22d6   :  { %5173 = vpow2.f32 %v4718_v48 }
0x22e3   :  { %v5174_v23 = vpop.eup %5173 }
0x22e4   :  { %v4358_v38 = vadd.f32 1.0, %v5174_v23 }
0x22e6   :  { %5175 = vrcp.f32 %v4358_v38  ;;  %v4498_v38 = vld [vmem:[%s7375_s17 + $0x18] sm:$0xff] }
0x22f3   :  { %v5176_v26 = vpop.eup %5175 }
0x22f4   :  { %v4369_v0 = vmul.f32 %v5176_v26, %v4367_v55  ;;  %v4496_v26 = vld [vmem:[%s7375_s17 + $0x8] sm:$0xff]  ;;  %v4495_v55 = vld [vmem:[%s7375_s17] sm:$0xff] }
0x22f6   :  { %v4370_v32 = vadd.f32 %v4369_v0, %v4168_v37  ;;  %v4720_v0 = vld [vmem:[%s7376_s16] ss:$0 sm:$0xff] }
0x22f8   :  { %5177 = vtanh.f32 %v4370_v32 }
0x2305   :  { %v5178_v60 = vpop.eup %5177  ;;  %v4339_v53 = vpop.permute.xlu1 %4338 }
0x2306   :  { %v4341_v3 = vmul.f32 %v4339_v53, %v4336_v43  ;;  %4374 = vrot.lane.b32.xlu0 %v5178_v60, %s5252_s4 }
0x2308   :  { %v4345_v29 = vadd.f32 %v4344_v56, %v4341_v3  ;;  %v4721_v56 = vld [vmem:[%s7377_s18] ss:$0 sm:$0xff] }
0x2309   :  { %v3255_v4 = vpop.permute.xlu1 %3254 }
0x230a   :  { %3257 = vst.msk [vmem:[#allocation3] sm:$0x30] %vm1186_vm5, %v3255_v4  ;;  %3025 = vrot.lane.b32.xlu0 %v6766_v59, %s5252_s4  ;;  %4382 = vrot.lane.b32.xlu1 %v4345_v29, %s5252_s4  ;;  %v4408_v59 = vld [vmem:[%s7374_s15 + $0x68] sm:$0xff] }
0x230b   :  { %4855 = vmatprep.subr.mxu1 %v4408_v59 }
0x230c   :  { %4856 = vmatpush3.msra.mxu1 %v4408_v59 }
0x230d   :  { %v2805_v50 = vpop.permute.xlu1 %2804 }
0x230e   :  { %2807 = vst.msk [vmem:[#allocation3 + $0x8] sm:$0xc0] %vm733_vm7, %v2805_v50  ;;  %3480 = vrot.lane.b32.xlu0 %v6871_v36, %s5252_s4  ;;  %v4407_v36 = vld [vmem:[%s7374_s15 + $0x60] sm:$0xff] }
0x230f   :  { %4857 = vmatprep.subr.mxu1 %v4407_v36 }
0x2310   :  { %4858 = vmatpush3.msra.mxu1 %v4407_v36 }
0x2311   :  { %v3260_v54 = vpop.permute.xlu1 %3259  ;;  %4859 = vmatprep.subr.mxu1 %v4406_v45 }
0x2312   :  { %3262 = vst.msk [vmem:[#allocation3 + $0x8] sm:$0xc] %vm1192_vm9, %v3260_v54  ;;  %3030 = vrot.lane.b32.xlu0 %v6772_v18, %s5252_s4  ;;  %v4405_v18 = vld [vmem:[%s7374_s15 + $0x50] sm:$0xff]  ;;  %4860 = vmatpush3.msra.mxu1 %v4406_v45 }
0x2313   :  { %4861 = vmatprep.subr.mxu1 %v4405_v18 }
0x2314   :  { %4862 = vmatpush3.msra.mxu1 %v4405_v18 }
0x2315   :  { %v7258_v33 = vpop.permute.xlu1 %3706  ;;  %4863 = vmatprep.subr.mxu1 %v4404_v61 }
0x2316   :  { %3485 = vrot.lane.b32.xlu0 %v6879_v20, %s5252_s4  ;;  %v4403_v20 = vld [vmem:[%s7374_s15 + $0x40] sm:$0xff]  ;;  %4864 = vmatpush3.msra.mxu1 %v4404_v61 }
0x2317   :  { %4865 = vmatprep.subr.mxu1 %v4403_v20 }
0x2318   :  { %4866 = vmatpush3.msra.mxu1 %v4403_v20 }
0x2319   :  { %v4162_v63 = vpop.permute.xlu1 %4161  ;;  %4867 = vmatprep.subr.mxu1 %v4402_v34 }
0x231a   :  { %3932 = vrot.lane.b32.xlu0 %v7145_v42, %s5252_s4  ;;  %4868 = vmatpush3.msra.mxu1 %v4402_v34  ;;  %v4351_v42 = vadd.f32 %v7228_v52, %v4168_v37 }
0x231b   :  { %4869 = vmatprep.subr.mxu1 %v4401_v28 }
0x231c   :  { %v4719_v19 = vmul.f32 -1.442695, %v4351_v42  ;;  %4870 = vmatpush3.msra.mxu1 %v4401_v28 }
0x231d   :  { %v3928_v21 = vpop.permute.xlu1 %3927  ;;  %4871 = vmatprep.subr.mxu1 %v4400_v1 }
0x231e   :  { %3930 = vst.msk [vmem:[#allocation3 + $0x8] sm:$0xc] %vm955_vm3, %v3928_v21  ;;  %5179 = vpow2.f32 %v4719_v19  ;;  %4872 = vmatpush3.msra.mxu1 %v4400_v1 }
0x231f   :  { %4873 = vmatprep.subr.mxu1 %v4399_v6 }
0x2320   :  { %4874 = vmatpush3.msra.mxu1 %v4399_v6 }
0x2321   :  { %4875 = vmatprep.subr.mxu1 %v4398_v7 }
0x2322   :  { %4876 = vmatpush3.msra.mxu1 %v4398_v7 }
0x2323   :  { %4877 = vmatprep.subr.mxu1 %v4397_v11 }
0x2324   :  { %4878 = vmatpush3.msra.mxu1 %v4397_v11 }
0x2325   :  { %4879 = vmatprep.subr.mxu1 %v4396_v16 }
0x2326   :  { %4880 = vmatpush3.msra.mxu1 %v4396_v16 }
0x2327   :  { %4881 = vmatprep.subr.mxu1 %v4395_v41 }
0x2328   :  { %4882 = vmatpush3.msra.mxu1 %v4395_v41 }
0x232b   :  { %v5180_v58 = vpop.eup %5179 }
0x232c   :  { %v4359_v24 = vadd.f32 1.0, %v5180_v58 }
0x232e   :  { %5181 = vrcp.f32 %v4359_v24 }
0x233b   :  { %v5182_v31 = vpop.eup %5181 }
0x233c   :  { %v4372_v13 = vsub.f32 1.0, %v5182_v31  ;;  %v4379_v39 = vmul.f32 %v5182_v31, %v4245_v5  ;;  %v4501_v5 = vld [vmem:[%s7375_s17 + $0x30] sm:$0xff] }
0x233d   :  { %4888 = vmatprep.subr.mxu0 %v4501_v5 }
0x233e   :  { %4889 = vmatpush3.msra.mxu0 %v4501_v5 }
0x233f   :  { %4890 = vmatprep.subr.mxu0 %v4500_v47 }
0x2340   :  { %4891 = vmatpush3.msra.mxu0 %v4500_v47 }
0x2341   :  { %4892 = vmatprep.subr.mxu0 %v4499_v25 }
0x2342   :  { %4893 = vmatpush3.msra.mxu0 %v4499_v25 }
0x2343   :  { %4894 = vmatprep.subr.mxu0 %v4498_v38 }
0x2344   :  { %4895 = vmatpush3.msra.mxu0 %v4498_v38 }
0x2378   :  { %v4375_v14 = vpop.permute.xlu0 %4374 }
0x2379   :  { %v4377_v17 = vmul.f32 %v4375_v14, %v4372_v13 }
0x237b   :  { %v4380_v51 = vadd.f32 %v4379_v39, %v4377_v17 }
0x237c   :  { %v3026_v44 = vpop.permute.xlu0 %3025  ;;  %v4383_v46 = vpop.permute.xlu1 %4382 }
0x237d   :  { %3028 = vst.msk [vmem:[#allocation3] sm:$0xc] %vm955_vm3, %v3026_v44  ;;  %4387 = vrot.lane.b32.xlu0 %v4380_v51, %s5252_s4 }
0x237e   :  { %4385 = vst.msk [vmem:[#allocation3 + $0x8] sm:$0xc0] %vm1414_vm4, %v4383_v46 }
0x237f   :  { %4164 = vst.msk [vmem:[#allocation3] sm:$0xc] %vm1192_vm9, %v4162_v63 }
0x2380   :  { %v3481_v62 = vpop.permute.xlu0 %3480 }
0x2381   :  { %3483 = vst.msk [vmem:[#allocation3] sm:$0xc0] %vm1414_vm4, %v3481_v62  ;;  %4156 = vrot.lane.b32.xlu0 %v7198_v22, %s5252_s4 }
0x2382   :  { %3709 = vst.msk [vmem:[#allocation3] sm:$0xc0] %vm733_vm7, %v7258_v33 }
0x2384   :  { %v3031_v27 = vpop.permute.xlu0 %3030 }
0x2385   :  { %3033 = vst.msk [vmem:[#allocation3 + $0x8] sm:$0x30] %vm961_vm6, %v3031_v27 }
0x2388   :  { %v3486_v22 = vpop.permute.xlu0 %3485 }
0x2389   :  { %3488 = vst.msk [vmem:[#allocation3 + $0x8] sm:$0x3] %vm1420_vm8, %v3486_v22 }
0x238a   :  { %3704 = vst.msk [vmem:[#allocation3 + $0x8] sm:$0x3] %vm727_vm2, %v6943_v35  ;;  %v4497_v35 = vld [vmem:[%s7375_s17 + $0x10] sm:$0xff] }
0x238b   :  { %4896 = vmatprep.subr.mxu0 %v4497_v35 }
0x238c   :  { %v3933_v12 = vpop.permute.xlu0 %3932  ;;  %4897 = vmatpush3.msra.mxu0 %v4497_v35 }
0x238d   :  { %3935 = vst.msk [vmem:[#allocation3] sm:$0x30] %vm961_vm6, %v3933_v12  ;;  %4898 = vmatprep.subr.mxu0 %v4496_v26 }
0x238e   :  { %4899 = vmatpush3.msra.mxu0 %v4496_v26 }
0x238f   :  { %4900 = vmatprep.subr.mxu0 %v4495_v55 }
0x2390   :  { %4901 = vmatpush3.msra.mxu0 %v4495_v55 }
0x23ef   :  { %v4388_v49 = vpop.permute.xlu0 %4387 }
0x23f0   :  { %4390 = vst.msk [vmem:[#allocation3] sm:$0x3] %vm1420_vm8, %v4388_v49 }
0x23f3   :  { %v4157_v15 = vpop.permute.xlu0 %4156 }
0x23f4   :  { %4159 = vst.msk [vmem:[#allocation3 + $0x8] sm:$0x30] %vm1186_vm5, %v4157_v15 }
0x23f7   :  { %v4391_v52 = vld [vmem:[#allocation3] sm:$0xff] }
0x23f8   :  { %v4393_v10 = vmax.f32 %v4391_v52, 0.0 }
0x23fa   :  { %4883 = vmatprep.mubr.f32.mxu1 %v4393_v10 }
0x23fb   :  { %v4392_v48 = vld [vmem:[#allocation3 + $0x8] sm:$0xff] }
0x23fc   :  { %v4394_v23 = vmax.f32 %v4392_v48, 0.0 }
0x23fe   :  { %4884 = vmatmul.mubr.f32.vlgmr.msra.gmra.mxu1 %v4394_v23 }
0x24be   :  { %v4885_v37 = vpop.f32.mrf.mxu1 }
0x24bf   :  { %v4490_v32 = vadd.f32 %v4885_v37, %v4720_v0 }
0x24c0   :  { %v4484_v43 = vpop.f32.mrf.mxu1 }
0x24c1   :  { %v4485_v2 = vadd.f32 %v4720_v0, %v4484_v43  ;;  %v4494_v53 = vmax.f32 %v4490_v32, 0.0 }
0x24c3   :  { %v4493_v60 = vmax.f32 %v4485_v2, 0.0 }
0x24c5   :  { %4902 = vmatprep.mubr.msk.f32.mxu0 %vm219_vm1, %v4493_v60 }
0x24c6   :  { %4903 = vmatmul.mubr.msk.f32.vlgmr.msra.gmra.mxu0 %vm219_vm1, %v4494_v53 }
0x2586   :  { %v4904_v3 = vpop.f32.mrf.mxu0 }
0x2587   :  { %v4588_v29 = vadd.f32 %v4904_v3, %v4721_v56 }
0x2588   :  { %v4582_v4 = vpop.f32.mrf.mxu0 }
0x2589   :  { %v4592_v50 = vadd.f32 %v4588_v29, %v5361_v9  ;;  %v4583_v30 = vadd.f32 %v4721_v56, %v4582_v4 }
0x258b   :  { %4594 = vst.msk [vmem:[%s7378_s19 + $0x8] sm:$0xff] %vm78_vm0, %v4592_v50  ;;  %v4591_v40 = vadd.f32 %v4583_v30, %v5359_v8 }
0x258d   :  { %4593 = vst.msk [vmem:[%s7378_s19] sm:$0xff] %vm78_vm0, %v4591_v40 }

</bundles_post_ra>
